<compile_context>
chip_gen: v7x
topology: tpu7x:2x2x1
jax: 0.10.0
libtpu: 0.0.40
codegen_flags: <defaults>
</compile_context>

<pallas_src>
import functools

import jax
import jax.numpy as jnp
from jax import lax
from jax.experimental import pallas as pl
from jax.experimental.pallas import tpu as pltpu

EPS = 1e-5


# --------------------------------------------------------------------------
# Fused bottleneck kernel: one (batch, row-tile) step per grid point.
# --------------------------------------------------------------------------
def _bottleneck_kernel(xm_ref, xh_ref, w1_ref, b1_ref, w2_ref, b2_ref,
                       w3_ref, b3_ref, o_ref, xin_ref, acc_ref,
                       *, H, W, TH, dil):
    d = dil
    THp, Wp, _ = xin_ref.shape

    # Assemble the haloed (TH+2d, W+2d, Cin) input tile in VMEM from the
    # main block and the 2d-row halo block (non-overlapping BlockSpecs).
    xin_ref[0:TH] = xm_ref[0]
    xin_ref[TH:THp] = xh_ref[0]
    xin = xin_ref[...]                                    # f32

    ident = xin[d:d + TH, d:d + W, :]                     # identity (raw x)

    # ---- conv1 (1x1) + bn1 + relu (BN scale folded into w1) ---------------
    h1 = jnp.einsum("hwc,cp->hwp", xin.astype(w1_ref.dtype), w1_ref[...],
                    preferred_element_type=jnp.float32)
    h1 = jnp.maximum(h1 + b1_ref[0], 0.0)

    # Zero the positions that belong to conv2's zero-padding ring of out1.
    row = lax.broadcasted_iota(jnp.int32, (THp, Wp, 1), 0) + pl.program_id(1) * TH
    col = lax.broadcasted_iota(jnp.int32, (THp, Wp, 1), 1)
    valid = (row >= d) & (row < H + d) & (col >= d) & (col < W + d)
    h1 = jnp.where(valid, h1, 0.0).astype(w2_ref.dtype)   # (THp, Wp, P)

    # ---- conv2 (3x3, dilation d) + bn2 + relu -----------------------------
    # Three width-W views taken once (W = sublane axis) instead of 9 shifted
    # slices; per-tap row offsets stay on the cheap H axis.
    acc_ref[...] = jnp.zeros_like(acc_ref)
    shifted = [h1[:, kw * d:kw * d + W, :] for kw in range(3)]
    for kh in range(3):
        for kw in range(3):
            acc_ref[...] += jnp.einsum(
                "hwc,cp->hwp", shifted[kw][kh * d:kh * d + TH],
                w2_ref[kh, kw], preferred_element_type=jnp.float32)
    h2 = jnp.maximum(acc_ref[...] + b2_ref[0], 0.0).astype(w3_ref.dtype)

    # ---- conv3 (1x1) + bn3 + identity + relu ------------------------------
    y = jnp.einsum("hwp,pq->hwq", h2, w3_ref[...],
                   preferred_element_type=jnp.float32)
    y = jnp.maximum(y + b3_ref[0] + ident, 0.0)
    o_ref[0] = y.astype(o_ref.dtype)


# --------------------------------------------------------------------------
# Host-side glue
# --------------------------------------------------------------------------
def _fold_bn(gamma, beta, mean, var):
    scale = gamma / jnp.sqrt(var + EPS)
    bias = beta - mean * scale
    return scale, bias


def _pick_tile_h(H, dil, target=32):
    """Largest row-tile height <= target that divides H and is a multiple of 2*dil."""
    step = 2 * dil
    best, t = 0, step
    while t <= max(min(H, target), step):
        if H % t == 0:
            best = t
        t += step
    if best == 0:
        raise ValueError(f"H={H} has no row tile that is a multiple of {step}; "
                         "pass tile_h explicitly or pad H")
    return best


def bottleneck_forward(x, params, *, dilation=1, tile_h=None,
                       mm_dtype=jnp.float32):
    """x: [N, H, W, inplanes] NHWC; inplanes == planes*4 (downsample=None)."""
    N, H, W, cin = x.shape
    planes = params["w1"].shape[1]
    cout = params["w3"].shape[1]
    assert cin == cout, "downsample=None requires inplanes == planes*expansion"
    d = dilation

    TH = tile_h if tile_h is not None else _pick_tile_h(H, d)
    assert H % TH == 0 and TH % (2 * d) == 0, (H, TH, d)
    THp, Wp = TH + 2 * d, W + 2 * d
    n_th = H // TH
    halo_stride = TH // (2 * d)        # halo block (size 2d) index stride

    s1, b1 = _fold_bn(params["g1"], params["be1"], params["m1"], params["v1"])
    s2, b2 = _fold_bn(params["g2"], params["be2"], params["m2"], params["v2"])
    s3, b3 = _fold_bn(params["g3"], params["be3"], params["m3"], params["v3"])

    # Fold BN scales into the conv weights at trace time (free at run time).
    w1s = (params["w1"] * s1[None, :]).astype(mm_dtype)
    w2s = (params["w2"] * s2[None, None, None, :]).astype(mm_dtype)
    w3s = (params["w3"] * s3[None, :]).astype(mm_dtype)
    b1 = b1.reshape(1, -1)
    b2 = b2.reshape(1, -1)
    b3 = b3.reshape(1, -1)

    # Single small pad of x in H and W; all other padding is handled in VMEM.
    x_pad = jnp.pad(x, ((0, 0), (d, d), (d, d), (0, 0)))

    kern = functools.partial(_bottleneck_kernel, H=H, W=W, TH=TH, dil=d)
    return pl.pallas_call(
        kern,
        out_shape=jax.ShapeDtypeStruct((N, H, W, cout), x.dtype),
        grid=(N, n_th),
        in_specs=[
            # main rows [i*TH, i*TH + TH) of the padded input
            pl.BlockSpec((1, TH, Wp, cin), lambda n, i: (n, i, 0, 0)),
            # halo rows [i*TH + TH, i*TH + TH + 2d) of the padded input
            pl.BlockSpec((1, 2 * d, Wp, cin),
                         lambda n, i: (n, (i + 1) * halo_stride, 0, 0)),
            pl.BlockSpec((cin, planes), lambda n, i: (0, 0)),
            pl.BlockSpec((1, planes), lambda n, i: (0, 0)),
            pl.BlockSpec((3, 3, planes, planes), lambda n, i: (0, 0, 0, 0)),
            pl.BlockSpec((1, planes), lambda n, i: (0, 0)),
            pl.BlockSpec((planes, cout), lambda n, i: (0, 0)),
            pl.BlockSpec((1, cout), lambda n, i: (0, 0)),
        ],
        out_specs=pl.BlockSpec((1, TH, W, cout), lambda n, i: (n, i, 0, 0)),
        scratch_shapes=[
            pltpu.VMEM((THp, Wp, cin), jnp.float32),   # haloed x tile
            pltpu.VMEM((TH, W, planes), jnp.float32),  # conv2 accumulator
        ],
        compiler_params=pltpu.CompilerParams(
            dimension_semantics=("parallel", "parallel"),
            vmem_limit_bytes=64 * 1024 * 1024),
    )(x_pad, x_pad, w1s, b1, w2s, b2, w3s, b3)


# --------------------------------------------------------------------------
# Pure-JAX reference (same math, via lax.conv) for correctness checking
# --------------------------------------------------------------------------
def bottleneck_ref(x, params, *, dilation=1):
    def bn(y, g, be, m, v):
        return (y - m) / jnp.sqrt(v + EPS) * g + be

    out = jnp.einsum("nhwc,cd->nhwd", x, params["w1"])
    out = jax.nn.relu(bn(out, params["g1"], params["be1"], params["m1"], params["v1"]))
    out = lax.conv_general_dilated(
        out, params["w2"], window_strides=(1, 1),
        padding=[(dilation, dilation), (dilation, dilation)],
        rhs_dilation=(dilation, dilation),
        dimension_numbers=("NHWC", "HWIO", "NHWC"))
    out = jax.nn.relu(bn(out, params["g2"], params["be2"], params["m2"], params["v2"]))
    out = jnp.einsum("nhwc,cd->nhwd", out, params["w3"])
    out = bn(out, params["g3"], params["be3"], params["m3"], params["v3"])
    out = out + x
    return jax.nn.relu(out)


def init_params(key, inplanes, planes):
    expansion = 4
    ks = jax.random.split(key, 15)
    p = {
        "w1": 0.1 * jax.random.normal(ks[0], (inplanes, planes), jnp.float32),
        "w2": 0.1 * jax.random.normal(ks[1], (3, 3, planes, planes), jnp.float32),
        "w3": 0.1 * jax.random.normal(ks[2], (planes, planes * expansion), jnp.float32),
    }
    for i, c in zip((1, 2, 3), (planes, planes, planes * expansion)):
        base = 3 + (i - 1) * 4
        p[f"g{i}"] = 1.0 + 0.1 * jax.random.normal(ks[base + 0], (c,), jnp.float32)
        p[f"be{i}"] = 0.1 * jax.random.normal(ks[base + 1], (c,), jnp.float32)
        p[f"m{i}"] = 0.1 * jax.random.normal(ks[base + 2], (c,), jnp.float32)
        p[f"v{i}"] = jax.random.uniform(ks[base + 3], (c,), jnp.float32, 0.5, 1.5)
    return p


if __name__ == "__main__":
    # Small shapes: batch=2, planes=8 (expansion=4 -> inplanes=32), spatial 16x16.
    # NOTE: production ResNet channel counts (multiples of 128) keep the output
    # lane-dense; the toy widths here under-fill the MXU/store path by design.
    N, H, W = 2, 16, 16
    planes = 8
    inplanes = planes * 4  # == planes * expansion, so downsample=None is valid

    key = jax.random.PRNGKey(0)
    kx, kp = jax.random.split(key)
    x = jax.random.normal(kx, (N, H, W, inplanes), jnp.float32)
    params = init_params(kp, inplanes, planes)

    ref = bottleneck_ref(x, params, dilation=1)

    # f32 MXU path: tight check against the pure-JAX reference.
    out = jax.block_until_ready(bottleneck_forward(x, params, dilation=1, tile_h=8))
    assert out.shape == (N, H, W, planes * 4)
    assert jnp.allclose(out, ref, rtol=1e-4, atol=1e-4), (
        float(jnp.max(jnp.abs(out - ref))))

    # bf16 MXU inputs / f32 accumulation (v6e/v7x fast path): sanity check.
    out_bf16 = jax.block_until_ready(
        bottleneck_forward(x, params, dilation=1, tile_h=8, mm_dtype=jnp.bfloat16))
    assert bool(jnp.all(jnp.isfinite(out_bf16)))
    assert float(jnp.max(jnp.abs(out_bf16 - ref))) < 0.25

    print("KERNEL_OK")
</pallas_src>

<mosaic_0001>
module attributes {stable_mosaic.version = 11 : i64} {
  func.func @_bottleneck_kernel(%arg0: i32, %arg1: i32, %arg2: memref<1x8x18x32xf32, #tpu.memory_space<vmem>>, %arg3: memref<1x2x18x32xf32, #tpu.memory_space<vmem>>, %arg4: memref<32x8xf32, #tpu.memory_space<vmem>>, %arg5: memref<1x8xf32, #tpu.memory_space<vmem>>, %arg6: memref<3x3x8x8xf32, #tpu.memory_space<vmem>>, %arg7: memref<1x8xf32, #tpu.memory_space<vmem>>, %arg8: memref<8x32xf32, #tpu.memory_space<vmem>>, %arg9: memref<1x32xf32, #tpu.memory_space<vmem>>, %arg10: memref<1x8x16x32xf32, #tpu.memory_space<vmem>>, %arg11: memref<10x18x32xf32, #tpu.memory_space<vmem>>, %arg12: memref<8x16x8xf32, #tpu.memory_space<vmem>>) attributes {dimension_semantics = [#tpu.dimension_semantics<parallel>, #tpu.dimension_semantics<parallel>], iteration_bounds = array<i64: 2, 2>, scalar_prefetch = 0 : i64, scratch_operands = 2 : i64, tpu.core_type = #tpu.core_type<tc>, window_params = [{transform_indices = @transform_0, window_bounds = array<i64: 1, 8, 18, 32>}, {transform_indices = @transform_1, window_bounds = array<i64: 1, 2, 18, 32>}, {pipeline_mode = #tpu.pipeline_mode<synchronous>, transform_indices = @transform_2, window_bounds = array<i64: 32, 8>}, {pipeline_mode = #tpu.pipeline_mode<synchronous>, transform_indices = @transform_3, window_bounds = array<i64: 1, 8>}, {pipeline_mode = #tpu.pipeline_mode<synchronous>, transform_indices = @transform_4, window_bounds = array<i64: 3, 3, 8, 8>}, {pipeline_mode = #tpu.pipeline_mode<synchronous>, transform_indices = @transform_5, window_bounds = array<i64: 1, 8>}, {pipeline_mode = #tpu.pipeline_mode<synchronous>, transform_indices = @transform_6, window_bounds = array<i64: 8, 32>}, {pipeline_mode = #tpu.pipeline_mode<synchronous>, transform_indices = @transform_7, window_bounds = array<i64: 1, 32>}, {transform_indices = @transform_8, window_bounds = array<i64: 1, 8, 16, 32>}]} {
    %c0 = arith.constant 0 : index
    %c0_0 = arith.constant 0 : index
    %c0_1 = arith.constant 0 : index
    %c0_2 = arith.constant 0 : index
    %0 = vector.load %arg2[%c0, %c0_0, %c0_1, %c0_2] : memref<1x8x18x32xf32, #tpu.memory_space<vmem>>, vector<1x8x18x32xf32>
    %1 = vector.shape_cast %0 : vector<1x8x18x32xf32> to vector<8x18x32xf32>
    %c0_3 = arith.constant 0 : index
    %c0_4 = arith.constant 0 : index
    %c0_5 = arith.constant 0 : index
    %2 = vector.load %arg11[%c0_3, %c0_4, %c0_5] : memref<10x18x32xf32, #tpu.memory_space<vmem>>, vector<8x18x32xf32>
    tpu.vector_store %arg11[%c0_3, %c0_4, %c0_5], %1 {strides = array<i32>} : memref<10x18x32xf32, #tpu.memory_space<vmem>>, vector<8x18x32xf32>,
    %c0_6 = arith.constant 0 : index
    %c0_7 = arith.constant 0 : index
    %c0_8 = arith.constant 0 : index
    %c0_9 = arith.constant 0 : index
    %3 = vector.load %arg3[%c0_6, %c0_7, %c0_8, %c0_9] : memref<1x2x18x32xf32, #tpu.memory_space<vmem>>, vector<1x2x18x32xf32>
    %4 = vector.shape_cast %3 : vector<1x2x18x32xf32> to vector<2x18x32xf32>
    %c8 = arith.constant 8 : index
    %c0_10 = arith.constant 0 : index
    %c0_11 = arith.constant 0 : index
    %5 = vector.load %arg11[%c8, %c0_10, %c0_11] : memref<10x18x32xf32, #tpu.memory_space<vmem>>, vector<2x18x32xf32>
    tpu.vector_store %arg11[%c8, %c0_10, %c0_11], %4 {strides = array<i32>} : memref<10x18x32xf32, #tpu.memory_space<vmem>>, vector<2x18x32xf32>,
    %c0_12 = arith.constant 0 : index
    %c0_13 = arith.constant 0 : index
    %c0_14 = arith.constant 0 : index
    %6 = vector.load %arg11[%c0_12, %c0_13, %c0_14] : memref<10x18x32xf32, #tpu.memory_space<vmem>>, vector<10x18x32xf32>
    %7 = vector.extract_strided_slice %6 {offsets = [1, 1, 0], sizes = [8, 16, 32], strides = [1, 1, 1]} : vector<10x18x32xf32> to vector<8x16x32xf32>
    %c0_15 = arith.constant 0 : index
    %c0_16 = arith.constant 0 : index
    %8 = vector.load %arg4[%c0_15, %c0_16] : memref<32x8xf32, #tpu.memory_space<vmem>>, vector<32x8xf32>
    "tpu.trace_start"() <{level = 10 : i32, message = "hwc,cp->hwp"}> : () -> ()
    %cst = arith.constant dense<0.000000e+00> : vector<10x18x8xf32>
    %9 = tpu.matmul %6, %8, %cst {dimension_numbers = #tpu.dot_dimension_numbers<[2], [0], [0, 1], [1], [0, 0, 0, 1, 1, 1], [], []>} : vector<10x18x32xf32>, vector<32x8xf32>, vector<10x18x8xf32> -> vector<10x18x8xf32>
    "tpu.trace_stop"() : () -> ()
    %c0_17 = arith.constant 0 : index
    %c0_18 = arith.constant 0 : index
    %10 = vector.load %arg5[%c0_17, %c0_18] : memref<1x8xf32, #tpu.memory_space<vmem>>, vector<1x8xf32>
    %11 = vector.shape_cast %10 : vector<1x8xf32> to vector<8xf32>
    %12 = vector.shape_cast %11 : vector<8xf32> to vector<1x1x8xf32>
    %13 = vector.broadcast %12 : vector<1x1x8xf32> to vector<10x18x8xf32>
    %14 = arith.addf %9, %13 : vector<10x18x8xf32>
    %cst_19 = arith.constant 0.000000e+00 : f32
    %15 = vector.broadcast %cst_19 : f32 to vector<10x18x8xf32>
    %16 = arith.maximumf %14, %15 : vector<10x18x8xf32>
    %17 = tpu.iota {dimensions = array<i32: 0>} : vector<10x18x1xi32>
    %c8_i32 = arith.constant 8 : i32
    %18 = arith.muli %arg1, %c8_i32 : i32
    %19 = vector.broadcast %18 : i32 to vector<10x18x1xi32>
    %20 = arith.addi %17, %19 : vector<10x18x1xi32>
    %21 = tpu.iota {dimensions = array<i32: 1>} : vector<10x18x1xi32>
    %c1_i32 = arith.constant 1 : i32
    %22 = vector.broadcast %c1_i32 : i32 to vector<10x18x1xi32>
    %23 = arith.cmpi sge, %20, %22 : vector<10x18x1xi32>
    %c17_i32 = arith.constant 17 : i32
    %24 = vector.broadcast %c17_i32 : i32 to vector<10x18x1xi32>
    %25 = arith.cmpi slt, %20, %24 : vector<10x18x1xi32>
    %26 = arith.andi %23, %25 : vector<10x18x1xi1>
    %c1_i32_20 = arith.constant 1 : i32
    %27 = vector.broadcast %c1_i32_20 : i32 to vector<10x18x1xi32>
    %28 = arith.cmpi sge, %21, %27 : vector<10x18x1xi32>
    %29 = arith.andi %26, %28 : vector<10x18x1xi1>
    %c17_i32_21 = arith.constant 17 : i32
    %30 = vector.broadcast %c17_i32_21 : i32 to vector<10x18x1xi32>
    %31 = arith.cmpi slt, %21, %30 : vector<10x18x1xi32>
    %32 = arith.andi %29, %31 : vector<10x18x1xi1>
    %cst_22 = arith.constant 0.000000e+00 : f32
    %33 = vector.shape_cast %32 : vector<10x18x1xi1> to vector<10x18x1xi1>
    %34 = vector.broadcast %33 : vector<10x18x1xi1> to vector<10x18x8xi1>
    %35 = vector.broadcast %cst_22 : f32 to vector<10x18x8xf32>
    %36 = arith.select %34, %16, %35 : vector<10x18x8xi1>, vector<10x18x8xf32>
    %cst_23 = arith.constant 0.000000e+00 : f32
    %37 = vector.broadcast %cst_23 : f32 to vector<8x16x8xf32>
    %c0_24 = arith.constant 0 : index
    %c0_25 = arith.constant 0 : index
    %c0_26 = arith.constant 0 : index
    %38 = vector.load %arg12[%c0_24, %c0_25, %c0_26] : memref<8x16x8xf32, #tpu.memory_space<vmem>>, vector<8x16x8xf32>
    tpu.vector_store %arg12[%c0_24, %c0_25, %c0_26], %37 {strides = array<i32>} : memref<8x16x8xf32, #tpu.memory_space<vmem>>, vector<8x16x8xf32>,
    %39 = vector.extract_strided_slice %36 {offsets = [0, 0, 0], sizes = [10, 16, 8], strides = [1, 1, 1]} : vector<10x18x8xf32> to vector<10x16x8xf32>
    %40 = vector.extract_strided_slice %36 {offsets = [0, 1, 0], sizes = [10, 16, 8], strides = [1, 1, 1]} : vector<10x18x8xf32> to vector<10x16x8xf32>
    %41 = vector.extract_strided_slice %36 {offsets = [0, 2, 0], sizes = [10, 16, 8], strides = [1, 1, 1]} : vector<10x18x8xf32> to vector<10x16x8xf32>
    %c0_27 = arith.constant 0 : index
    %c0_28 = arith.constant 0 : index
    %c0_29 = arith.constant 0 : index
    %42 = vector.load %arg12[%c0_27, %c0_28, %c0_29] : memref<8x16x8xf32, #tpu.memory_space<vmem>>, vector<8x16x8xf32>
    %43 = vector.extract_strided_slice %39 {offsets = [0, 0, 0], sizes = [8, 16, 8], strides = [1, 1, 1]} : vector<10x16x8xf32> to vector<8x16x8xf32>
    %c0_30 = arith.constant 0 : index
    %c0_31 = arith.constant 0 : index
    %c0_32 = arith.constant 0 : index
    %c0_33 = arith.constant 0 : index
    %44 = vector.load %arg6[%c0_30, %c0_31, %c0_32, %c0_33] : memref<3x3x8x8xf32, #tpu.memory_space<vmem>>, vector<1x1x8x8xf32>
    %45 = vector.shape_cast %44 : vector<1x1x8x8xf32> to vector<8x8xf32>
    "tpu.trace_start"() <{level = 10 : i32, message = "hwc,cp->hwp"}> : () -> ()
    %cst_34 = arith.constant dense<0.000000e+00> : vector<8x16x8xf32>
    %46 = tpu.matmul %43, %45, %cst_34 {dimension_numbers = #tpu.dot_dimension_numbers<[2], [0], [0, 1], [1], [0, 0, 0, 1, 1, 1], [], []>} : vector<8x16x8xf32>, vector<8x8xf32>, vector<8x16x8xf32> -> vector<8x16x8xf32>
    "tpu.trace_stop"() : () -> ()
    %47 = arith.addf %42, %46 : vector<8x16x8xf32>
    %c0_35 = arith.constant 0 : index
    %c0_36 = arith.constant 0 : index
    %c0_37 = arith.constant 0 : index
    %48 = vector.load %arg12[%c0_35, %c0_36, %c0_37] : memref<8x16x8xf32, #tpu.memory_space<vmem>>, vector<8x16x8xf32>
    tpu.vector_store %arg12[%c0_35, %c0_36, %c0_37], %47 {strides = array<i32>} : memref<8x16x8xf32, #tpu.memory_space<vmem>>, vector<8x16x8xf32>,
    %c0_38 = arith.constant 0 : index
    %c0_39 = arith.constant 0 : index
    %c0_40 = arith.constant 0 : index
    %49 = vector.load %arg12[%c0_38, %c0_39, %c0_40] : memref<8x16x8xf32, #tpu.memory_space<vmem>>, vector<8x16x8xf32>
    %50 = vector.extract_strided_slice %40 {offsets = [0, 0, 0], sizes = [8, 16, 8], strides = [1, 1, 1]} : vector<10x16x8xf32> to vector<8x16x8xf32>
    %c0_41 = arith.constant 0 : index
    %c1 = arith.constant 1 : index
    %c0_42 = arith.constant 0 : index
    %c0_43 = arith.constant 0 : index
    %51 = vector.load %arg6[%c0_41, %c1, %c0_42, %c0_43] : memref<3x3x8x8xf32, #tpu.memory_space<vmem>>, vector<1x1x8x8xf32>
    %52 = vector.shape_cast %51 : vector<1x1x8x8xf32> to vector<8x8xf32>
    "tpu.trace_start"() <{level = 10 : i32, message = "hwc,cp->hwp"}> : () -> ()
    %cst_44 = arith.constant dense<0.000000e+00> : vector<8x16x8xf32>
    %53 = tpu.matmul %50, %52, %cst_44 {dimension_numbers = #tpu.dot_dimension_numbers<[2], [0], [0, 1], [1], [0, 0, 0, 1, 1, 1], [], []>} : vector<8x16x8xf32>, vector<8x8xf32>, vector<8x16x8xf32> -> vector<8x16x8xf32>
    "tpu.trace_stop"() : () -> ()
    %54 = arith.addf %49, %53 : vector<8x16x8xf32>
    %c0_45 = arith.constant 0 : index
    %c0_46 = arith.constant 0 : index
    %c0_47 = arith.constant 0 : index
    %55 = vector.load %arg12[%c0_45, %c0_46, %c0_47] : memref<8x16x8xf32, #tpu.memory_space<vmem>>, vector<8x16x8xf32>
    tpu.vector_store %arg12[%c0_45, %c0_46, %c0_47], %54 {strides = array<i32>} : memref<8x16x8xf32, #tpu.memory_space<vmem>>, vector<8x16x8xf32>,
    %c0_48 = arith.constant 0 : index
    %c0_49 = arith.constant 0 : index
    %c0_50 = arith.constant 0 : index
    %56 = vector.load %arg12[%c0_48, %c0_49, %c0_50] : memref<8x16x8xf32, #tpu.memory_space<vmem>>, vector<8x16x8xf32>
    %57 = vector.extract_strided_slice %41 {offsets = [0, 0, 0], sizes = [8, 16, 8], strides = [1, 1, 1]} : vector<10x16x8xf32> to vector<8x16x8xf32>
    %c0_51 = arith.constant 0 : index
    %c2 = arith.constant 2 : index
    %c0_52 = arith.constant 0 : index
    %c0_53 = arith.constant 0 : index
    %58 = vector.load %arg6[%c0_51, %c2, %c0_52, %c0_53] : memref<3x3x8x8xf32, #tpu.memory_space<vmem>>, vector<1x1x8x8xf32>
    %59 = vector.shape_cast %58 : vector<1x1x8x8xf32> to vector<8x8xf32>
    "tpu.trace_start"() <{level = 10 : i32, message = "hwc,cp->hwp"}> : () -> ()
    %cst_54 = arith.constant dense<0.000000e+00> : vector<8x16x8xf32>
    %60 = tpu.matmul %57, %59, %cst_54 {dimension_numbers = #tpu.dot_dimension_numbers<[2], [0], [0, 1], [1], [0, 0, 0, 1, 1, 1], [], []>} : vector<8x16x8xf32>, vector<8x8xf32>, vector<8x16x8xf32> -> vector<8x16x8xf32>
    "tpu.trace_stop"() : () -> ()
    %61 = arith.addf %56, %60 : vector<8x16x8xf32>
    %c0_55 = arith.constant 0 : index
    %c0_56 = arith.constant 0 : index
    %c0_57 = arith.constant 0 : index
    %62 = vector.load %arg12[%c0_55, %c0_56, %c0_57] : memref<8x16x8xf32, #tpu.memory_space<vmem>>, vector<8x16x8xf32>
    tpu.vector_store %arg12[%c0_55, %c0_56, %c0_57], %61 {strides = array<i32>} : memref<8x16x8xf32, #tpu.memory_space<vmem>>, vector<8x16x8xf32>,
    %c0_58 = arith.constant 0 : index
    %c0_59 = arith.constant 0 : index
    %c0_60 = arith.constant 0 : index
    %63 = vector.load %arg12[%c0_58, %c0_59, %c0_60] : memref<8x16x8xf32, #tpu.memory_space<vmem>>, vector<8x16x8xf32>
    %64 = vector.extract_strided_slice %39 {offsets = [1, 0, 0], sizes = [8, 16, 8], strides = [1, 1, 1]} : vector<10x16x8xf32> to vector<8x16x8xf32>
    %c1_61 = arith.constant 1 : index
    %c0_62 = arith.constant 0 : index
    %c0_63 = arith.constant 0 : index
    %c0_64 = arith.constant 0 : index
    %65 = vector.load %arg6[%c1_61, %c0_62, %c0_63, %c0_64] : memref<3x3x8x8xf32, #tpu.memory_space<vmem>>, vector<1x1x8x8xf32>
    %66 = vector.shape_cast %65 : vector<1x1x8x8xf32> to vector<8x8xf32>
    "tpu.trace_start"() <{level = 10 : i32, message = "hwc,cp->hwp"}> : () -> ()
    %cst_65 = arith.constant dense<0.000000e+00> : vector<8x16x8xf32>
    %67 = tpu.matmul %64, %66, %cst_65 {dimension_numbers = #tpu.dot_dimension_numbers<[2], [0], [0, 1], [1], [0, 0, 0, 1, 1, 1], [], []>} : vector<8x16x8xf32>, vector<8x8xf32>, vector<8x16x8xf32> -> vector<8x16x8xf32>
    "tpu.trace_stop"() : () -> ()
    %68 = arith.addf %63, %67 : vector<8x16x8xf32>
    %c0_66 = arith.constant 0 : index
    %c0_67 = arith.constant 0 : index
    %c0_68 = arith.constant 0 : index
    %69 = vector.load %arg12[%c0_66, %c0_67, %c0_68] : memref<8x16x8xf32, #tpu.memory_space<vmem>>, vector<8x16x8xf32>
    tpu.vector_store %arg12[%c0_66, %c0_67, %c0_68], %68 {strides = array<i32>} : memref<8x16x8xf32, #tpu.memory_space<vmem>>, vector<8x16x8xf32>,
    %c0_69 = arith.constant 0 : index
    %c0_70 = arith.constant 0 : index
    %c0_71 = arith.constant 0 : index
    %70 = vector.load %arg12[%c0_69, %c0_70, %c0_71] : memref<8x16x8xf32, #tpu.memory_space<vmem>>, vector<8x16x8xf32>
    %71 = vector.extract_strided_slice %40 {offsets = [1, 0, 0], sizes = [8, 16, 8], strides = [1, 1, 1]} : vector<10x16x8xf32> to vector<8x16x8xf32>
    %c1_72 = arith.constant 1 : index
    %c1_73 = arith.constant 1 : index
    %c0_74 = arith.constant 0 : index
    %c0_75 = arith.constant 0 : index
    %72 = vector.load %arg6[%c1_72, %c1_73, %c0_74, %c0_75] : memref<3x3x8x8xf32, #tpu.memory_space<vmem>>, vector<1x1x8x8xf32>
    %73 = vector.shape_cast %72 : vector<1x1x8x8xf32> to vector<8x8xf32>
    "tpu.trace_start"() <{level = 10 : i32, message = "hwc,cp->hwp"}> : () -> ()
    %cst_76 = arith.constant dense<0.000000e+00> : vector<8x16x8xf32>
    %74 = tpu.matmul %71, %73, %cst_76 {dimension_numbers = #tpu.dot_dimension_numbers<[2], [0], [0, 1], [1], [0, 0, 0, 1, 1, 1], [], []>} : vector<8x16x8xf32>, vector<8x8xf32>, vector<8x16x8xf32> -> vector<8x16x8xf32>
    "tpu.trace_stop"() : () -> ()
    %75 = arith.addf %70, %74 : vector<8x16x8xf32>
    %c0_77 = arith.constant 0 : index
    %c0_78 = arith.constant 0 : index
    %c0_79 = arith.constant 0 : index
    %76 = vector.load %arg12[%c0_77, %c0_78, %c0_79] : memref<8x16x8xf32, #tpu.memory_space<vmem>>, vector<8x16x8xf32>
    tpu.vector_store %arg12[%c0_77, %c0_78, %c0_79], %75 {strides = array<i32>} : memref<8x16x8xf32, #tpu.memory_space<vmem>>, vector<8x16x8xf32>,
    %c0_80 = arith.constant 0 : index
    %c0_81 = arith.constant 0 : index
    %c0_82 = arith.constant 0 : index
    %77 = vector.load %arg12[%c0_80, %c0_81, %c0_82] : memref<8x16x8xf32, #tpu.memory_space<vmem>>, vector<8x16x8xf32>
    %78 = vector.extract_strided_slice %41 {offsets = [1, 0, 0], sizes = [8, 16, 8], strides = [1, 1, 1]} : vector<10x16x8xf32> to vector<8x16x8xf32>
    %c1_83 = arith.constant 1 : index
    %c2_84 = arith.constant 2 : index
    %c0_85 = arith.constant 0 : index
    %c0_86 = arith.constant 0 : index
    %79 = vector.load %arg6[%c1_83, %c2_84, %c0_85, %c0_86] : memref<3x3x8x8xf32, #tpu.memory_space<vmem>>, vector<1x1x8x8xf32>
    %80 = vector.shape_cast %79 : vector<1x1x8x8xf32> to vector<8x8xf32>
    "tpu.trace_start"() <{level = 10 : i32, message = "hwc,cp->hwp"}> : () -> ()
    %cst_87 = arith.constant dense<0.000000e+00> : vector<8x16x8xf32>
    %81 = tpu.matmul %78, %80, %cst_87 {dimension_numbers = #tpu.dot_dimension_numbers<[2], [0], [0, 1], [1], [0, 0, 0, 1, 1, 1], [], []>} : vector<8x16x8xf32>, vector<8x8xf32>, vector<8x16x8xf32> -> vector<8x16x8xf32>
    "tpu.trace_stop"() : () -> ()
    %82 = arith.addf %77, %81 : vector<8x16x8xf32>
    %c0_88 = arith.constant 0 : index
    %c0_89 = arith.constant 0 : index
    %c0_90 = arith.constant 0 : index
    %83 = vector.load %arg12[%c0_88, %c0_89, %c0_90] : memref<8x16x8xf32, #tpu.memory_space<vmem>>, vector<8x16x8xf32>
    tpu.vector_store %arg12[%c0_88, %c0_89, %c0_90], %82 {strides = array<i32>} : memref<8x16x8xf32, #tpu.memory_space<vmem>>, vector<8x16x8xf32>,
    %c0_91 = arith.constant 0 : index
    %c0_92 = arith.constant 0 : index
    %c0_93 = arith.constant 0 : index
    %84 = vector.load %arg12[%c0_91, %c0_92, %c0_93] : memref<8x16x8xf32, #tpu.memory_space<vmem>>, vector<8x16x8xf32>
    %85 = vector.extract_strided_slice %39 {offsets = [2, 0, 0], sizes = [8, 16, 8], strides = [1, 1, 1]} : vector<10x16x8xf32> to vector<8x16x8xf32>
    %c2_94 = arith.constant 2 : index
    %c0_95 = arith.constant 0 : index
    %c0_96 = arith.constant 0 : index
    %c0_97 = arith.constant 0 : index
    %86 = vector.load %arg6[%c2_94, %c0_95, %c0_96, %c0_97] : memref<3x3x8x8xf32, #tpu.memory_space<vmem>>, vector<1x1x8x8xf32>
    %87 = vector.shape_cast %86 : vector<1x1x8x8xf32> to vector<8x8xf32>
    "tpu.trace_start"() <{level = 10 : i32, message = "hwc,cp->hwp"}> : () -> ()
    %cst_98 = arith.constant dense<0.000000e+00> : vector<8x16x8xf32>
    %88 = tpu.matmul %85, %87, %cst_98 {dimension_numbers = #tpu.dot_dimension_numbers<[2], [0], [0, 1], [1], [0, 0, 0, 1, 1, 1], [], []>} : vector<8x16x8xf32>, vector<8x8xf32>, vector<8x16x8xf32> -> vector<8x16x8xf32>
    "tpu.trace_stop"() : () -> ()
    %89 = arith.addf %84, %88 : vector<8x16x8xf32>
    %c0_99 = arith.constant 0 : index
    %c0_100 = arith.constant 0 : index
    %c0_101 = arith.constant 0 : index
    %90 = vector.load %arg12[%c0_99, %c0_100, %c0_101] : memref<8x16x8xf32, #tpu.memory_space<vmem>>, vector<8x16x8xf32>
    tpu.vector_store %arg12[%c0_99, %c0_100, %c0_101], %89 {strides = array<i32>} : memref<8x16x8xf32, #tpu.memory_space<vmem>>, vector<8x16x8xf32>,
    %c0_102 = arith.constant 0 : index
    %c0_103 = arith.constant 0 : index
    %c0_104 = arith.constant 0 : index
    %91 = vector.load %arg12[%c0_102, %c0_103, %c0_104] : memref<8x16x8xf32, #tpu.memory_space<vmem>>, vector<8x16x8xf32>
    %92 = vector.extract_strided_slice %40 {offsets = [2, 0, 0], sizes = [8, 16, 8], strides = [1, 1, 1]} : vector<10x16x8xf32> to vector<8x16x8xf32>
    %c2_105 = arith.constant 2 : index
    %c1_106 = arith.constant 1 : index
    %c0_107 = arith.constant 0 : index
    %c0_108 = arith.constant 0 : index
    %93 = vector.load %arg6[%c2_105, %c1_106, %c0_107, %c0_108] : memref<3x3x8x8xf32, #tpu.memory_space<vmem>>, vector<1x1x8x8xf32>
    %94 = vector.shape_cast %93 : vector<1x1x8x8xf32> to vector<8x8xf32>
    "tpu.trace_start"() <{level = 10 : i32, message = "hwc,cp->hwp"}> : () -> ()
    %cst_109 = arith.constant dense<0.000000e+00> : vector<8x16x8xf32>
    %95 = tpu.matmul %92, %94, %cst_109 {dimension_numbers = #tpu.dot_dimension_numbers<[2], [0], [0, 1], [1], [0, 0, 0, 1, 1, 1], [], []>} : vector<8x16x8xf32>, vector<8x8xf32>, vector<8x16x8xf32> -> vector<8x16x8xf32>
    "tpu.trace_stop"() : () -> ()
    %96 = arith.addf %91, %95 : vector<8x16x8xf32>
    %c0_110 = arith.constant 0 : index
    %c0_111 = arith.constant 0 : index
    %c0_112 = arith.constant 0 : index
    %97 = vector.load %arg12[%c0_110, %c0_111, %c0_112] : memref<8x16x8xf32, #tpu.memory_space<vmem>>, vector<8x16x8xf32>
    tpu.vector_store %arg12[%c0_110, %c0_111, %c0_112], %96 {strides = array<i32>} : memref<8x16x8xf32, #tpu.memory_space<vmem>>, vector<8x16x8xf32>,
    %c0_113 = arith.constant 0 : index
    %c0_114 = arith.constant 0 : index
    %c0_115 = arith.constant 0 : index
    %98 = vector.load %arg12[%c0_113, %c0_114, %c0_115] : memref<8x16x8xf32, #tpu.memory_space<vmem>>, vector<8x16x8xf32>
    %99 = vector.extract_strided_slice %41 {offsets = [2, 0, 0], sizes = [8, 16, 8], strides = [1, 1, 1]} : vector<10x16x8xf32> to vector<8x16x8xf32>
    %c2_116 = arith.constant 2 : index
    %c2_117 = arith.constant 2 : index
    %c0_118 = arith.constant 0 : index
    %c0_119 = arith.constant 0 : index
    %100 = vector.load %arg6[%c2_116, %c2_117, %c0_118, %c0_119] : memref<3x3x8x8xf32, #tpu.memory_space<vmem>>, vector<1x1x8x8xf32>
    %101 = vector.shape_cast %100 : vector<1x1x8x8xf32> to vector<8x8xf32>
    "tpu.trace_start"() <{level = 10 : i32, message = "hwc,cp->hwp"}> : () -> ()
    %cst_120 = arith.constant dense<0.000000e+00> : vector<8x16x8xf32>
    %102 = tpu.matmul %99, %101, %cst_120 {dimension_numbers = #tpu.dot_dimension_numbers<[2], [0], [0, 1], [1], [0, 0, 0, 1, 1, 1], [], []>} : vector<8x16x8xf32>, vector<8x8xf32>, vector<8x16x8xf32> -> vector<8x16x8xf32>
    "tpu.trace_stop"() : () -> ()
    %103 = arith.addf %98, %102 : vector<8x16x8xf32>
    %c0_121 = arith.constant 0 : index
    %c0_122 = arith.constant 0 : index
    %c0_123 = arith.constant 0 : index
    %104 = vector.load %arg12[%c0_121, %c0_122, %c0_123] : memref<8x16x8xf32, #tpu.memory_space<vmem>>, vector<8x16x8xf32>
    tpu.vector_store %arg12[%c0_121, %c0_122, %c0_123], %103 {strides = array<i32>} : memref<8x16x8xf32, #tpu.memory_space<vmem>>, vector<8x16x8xf32>,
    %c0_124 = arith.constant 0 : index
    %c0_125 = arith.constant 0 : index
    %c0_126 = arith.constant 0 : index
    %105 = vector.load %arg12[%c0_124, %c0_125, %c0_126] : memref<8x16x8xf32, #tpu.memory_space<vmem>>, vector<8x16x8xf32>
    %c0_127 = arith.constant 0 : index
    %c0_128 = arith.constant 0 : index
    %106 = vector.load %arg7[%c0_127, %c0_128] : memref<1x8xf32, #tpu.memory_space<vmem>>, vector<1x8xf32>
    %107 = vector.shape_cast %106 : vector<1x8xf32> to vector<8xf32>
    %108 = vector.shape_cast %107 : vector<8xf32> to vector<1x1x8xf32>
    %109 = vector.broadcast %108 : vector<1x1x8xf32> to vector<8x16x8xf32>
    %110 = arith.addf %105, %109 : vector<8x16x8xf32>
    %cst_129 = arith.constant 0.000000e+00 : f32
    %111 = vector.broadcast %cst_129 : f32 to vector<8x16x8xf32>
    %112 = arith.maximumf %110, %111 : vector<8x16x8xf32>
    %c0_130 = arith.constant 0 : index
    %c0_131 = arith.constant 0 : index
    %113 = vector.load %arg8[%c0_130, %c0_131] : memref<8x32xf32, #tpu.memory_space<vmem>>, vector<8x32xf32>
    "tpu.trace_start"() <{level = 10 : i32, message = "hwp,pq->hwq"}> : () -> ()
    %cst_132 = arith.constant dense<0.000000e+00> : vector<8x16x32xf32>
    %114 = tpu.matmul %112, %113, %cst_132 {dimension_numbers = #tpu.dot_dimension_numbers<[2], [0], [0, 1], [1], [0, 0, 0, 1, 1, 1], [], []>} : vector<8x16x8xf32>, vector<8x32xf32>, vector<8x16x32xf32> -> vector<8x16x32xf32>
    "tpu.trace_stop"() : () -> ()
    %c0_133 = arith.constant 0 : index
    %c0_134 = arith.constant 0 : index
    %115 = vector.load %arg9[%c0_133, %c0_134] : memref<1x32xf32, #tpu.memory_space<vmem>>, vector<1x32xf32>
    %116 = vector.shape_cast %115 : vector<1x32xf32> to vector<32xf32>
    %117 = vector.shape_cast %116 : vector<32xf32> to vector<1x1x32xf32>
    %118 = vector.broadcast %117 : vector<1x1x32xf32> to vector<8x16x32xf32>
    %119 = arith.addf %114, %118 : vector<8x16x32xf32>
    %120 = arith.addf %119, %7 : vector<8x16x32xf32>
    %cst_135 = arith.constant 0.000000e+00 : f32
    %121 = vector.broadcast %cst_135 : f32 to vector<8x16x32xf32>
    %122 = arith.maximumf %120, %121 : vector<8x16x32xf32>
    %c0_136 = arith.constant 0 : index
    %c0_137 = arith.constant 0 : index
    %c0_138 = arith.constant 0 : index
    %c0_139 = arith.constant 0 : index
    %123 = vector.load %arg10[%c0_136, %c0_137, %c0_138, %c0_139] : memref<1x8x16x32xf32, #tpu.memory_space<vmem>>, vector<1x8x16x32xf32>
    %124 = vector.shape_cast %123 : vector<1x8x16x32xf32> to vector<8x16x32xf32>
    %125 = vector.shape_cast %122 : vector<8x16x32xf32> to vector<1x8x16x32xf32>
    tpu.vector_store %arg10[%c0_136, %c0_137, %c0_138, %c0_139], %125 {strides = array<i32>} : memref<1x8x16x32xf32, #tpu.memory_space<vmem>>, vector<1x8x16x32xf32>,
    return
  }
  func.func @transform_0(%arg0: i32, %arg1: i32) -> (i32, i32, i32, i32) {
    %c0_i32 = arith.constant 0 : i32
    %c0_i32_0 = arith.constant 0 : i32
    %c0_i32_1 = arith.constant 0 : i32
    return %arg0, %arg1, %c0_i32, %c0_i32_0 : i32, i32, i32, i32
  }
  func.func @transform_1(%arg0: i32, %arg1: i32) -> (i32, i32, i32, i32) {
    %c1_i32 = arith.constant 1 : i32
    %0 = arith.addi %arg1, %c1_i32 : i32
    %c4_i32 = arith.constant 4 : i32
    %1 = arith.muli %0, %c4_i32 : i32
    %c0_i32 = arith.constant 0 : i32
    %c0_i32_0 = arith.constant 0 : i32
    %c0_i32_1 = arith.constant 0 : i32
    return %arg0, %1, %c0_i32, %c0_i32_0 : i32, i32, i32, i32
  }
  func.func @transform_2(%arg0: i32, %arg1: i32) -> (i32, i32) {
    %c0_i32 = arith.constant 0 : i32
    %c0_i32_0 = arith.constant 0 : i32
    %c0_i32_1 = arith.constant 0 : i32
    return %c0_i32, %c0_i32_0 : i32, i32
  }
  func.func @transform_3(%arg0: i32, %arg1: i32) -> (i32, i32) {
    %c0_i32 = arith.constant 0 : i32
    %c0_i32_0 = arith.constant 0 : i32
    %c0_i32_1 = arith.constant 0 : i32
    return %c0_i32, %c0_i32_0 : i32, i32
  }
  func.func @transform_4(%arg0: i32, %arg1: i32) -> (i32, i32, i32, i32) {
    %c0_i32 = arith.constant 0 : i32
    %c0_i32_0 = arith.constant 0 : i32
    %c0_i32_1 = arith.constant 0 : i32
    %c0_i32_2 = arith.constant 0 : i32
    %c0_i32_3 = arith.constant 0 : i32
    return %c0_i32, %c0_i32_0, %c0_i32_1, %c0_i32_2 : i32, i32, i32, i32
  }
  func.func @transform_5(%arg0: i32, %arg1: i32) -> (i32, i32) {
    %c0_i32 = arith.constant 0 : i32
    %c0_i32_0 = arith.constant 0 : i32
    %c0_i32_1 = arith.constant 0 : i32
    return %c0_i32, %c0_i32_0 : i32, i32
  }
  func.func @transform_6(%arg0: i32, %arg1: i32) -> (i32, i32) {
    %c0_i32 = arith.constant 0 : i32
    %c0_i32_0 = arith.constant 0 : i32
    %c0_i32_1 = arith.constant 0 : i32
    return %c0_i32, %c0_i32_0 : i32, i32
  }
  func.func @transform_7(%arg0: i32, %arg1: i32) -> (i32, i32) {
    %c0_i32 = arith.constant 0 : i32
    %c0_i32_0 = arith.constant 0 : i32
    %c0_i32_1 = arith.constant 0 : i32
    return %c0_i32, %c0_i32_0 : i32, i32
  }
  func.func @transform_8(%arg0: i32, %arg1: i32) -> (i32, i32, i32, i32) {
    %c0_i32 = arith.constant 0 : i32
    %c0_i32_0 = arith.constant 0 : i32
    %c0_i32_1 = arith.constant 0 : i32
    return %arg0, %arg1, %c0_i32, %c0_i32_0 : i32, i32, i32, i32
  }
}

</mosaic_0001>

<bundles_post_ra>
// kernel: tpu_custom_call.1
= control target key start
LH: loop header
LB: loop body
LE: loop exit
PB: predicated region body
PF: predicated region fallthrough
CT: control target
= control target key end

     0   :  { %s9139_s0 = inlined_call_operand.hbm [shape: f32[2,18,18,32], index: 0, kind: input, shape index: {}]   ;;  %s9140_s1 = inlined_call_operand.hbm [shape: f32[2,18,18,32], index: 1, kind: input, shape index: {}]   ;;  %s9141_s2 = inlined_call_operand.hbm [shape: f32[32,8], index: 2, kind: input, shape index: {}]   ;;  %s9142_s3 = inlined_call_operand.hbm [shape: f32[1,8], index: 3, kind: input, shape index: {}]   ;;  %s9143_s4 = inlined_call_operand.hbm [shape: f32[3,3,8,8], index: 4, kind: input, shape index: {}]   ;;  %s9144_s5 = inlined_call_operand.hbm [shape: f32[1,8], index: 5, kind: input, shape index: {}]   ;;  %s9145_s6 = inlined_call_operand.hbm [shape: f32[8,32], index: 6, kind: input, shape index: {}]   ;;  %s9146_s7 = inlined_call_operand.hbm [shape: f32[1,32], index: 7, kind: input, shape index: {}]   ;;  %s9147_s8 = inlined_call_operand.hbm [shape: f32[2,16,16,32], index: 8, kind: output, shape index: {}]  }
   0x1   :  { %9182 = sst [smem:[#allocation47_spill]] %s9139_s0 }
   0x2   :  { %9183 = sst [smem:[#allocation48_spill]] %s9140_s1 }
   0x3   :  { %9184 = sst [smem:[#allocation49_spill]] %s9142_s3 }
   0x4   :  { %9185 = sst [smem:[#allocation50_spill]] %s9144_s5 }
   0x5   :  { %9186 = sst [smem:[#allocation51_spill]] %s9147_s8 }
   0x6   :  { %13 = vsyncpa [#allocation5], 0 }
   0x7   :  { %15 = vsyncpa [#allocation5 + $0x1], 0 }
   0x8   :  { %16 = vsyncpa [#allocation8], 0 }
   0x9   :  { %18 = vsyncpa [#allocation8 + $0x1], 0 }
   0xa   :  { %19 = vsyncpa [#allocation11], 0 }
   0xb   :  { %20 = vsyncpa [#allocation14], 0 }
   0xc   :  { %21 = vsyncpa [#allocation17], 0 }
   0xd   :  { %22 = vsyncpa [#allocation6], 0 }
   0xe   :  { %24 = vsyncpa [#allocation6 + $0x1], 0  ;;  %s7034_s27 = smov 0   ;;  %s7036_s28 = smov 0  }
   0xf   :  { %s7038_s29 = smov 0   ;;  %s7040_s30 = smov 0  }
  0x10   :  { %s7042_s9 = smov 0   ;;  %s7044_s10 = smov 0  }
  0x11   :  { %s7046_s11 = smov 0   ;;  %s7048_s12 = smov 0  }
  0x12   :  { %s7050_s13 = smov 0   ;;  %s7052_s14 = smov 0  }
  0x13   :  { %s7054_s15 = smov 0  }
  0x14 LB: > { %9187 = sst [smem:[#allocation26_spill]] %s6930_s28  ;;  %s7090_s16 = sadd.s32 4294967295, %s6966_s15   ;;  %s6966_s15 = sphi %s7054_s15, %s30_s15   ;;  %s6962_s14 = sphi %s7052_s14, %s9310_s14   ;;  %s6958_s13 = sphi %s7050_s13, %s9302_s13   ;;  %s6954_s12 = sphi %s7048_s12, %s9309_s12   ;;  %s6950_s11 = sphi %s7046_s11, %s9301_s11   ;;  %s6946_s10 = sphi %s7044_s10, %s9308_s10   ;;  %s6942_s9 = sphi %s7042_s9, %s9307_s9   ;;  %s6938_s30 = sphi %s7040_s30, %s9306_s30   ;;  %s6934_s29 = sphi %s7038_s29, %s9305_s29   ;;  %s6930_s28 = sphi %s7036_s28, %s9304_s28   ;;  %s6926_s27 = sphi %s7034_s27, %s9298_s27  }
  0x15   : > { %9188 = sst [smem:[#allocation27_spill]] %s6938_s30  ;;  %s39_s18 = sadd.s32 1, %s6958_s13 }
  0x16   : > { %9189 = sst [smem:[#allocation28_spill]] %s6950_s11  ;;  %s42_s19 = sadd.s32 1, %s6962_s14 }
  0x17   : > { %9190 = sst [smem:[#allocation29_spill]] %s6954_s12  ;;  %p40_p0 = scmp.ge.s32.totalorder %s39_s18, 2 }
  0x18   : > { %9191 = sst [smem:[#allocation30_spill]] %s6958_s13  ;;  %s51_s20 = sadd.s32 1, %s6946_s10 }
  0x19   : > { %9192 = sst [smem:[#allocation31_spill]] %s7090_s16  ;;  %p58_p1 = scmp.ne.s32.totalorder %s6946_s10, %s6942_s9 }
  0x1a   : > { %p59_p2 = scmp.eq.s32.totalorder %s6966_s15, 0  ;;  %s9312_s18 = smov (%p40_p0, %s39_s18), 0 }
  0x1b   : > { %9193 = sst [smem:[#allocation32_spill]] %s9312_s18  ;;  %s9314_s19 = smov (!%p40_p0, %s42_s19), %s6962_s14 }
  0x1c   : > { %s47_s21 = ssub.s32 %s6958_s13, %s9312_s18  ;;  %p7109_p3 = por %p59_p2, %p58_p1 }
  0x1d   : > { %p44_p4 = scmp.ge.s32.totalorder %s9314_s19, 2  ;;  %p9153_p5 = scmp.ne.s32.totalorder %s6942_s9, %s6938_s30 }
  0x1e   : > { %s9194_s22 = scalar_select %p7109_p3, 1, 0 }
  0x1f   : > { %p9158_p6 = scmp.eq.s32.totalorder %s7090_s16, 0  ;;  %s5829_s23 = sshll.u32 %s6958_s13, 2 }
  0x20   : > { %s9316_s19 = smov (%p44_p4, %s9314_s19), 0  ;;  %s5830_s25 = sadd.s32 4, %s5829_s23 }
  0x21   : > { %9195 = sst [smem:[#allocation33_spill]] %s9316_s19  ;;  %p7124_p7 = por %p9158_p6, %p9153_p5 }
  0x22   : > { %s46_s26 = ssub.s32 %s6962_s14, %s9316_s19  ;;  %s5831_s17 = sshll.u32 %s9312_s18, 2 }
  0x23   : > { %s9196_s24 = scalar_select %p7124_p7, 1, 0 }
  0x24   : > { %s48_s8 = sor.u32 %s47_s21, %s46_s26  ;;  %s5832_s12 = sadd.s32 4, %s5831_s17 }
  0x25   : > { %p49_p8 = scmp.eq.s32.totalorder %s48_s8, 0  ;;  %s79_s11 = ssub.s32 %s5830_s25, %s5832_s12 }
  0x26   : > { %s80_s1 = sor.u32 %s79_s11, %s46_s26  ;;  %s83_s0 = sadd.s32 1, %s6934_s29 }
  0x27   : > { %s7133_s13 = scalar_select %p49_p8, %s6946_s10, %s51_s20  }
  0x28   : > { %p81_p9 = scmp.eq.s32.totalorder %s80_s1, 0  ;;  %p90_p10 = scmp.ne.s32.totalorder %s6934_s29, %s6930_s28 }
  0x29   : > { %9197 = sst [smem:[#allocation34_spill]] %s7133_s13  ;;  %p96_p11 = scmp.ne.s32.totalorder %s6930_s28, %s6926_s27 }
  0x2a   : > { %p248_p12 = scmp.eq.s32.totalorder %s7090_s16, 3  ;;  %p7145_p13 = por %p90_p10, %p59_p2 }
  0x2b   : > { %s7141_s23 = scalar_select %p81_p9, %s6934_s29, %s83_s0  }
  0x2c   : > { %s9199_s21 = scalar_select %p7145_p13, 1, 0 }
  0x2d   : > { %9198 = sst [smem:[#allocation35_spill]] %s7141_s23  ;;  %p7151_p0 = por %p96_p11, %p9158_p6 }
  0x2e   : > { %p7158_p4 = por %p248_p12, %p58_p1  ;;  %s9204_s1 = sadd.s32 4294967294, %s6966_s15  }
  0x2f   : > { %s9200_s8 = scalar_select %p7151_p0, 1, 0 }
  0x30   : > { %s9202_s11 = scalar_select %p7158_p4, 1, 0 }
  0x31   : > { %9201 = sst [smem:[#allocation36_spill]] %s9200_s8  ;;  %p254_p8 = scmp.eq.s32.totalorder %s9204_s1, 3 }
  0x32   : > { %9203 = sst [smem:[#allocation37_spill]] %s9202_s11  ;;  %p5608_p5 = scmp.ge.s32.totalorder %s6966_s15, 1 }
  0x33   : > { %p261_p9 = scmp.lt.s32.totalorder %s6966_s15, 5  ;;  %p9205_p7 = scmp.ne.s32.totalorder %s6942_s9, %s6938_s30 }
  0x34   : > { %s6968_s12 = smov [#allocation10]   ;;  %s6969_s20 = smov [#allocation13]  }
  0x35   : > { %p7169_p3 = por %p254_p8, %p9205_p7  ;;  %p7173_p2 = pnand %p5608_p5, %p261_p9 }
  0x36   : > { %s287_s17 = sshll.u32 %s6968_s12, 4  ;;  %s311_s25 = sshll.u32 %s6969_s20, 4  ;;  %s288_s17 = int_to_ptr.vmem [resolvable:$true] %s287_s17  ;;  %s7185_s25 = int_to_ptr.vmem [resolvable:$true] %s311_s25 }
  0x37   : > { %s9206_s0 = scalar_select %p7169_p3, 1, 0 }
  0x38   : > { %s9208_s27 = scalar_select %p7173_p2, 1, 0 }
  0x39   : > { %9207 = sst [smem:[#allocation38_spill]] %s9206_s0  ;;  %p6411_p1 = pneg %p7173_p2 }
  0x3a   : > { %s9210_s3 = sld [smem:[#allocation49_spill]] }
  0x3b   : > { %p7181_p10 = pnand %p6411_p1, %p9158_p6 }
  0x3d   : > { %p7195_p7 = pneg %p7181_p10 }
  0x40   : > { %s6597_s18 = scalar_lea.hbm %s9210_s3, 16 }
  0x41   : > { %p6598_p5 = scmp.ne.s32.totalorder %s9210_s3, %s6597_s18  ;;  %p6604_p8 = scmp.lt.u32.totalorder %s6597_s18, %s9210_s3 }
  0x43   : > { %p6600_p11 = pnand %p7195_p7, %p6598_p5 }
  0x45   : > { %p6601_p12 = pneg %p6600_p11 }
  0x47   : > { %p6606_p9 = pnand %p6604_p8, %p6601_p12 }
  0x49   : > { %6609 = shalt.err (!%p6606_p9)
}
  0x4a   : > { %s6610_s19 = scalar_lea.vmem %s288_s17, 16  ;;  %s6617_s13 = scalar_lea.vmem %s288_s17, 32 }
  0x4b   : > { %p6611_p1 = scmp.ne.s32.totalorder %s288_s17, %s6610_s19  ;;  %p6618_p4 = scmp.lt.s32.totalorder %s288_s17, %s288_s17 }
  0x4c   : > { %p6619_p0 = scmp.lt.s32.totalorder %s6617_s13, %s6610_s19 }
  0x4d   : > { %p6613_p6 = pnand %p6611_p1, %p7195_p7 }
  0x4e   : > { %p6620_p2 = por %p6619_p0, %p6618_p4 }
  0x4f   : > { %p6614_p3 = pneg %p6613_p6 }
  0x51   : > { %p6621_p13 = pnand %p6620_p2, %p6614_p3 }
  0x53   : > { %6624 = shalt.err (!%p6621_p13)
}
  0x54   : > { %6417 = dma.hbm_to_vmem [thread:$0]  (!%p7181_p10), %s9210_s3, 16, %s288_s17, [#allocation11]  }
  0x55   : > { %s9212_s5 = sld [smem:[#allocation50_spill]] }
  0x5b   : > { %s6625_s20 = scalar_lea.hbm %s9212_s5, 16 }
  0x5c   : > { %p6626_p6 = scmp.ne.s32.totalorder %s9212_s5, %s6625_s20  ;;  %p6632_p3 = scmp.lt.u32.totalorder %s6625_s20, %s9212_s5 }
  0x5e   : > { %p6628_p5 = pnand %p6626_p6, %p7195_p7 }
  0x60   : > { %p6629_p0 = pneg %p6628_p5 }
  0x62   : > { %p6634_p13 = pnand %p6632_p3, %p6629_p0 }
  0x64   : > { %6637 = shalt.err (!%p6634_p13)
}
  0x65   : > { %s6638_s17 = scalar_lea.vmem %s7185_s25, 16  ;;  %s6645_s30 = scalar_lea.vmem %s7185_s25, 32 }
  0x66   : > { %p6639_p4 = scmp.ne.s32.totalorder %s7185_s25, %s6638_s17  ;;  %p6646_p12 = scmp.lt.s32.totalorder %s7185_s25, %s7185_s25 }
  0x67   : > { %p6647_p8 = scmp.lt.s32.totalorder %s6645_s30, %s6638_s17 }
  0x68   : > { %p6641_p2 = pnand %p6639_p4, %p7195_p7 }
  0x69   : > { %p6648_p9 = por %p6647_p8, %p6646_p12 }
  0x6a   : > { %p6642_p11 = pneg %p6641_p2 }
  0x6c   : > { %p6649_p1 = pnand %p6648_p9, %p6642_p11 }
  0x6e   : > { %6652 = shalt.err (!%p6649_p1)
}
  0x6f   : > { %6423 = dma.hbm_to_vmem [thread:$0]  (!%p7181_p10), %s9212_s5, 16, %s7185_s25, [#allocation14]  }
  0x70   : > { %s6970_s1 = smov [#allocation9]   ;;  %s6653_s19 = scalar_lea.hbm %s9141_s2, 512 }
  0x71   : > { %s273_s18 = sshll.u32 %s6970_s1, 4  ;;  %p6654_p6 = scmp.ne.s32.totalorder %s9141_s2, %s6653_s19  ;;  %s274_s18 = int_to_ptr.vmem [resolvable:$true] %s273_s18 }
  0x72   : > { %p6660_p3 = scmp.lt.u32.totalorder %s6653_s19, %s9141_s2 }
  0x73   : > { %p6656_p5 = pnand %p6654_p6, %p7195_p7 }
  0x75   : > { %p6657_p0 = pneg %p6656_p5 }
  0x77   : > { %p6662_p13 = pnand %p6660_p3, %p6657_p0 }
  0x79   : > { %6665 = shalt.err (!%p6662_p13)
}
  0x7a   : > { %s6666_s25 = scalar_lea.vmem %s274_s18, 512  ;;  %p6674_p12 = scmp.lt.s32.totalorder %s274_s18, %s274_s18 }
  0x7b   : > { %p6667_p4 = scmp.ne.s32.totalorder %s274_s18, %s6666_s25  ;;  %p6675_p8 = scmp.lt.s32.totalorder %s6666_s25, %s6666_s25 }
  0x7d   : > { %p6669_p2 = pnand %p6667_p4, %p7195_p7  ;;  %p6676_p9 = por %p6675_p8, %p6674_p12 }
  0x7f   : > { %p6670_p11 = pneg %p6669_p2 }
  0x81   : > { %p6677_p1 = pnand %p6676_p9, %p6670_p11 }
  0x83   : > { %6680 = shalt.err (!%p6677_p1)
}
  0x84   : > { %s6971_s11 = smov 128   ;;  %s6972_s23 = smov 8  }
  0x85   : > { %6414 = dma.hbm_to_vmem [thread:$0]  (!%p7181_p10), %s9141_s2, 512, %s274_s18, [#allocation8], %s6971_s11, %s6971_s11, %s6972_s23  }
  0x86   : > { %s6973_s0 = smov [#allocation12]   ;;  %s6974_s19 = smov [#allocation15]  }
  0x87   : > { %s297_s20 = sshll.u32 %s6973_s0, 4  ;;  %s322_s13 = sshll.u32 %s6974_s19, 4  ;;  %s298_s20 = int_to_ptr.vmem [resolvable:$true] %s297_s20  ;;  %s323_s13 = int_to_ptr.vmem [resolvable:$true] %s322_s13 }
  0x88   : > { %s6681_s25 = scalar_lea.hbm %s9143_s4, 1152 }
  0x89   : > { %p6682_p6 = scmp.ne.s32.totalorder %s9143_s4, %s6681_s25  ;;  %p6688_p3 = scmp.lt.u32.totalorder %s6681_s25, %s9143_s4 }
  0x8b   : > { %p6684_p5 = pnand %p6682_p6, %p7195_p7 }
  0x8d   : > { %p6685_p0 = pneg %p6684_p5 }
  0x8f   : > { %p6690_p13 = pnand %p6688_p3, %p6685_p0 }
  0x91   : > { %6693 = shalt.err (!%p6690_p13)
}
  0x92   : > { %s6694_s18 = scalar_lea.vmem %s298_s20, 1152  ;;  %p6702_p12 = scmp.lt.s32.totalorder %s298_s20, %s298_s20 }
  0x93   : > { %p6695_p4 = scmp.ne.s32.totalorder %s298_s20, %s6694_s18  ;;  %p6703_p8 = scmp.lt.s32.totalorder %s6694_s18, %s6694_s18 }
  0x95   : > { %p6697_p2 = pnand %p6695_p4, %p7195_p7  ;;  %p6704_p9 = por %p6703_p8, %p6702_p12 }
  0x97   : > { %p6698_p11 = pneg %p6697_p2 }
  0x99   : > { %p6705_p1 = pnand %p6704_p9, %p6698_p11 }
  0x9b   : > { %6708 = shalt.err (!%p6705_p1)
}
  0x9c   : > { %6420 = dma.hbm_to_vmem [thread:$0]  (!%p7181_p10), %s9143_s4, 1152, %s298_s20, [#allocation11], %s6971_s11, %s6971_s11, %s6972_s23  }
  0x9d   : > { %s6709_s3 = scalar_lea.hbm %s9145_s6, 128 }
  0x9e   : > { %p6710_p6 = scmp.ne.s32.totalorder %s9145_s6, %s6709_s3  ;;  %p6716_p3 = scmp.lt.u32.totalorder %s6709_s3, %s9145_s6 }
  0xa0   : > { %p6712_p5 = pnand %p6710_p6, %p7195_p7 }
  0xa2   : > { %p6713_p0 = pneg %p6712_p5 }
  0xa4   : > { %p6718_p13 = pnand %p6716_p3, %p6713_p0 }
  0xa6   : > { %6721 = shalt.err (!%p6718_p13)
}
  0xa7   : > { %s6722_s30 = scalar_lea.vmem %s323_s13, 128  ;;  %p6730_p12 = scmp.lt.s32.totalorder %s323_s13, %s323_s13 }
  0xa8   : > { %p6723_p4 = scmp.ne.s32.totalorder %s323_s13, %s6722_s30  ;;  %p6731_p8 = scmp.lt.s32.totalorder %s6722_s30, %s6722_s30 }
  0xaa   : > { %p6725_p2 = pnand %p6723_p4, %p7195_p7  ;;  %p6732_p9 = por %p6731_p8, %p6730_p12 }
  0xac   : > { %p6726_p11 = pneg %p6725_p2 }
  0xae   : > { %p6733_p1 = pnand %p6732_p9, %p6726_p11 }
  0xb0   : > { %6736 = shalt.err (!%p6733_p1)
}
  0xb1   : > { %6426 = dma.hbm_to_vmem [thread:$0]  (!%p7181_p10), %s9145_s6, 128, %s323_s13, [#allocation14]  }
  0xb2   : > { %s6975_s20 = smov [#allocation16]   ;;  %s6737_s8 = scalar_lea.hbm %s9146_s7, 16 }
  0xb3   : > { %s333_s25 = sshll.u32 %s6975_s20, 4  ;;  %p6738_p6 = scmp.ne.s32.totalorder %s9146_s7, %s6737_s8  ;;  %s334_s25 = int_to_ptr.vmem [resolvable:$true] %s333_s25 }
  0xb4   : > { %p6744_p3 = scmp.lt.u32.totalorder %s6737_s8, %s9146_s7 }
  0xb5   : > { %p6740_p5 = pnand %p6738_p6, %p7195_p7 }
  0xb7   : > { %p6741_p0 = pneg %p6740_p5 }
  0xb9   : > { %p6746_p13 = pnand %p6744_p3, %p6741_p0 }
  0xbb   : > { %6749 = shalt.err (!%p6746_p13)
}
  0xbc   : > { %s6750_s13 = scalar_lea.vmem %s334_s25, 16  ;;  %s6757_s0 = scalar_lea.vmem %s334_s25, 32 }
  0xbd   : > { %p6751_p4 = scmp.ne.s32.totalorder %s334_s25, %s6750_s13  ;;  %p6758_p12 = scmp.lt.s32.totalorder %s334_s25, %s334_s25 }
  0xbe   : > { %p6759_p8 = scmp.lt.s32.totalorder %s6757_s0, %s6750_s13 }
  0xbf   : > { %p6753_p2 = pnand %p6751_p4, %p7195_p7 }
  0xc0   : > { %p6760_p9 = por %p6759_p8, %p6758_p12 }
  0xc1   : > { %p6754_p11 = pneg %p6753_p2 }
  0xc3   : > { %p6761_p1 = pnand %p6760_p9, %p6754_p11 }
  0xc5   : > { %6764 = shalt.err (!%p6761_p1)
}
  0xc6   : > { %6429 = dma.hbm_to_vmem [thread:$0]  (!%p7181_p10), %s9146_s7, 16, %s334_s25, [#allocation17]  }
  0xc7   : > { %p5615_p6 = scmp.ge.s32.totalorder %s6966_s15, 4 }
  0xc8   : > { %p9213_p5 = scmp.ne.s32.totalorder (!%p5615_p6), %s9194_s22, 0 }
  0xc9   : > { %340 = sbr.rel (%p5615_p6) target bundleno = 275 (0x113), region = 40 }
  0xd0   : > { %343 = sbr.rel (!%p9213_p5) target bundleno = 241 (0xf1), region = 44  ;;  %s9214_s12 = sld [smem:[#allocation30_spill]] (%p9213_p5) }
  0xd1   : > { %s344_s30 = sand.u32 (%p9213_p5), 1, %s6946_s10   ;;  %s6378_s26 = smul.u32 (%p9213_p5), 54, %s6962_s14 }
  0xd2   : > { %s6376_s11 = smul.u32 (%p9213_p5), 192, %s344_s30  ;;  %s7311_s23 = scalar_lea.sflag (%p9213_p5), [#allocation5], %s344_s30 }
  0xd3   : > { %s9215_s3 = sld [smem:[#allocation47_spill]] (%p9213_p5) }
  0xd4   : > { %s348_s20 = scalar_lea.vmem (%p9213_p5), [#allocation4], %s6376_s11 }
  0xd5   : > { %s366_s5 = sshll.u32 (%p9213_p5), %s348_s20, 4  ;;  %s7315_s5 = int_to_ptr.vmem [resolvable:$true] %s366_s5 }
  0xd6   : > { %s6377_s18 = smul.u32 (%p9213_p5), 24, %s9214_s12 }
  0xd8   : > { %s361_s25 = sadd.s32 %s6378_s26, %s6377_s18 }
  0xd9   : > { %s5621_s8 = sshll.u32 %s361_s25, 7  ;;  %s6769_s19 = scalar_lea.hbm %s9215_s3, 13824 }
  0xda   : > { %s363_s22 = scalar_lea.hbm %s9215_s3, %s5621_s8 }
  0xdb   : > { %s6765_s1 = scalar_lea.hbm %s363_s22, 3072  ;;  %p6770_p7 = scmp.lt.u32.totalorder %s363_s22, %s9215_s3 }
  0xdc   : > { %p6766_p10 = scmp.ne.s32.totalorder %s363_s22, %s6765_s1  ;;  %p6771_p0 = scmp.lt.u32.totalorder %s6769_s19, %s6765_s1 }
  0xdd   : > { %p6773_p13 = scmp.lt.u32.totalorder %s6765_s1, %s363_s22 }
  0xde   : > { %p6772_p3 = por %p6771_p0, %p6770_p7 }
  0xe0   : > { %p6774_p4 = por %p6773_p13, %p6772_p3 }
  0xe2   : > { %p6775_p2 = pnand %p6774_p4, %p6766_p10 }
  0xe4   : > { %6778 = shalt.err (!%p6775_p2)
}
  0xe5   : > { %s6779_s12 = scalar_lea.vmem %s7315_s5, 3072  ;;  %s6976_s11 = smov [#allocation4]  }
  0xe6   : > { %p6780_p11 = scmp.ne.s32.totalorder %s7315_s5, %s6779_s12  ;;  %s6783_s20 = sshll.u32 %s6976_s11, 4  ;;  %s6784_s20 = int_to_ptr.vmem [resolvable:$false] %s6783_s20 }
  0xe7   : > { %s6785_s18 = scalar_lea.vmem %s6784_s20, 6144  ;;  %p6786_p12 = scmp.lt.s32.totalorder %s7315_s5, %s6784_s20 }
  0xe8   : > { %p6787_p8 = scmp.lt.s32.totalorder %s6785_s18, %s6779_s12 }
  0xea   : > { %p6788_p9 = por %p6787_p8, %p6786_p12 }
  0xec   : > { %p6789_p1 = pnand %p6788_p9, %p6780_p11 }
  0xee   : > { %6792 = shalt.err (!%p6789_p1)
}
  0xef   : > { %s6977_s26 = smov 128   ;;  %s6978_s25 = smov 8  }
  0xf0   : > { %372 = dma.hbm_to_vmem [thread:$0]  %s363_s22, 3072, %s7315_s5, %s7311_s23, %s6977_s26, %s6977_s26, %s6978_s25  }
  0xf1 PF: > { %s9216_s8 = sld [smem:[#allocation30_spill]]  ;;  %s376_s28 = sand.u32 1, %s6966_s15  }
  0xf2   : > { %s378_s16 = sand.u32 1, %s6934_s29   ;;  %s5475_s0 = smul.u32 54, %s6962_s14 }
  0xf3   : > { %s6379_s1 = smul.u32 48, %s378_s16  ;;  %s9217_s23 = sld [smem:[#allocation48_spill]] }
  0xf4   : > { %s7342_s18 = scalar_lea.sflag [#allocation8], %s376_s28  ;;  %p9218_p5 = scmp.ne.s32.totalorder %s9199_s21, 0 }
  0xf5   : > { %s380_s19 = scalar_lea.vmem [#allocation7], %s6379_s1 }
  0xf6   : > { %s392_s17 = sshll.u32 %s380_s19, 4  ;;  %s7335_s17 = int_to_ptr.vmem [resolvable:$true] %s392_s17 }
  0xf7   : > { %s5474_s13 = smul.u32 24, %s9216_s8 }
  0xf9   : > { %s5476_s30 = sadd.s32 %s5475_s0, %s5474_s13  ;;  %s6797_s16 = scalar_lea.hbm %s9217_s23, 13824 }
  0xfa   : > { %s5624_s12 = sshll.u32 %s5476_s30, 7 }
  0xfb   : > { %s5478_s5 = scalar_lea.hbm %s9217_s23, %s5624_s12 }
  0xfc   : > { %s7340_s22 = scalar_lea.hbm %s5478_s5, 3072  ;;  %s6821_s26 = scalar_lea.hbm %s5478_s5, 3840 }
  0xfd   : > { %p6794_p6 = scmp.ne.s32.totalorder %s7340_s22, %s6821_s26  ;;  %p6798_p0 = scmp.lt.u32.totalorder %s7340_s22, %s9217_s23 }
  0xfe   : > { %p6799_p3 = scmp.lt.u32.totalorder %s6797_s16, %s6821_s26  ;;  %p6801_p4 = scmp.lt.u32.totalorder %s6821_s26, %s7340_s22 }
  0xff   : > { %p6795_p10 = pnand %p6794_p6, %p9218_p5 }
 0x100   : > { %p6800_p13 = por %p6799_p3, %p6798_p0 }
 0x101   : > { %p6796_p7 = pneg %p6795_p10 }
 0x102   : > { %p6802_p2 = por %p6801_p4, %p6800_p13 }
 0x104   : > { %p6803_p11 = pnand %p6802_p2, %p6796_p7 }
 0x106   : > { %6806 = shalt.err (!%p6803_p11)
}
 0x107   : > { %s6807_s28 = scalar_lea.vmem %s7335_s17, 768  ;;  %s6979_s0 = smov [#allocation7]  }
 0x108   : > { %p6808_p12 = scmp.ne.s32.totalorder %s7335_s17, %s6807_s28  ;;  %s6811_s19 = sshll.u32 %s6979_s0, 4  ;;  %s6812_s19 = int_to_ptr.vmem [resolvable:$false] %s6811_s19 }
 0x109   : > { %s6813_s30 = scalar_lea.vmem %s6812_s19, 1536  ;;  %p6814_p1 = scmp.lt.s32.totalorder %s7335_s17, %s6812_s19 }
 0x10a   : > { %p6809_p8 = pnand %p6808_p12, %p9218_p5  ;;  %p6815_p6 = scmp.lt.s32.totalorder %s6813_s30, %s6807_s28 }
 0x10c   : > { %p6810_p9 = pneg %p6809_p8  ;;  %p6816_p10 = por %p6815_p6, %p6814_p1 }
 0x10e   : > { %p6817_p0 = pnand %p6816_p10, %p6810_p9 }
 0x110   : > { %6820 = shalt.err (!%p6817_p0)
}
 0x111   : > { %s6980_s12 = smov 128   ;;  %s6981_s11 = smov 8  }
 0x112   : > { %6394 = dma.hbm_to_vmem [thread:$0]  (%p9218_p5), %s7340_s22, 768, %s7335_s17, %s7342_s18, %s6980_s12, %s6980_s12, %s6981_s11  }
 0x113 PF: > { %p9219_p7 = scmp.ne.s32.totalorder %s9208_s27, 0 }
 0x115   : > { %404 = sbr.rel (%p9219_p7) target bundleno = 1279 (0x4ff), region = 52 }
 0x11c   : > { %s7368_s20 = sand.u32 1, %s6942_s9   ;;  %p9220_p3 = scmp.ne.s32.totalorder %s9196_s24, 0 }
 0x11d   : > { %s6380_s5 = smul.u32 192, %s7368_s20  ;;  %s407_s26 = scalar_lea.sflag [#allocation5], %s7368_s20 }
 0x11f   : > { %s7372_s25 = scalar_lea.vmem [#allocation4], %s6380_s5 }
 0x120   : > { %6895 = dma.done.wait (%p9220_p3), %s407_s26, 3072  }
 0x121   : > { %6897 = vsyncadd (%p9220_p3), %s407_s26, 4294964224  ;;  %s9221_s21 = sld [smem:[#allocation31_spill]]  ;;  %s9222_s17 = sld [smem:[#allocation26_spill]] }
 0x122   : > { %s9223_s22 = sld [smem:[#allocation36_spill]] }
 0x127   : > { %s415_s27 = sand.u32 1, %s9221_s21   ;;  %s417_s18 = sand.u32 1, %s9222_s17  }
 0x128   : > { %s6381_s8 = smul.u32 48, %s417_s18  ;;  %s416_s16 = scalar_lea.sflag [#allocation8], %s415_s27 }
 0x129   : > { %p9224_p5 = scmp.ne.s32.totalorder %s9223_s22, 0 }
 0x12a   : > { %s7380_s1 = scalar_lea.vmem [#allocation7], %s6381_s8 }
 0x12b   : > { %6899 = dma.done.wait (%p9224_p5), %s416_s16, 768  }
 0x12c   : > { %6901 = vsyncadd (%p9224_p5), %s416_s16, 4294966528  ;;  %p9225_p13 = scmp.eq.s32.totalorder %s9221_s21, 0 }
 0x12e   : > { %6903 = dma.done.wait (%p9225_p13), [#allocation8], 512   ;;  %p9226_p4 = pmov %p9225_p13 }
 0x130   : > { %6905 = vsyncadd (%p9226_p4), [#allocation8], 4294966784  ;;  %p9227_p2 = pmov %p9226_p4 }
 0x132   : > { %6907 = dma.done.wait (%p9227_p2), [#allocation11], 1168   ;;  %p9228_p11 = pmov %p9227_p2 }
 0x133   : > { %p9229_p12 = pmov %p9227_p2 }
 0x134   : > { %6909 = vsyncadd (%p9228_p11), [#allocation11], 4294966128 }
 0x135   : > { %6911 = dma.done.wait (%p9229_p12), [#allocation14], 144   ;;  %p9230_p8 = pmov %p9227_p2 }
 0x136   : > { %p9231_p9 = pmov %p9227_p2 }
 0x137   : > { %6913 = vsyncadd (%p9230_p8), [#allocation14], 4294967152 }
 0x138   : > { %6915 = dma.done.wait (%p9231_p9), [#allocation17], 16   ;;  %p9232_p1 = pmov %p9227_p2 }
 0x139   : > { %v6982_v0 = vmov 0.0|0.0   ;;  %vm6983_vm0 = vmmov 0   ;;  %v6984_v1 = vmov 0.0   ;;  %v6985_v2 = vmov 1983009808   ;;  %v584_v5 = vld [vmem:[#allocation9] sm:$0xff] }
 0x13a   : > { %6917 = vsyncadd (%p9232_p1), [#allocation17], 4294967280  ;;  %6368 = vmatprep.subr.bf16.mxu0 %v6982_v0  ;;  %6039 = vmatprep.mubr.msk.f32.mxu0 %vm6983_vm0, %v6984_v1  ;;  %v626_v3 = vunpack.c.l.s4 %v6985_v2  ;;  %v628_v4 = vlaneseq  ;;  %vm515_vm1 = vcmask 261120   ;;  %v585_v6 = vld [vmem:[#allocation9 + $0x8] sm:$0xff]  ;;  %v586_v7 = vld [vmem:[#allocation9 + $0x10] sm:$0xff]  ;;  %vm518_vm2 = vcmask 254976  }
 0x13b   : > { %v6369_v8 = vpack.c.bf16 %v585_v6, %v584_v5  ;;  %v587_v9 = vld [vmem:[#allocation9 + $0x18] sm:$0xff]  ;;  %v491_v10 = vld [vmem:[%s7372_s25] sm:$0xff]  ;;  %v492_v11 = vld [vmem:[%s7372_s25 + $0x8] sm:$0xff]  ;;  %vm3030_vm3 = vcmask 64512   ;;  %s9233_s24 = sld [smem:[#allocation28_spill]]  ;;  %s5632_s28 = sshll.u32 %s7368_s20, 7 }
 0x13c   : > { %516 = vst.msk [vmem:[#allocation2] sm:$0xff] %vm515_vm1, %v491_v10  ;;  %v627_v12 = vunpack.c.0.s8 %v626_v3  ;;  %v7407_v13 = vshrl.u32 %v628_v4, 7  ;;  %517 = vst.msk [vmem:[#allocation2 + $0x8] sm:$0xff] %vm515_vm1, %v492_v11  ;;  %v493_v14 = vld [vmem:[%s7372_s25 + $0x10] sm:$0x3]  ;;  %v494_v15 = vld [vmem:[%s7372_s25 + $0x18] sm:$0xff]  ;;  %v6372_v17 = vpack.c.bf16 %v587_v9, %v586_v7 }
 0x13d   : > { %v495_v16 = vld [vmem:[%s7372_s25 + $0x20] sm:$0xff]  ;;  %6370 = vmatpush3.bf16.msra.mxu0 %v6369_v8  ;;  %519 = vst.msk [vmem:[#allocation2 + $0x10] sm:$0x3] %vm518_vm2, %v493_v14  ;;  %v496_v18 = vld [vmem:[%s7372_s25 + $0x28] sm:$0x3]  ;;  %v497_v19 = vld [vmem:[%s7372_s25 + $0x30] sm:$0xff] }
 0x13e   : > { %520 = vst.msk [vmem:[#allocation2 + $0x18] sm:$0xff] %vm515_vm1, %v494_v15  ;;  %521 = vst.msk [vmem:[#allocation2 + $0x20] sm:$0xff] %vm515_vm1, %v495_v16  ;;  %v498_v20 = vld [vmem:[%s7372_s25 + $0x38] sm:$0xff]  ;;  %6371 = vmatprep.subr.bf16.mxu0 %v6982_v0  ;;  %v499_v21 = vld [vmem:[%s7372_s25 + $0x40] sm:$0x3]  ;;  %v7432_v27 = vsub.s32 %v627_v12, %v7407_v13  ;;  %vm2344_vm6 = vcmp.ge.s32.totalorder %v7407_v13, 1 }
 0x13f   : > { %522 = vst.msk [vmem:[#allocation2 + $0x28] sm:$0x3] %vm518_vm2, %v496_v18  ;;  %v500_v22 = vld [vmem:[%s7372_s25 + $0x48] sm:$0xff]  ;;  %v501_v23 = vld [vmem:[%s7372_s25 + $0x50] sm:$0xff]  ;;  %525 = vst.msk [vmem:[#allocation2 + $0x40] sm:$0x3] %vm518_vm2, %v499_v21 }
 0x140   : > { %523 = vst.msk [vmem:[#allocation2 + $0x30] sm:$0xff] %vm515_vm1, %v497_v19  ;;  %524 = vst.msk [vmem:[#allocation2 + $0x38] sm:$0xff] %vm515_vm1, %v498_v20  ;;  %v502_v24 = vld [vmem:[%s7372_s25 + $0x58] sm:$0x3]  ;;  %v503_v25 = vld [vmem:[%s7372_s25 + $0x60] sm:$0xff]  ;;  %s9010_s0 = scalar_lea.vmem [#allocation18], %s5632_s28 }
 0x141   : > { %526 = vst.msk [vmem:[#allocation2 + $0x48] sm:$0xff] %vm515_vm1, %v500_v22  ;;  %527 = vst.msk [vmem:[#allocation2 + $0x50] sm:$0xff] %vm515_vm1, %v501_v23  ;;  %v504_v26 = vld [vmem:[%s7372_s25 + $0x68] sm:$0xff]  ;;  %v505_v28 = vld [vmem:[%s7372_s25 + $0x70] sm:$0x3]  ;;  %6373 = vmatpush3.bf16.msra.mxu0 %v6372_v17  ;;  %s5659_s13 = sshll.u32 %s9233_s24, 3 }
 0x142   : > { %528 = vst.msk [vmem:[#allocation2 + $0x58] sm:$0x3] %vm518_vm2, %v502_v24  ;;  %v506_v29 = vld [vmem:[%s7372_s25 + $0x78] sm:$0xff]  ;;  %v507_v30 = vld [vmem:[%s7372_s25 + $0x80] sm:$0xff]  ;;  %531 = vst.msk [vmem:[#allocation2 + $0x70] sm:$0x3] %vm518_vm2, %v505_v28 }
 0x143   : > { %529 = vst.msk [vmem:[#allocation2 + $0x60] sm:$0xff] %vm515_vm1, %v503_v25  ;;  %530 = vst.msk [vmem:[#allocation2 + $0x68] sm:$0xff] %vm515_vm1, %v504_v26  ;;  %v508_v31 = vld [vmem:[%s7372_s25 + $0x88] sm:$0x3]  ;;  %v509_v32 = vld [vmem:[%s7372_s25 + $0x90] sm:$0xff]  ;;  %s9291_s19 = sld [smem:[#allocation29_spill]] }
 0x144   : > { %532 = vst.msk [vmem:[#allocation2 + $0x78] sm:$0xff] %vm515_vm1, %v506_v29  ;;  %533 = vst.msk [vmem:[#allocation2 + $0x80] sm:$0xff] %vm515_vm1, %v507_v30  ;;  %v510_v33 = vld [vmem:[%s7372_s25 + $0x98] sm:$0xff]  ;;  %v511_v34 = vld [vmem:[%s7372_s25 + $0xa0] sm:$0x3]  ;;  %s5833_s30 = sshll.u32 %s9233_s24, 4 }
 0x145   : > { %534 = vst.msk [vmem:[#allocation2 + $0x88] sm:$0x3] %vm518_vm2, %v508_v31  ;;  %v512_v35 = vld [vmem:[%s7372_s25 + $0xa8] sm:$0xff]  ;;  %v513_v36 = vld [vmem:[%s7372_s25 + $0xb0] sm:$0xff]  ;;  %v555_v38 = vld [vmem:[#allocation2 + $0x8] sm:$0xff]  ;;  %s9292_s5 = sld [smem:[#allocation37_spill]] }
 0x146   : > { %535 = vst.msk [vmem:[#allocation2 + $0x90] sm:$0xff] %vm515_vm1, %v509_v32  ;;  %536 = vst.msk [vmem:[#allocation2 + $0x98] sm:$0xff] %vm515_vm1, %v510_v33  ;;  %v554_v37 = vld [vmem:[#allocation2] sm:$0xff]  ;;  %v514_v39 = vld [vmem:[%s7372_s25 + $0xb8] sm:$0x3]  ;;  %v641_v42 = vcombine.high %v555_v38, %v555_v38  ;;  %v648_v43 = vrot.slane %v555_v38, %v7432_v27  ;;  %s5430_s26 = sshll.u32 %s9010_s0, 4  ;;  %s9067_s26 = int_to_ptr.vmem [resolvable:$true] %s5430_s26 }
 0x147   : > { %537 = vst.msk [vmem:[#allocation2 + $0xa0] sm:$0x3] %vm518_vm2, %v511_v34  ;;  %v624_v40 = vcombine.high %v554_v37, %v554_v37  ;;  %v631_v41 = vrot.slane %v554_v37, %v7432_v27  ;;  %v557_v44 = vld [vmem:[#allocation2 + $0x18] sm:$0xff]  ;;  %v558_v45 = vld [vmem:[#allocation2 + $0x20] sm:$0xff]  ;;  %540 = vst.msk [vmem:[#allocation2 + $0xb8] sm:$0x3] %vm518_vm2, %v514_v39 }
 0x148   : > { %538 = vst.msk [vmem:[#allocation2 + $0xa8] sm:$0xff] %vm515_vm1, %v512_v35  ;;  %539 = vst.msk [vmem:[#allocation2 + $0xb0] sm:$0xff] %vm515_vm1, %v513_v36  ;;  %v665_v46 = vcombine.high %v557_v44, %v557_v44  ;;  %v672_v47 = vrot.slane %v557_v44, %v7432_v27  ;;  %v682_v48 = vcombine.high %v558_v45, %v558_v45  ;;  %v5634_v54 = vld.sshfl [vmem:[#allocation2 + $0x10] sm:$0x3 pattern:$0x76325410] }
 0x149   : > { %v689_v49 = vrot.slane %v558_v45, %v7432_v27  ;;  %v638_v50 = vrot.slane %v624_v40, %v7432_v27  ;;  %v639_v51 = vcombine.high %v631_v41, %v631_v41  ;;  %v655_v52 = vrot.slane %v641_v42, %v7432_v27  ;;  %v560_v0 = vld [vmem:[#allocation2 + $0x30] sm:$0xff]  ;;  %v6589_v6 = vld.sshfl [vmem:[#allocation2 + $0x28] sm:$0x3 pattern:$0x76325410]  ;;  %v561_v8 = vld [vmem:[#allocation2 + $0x38] sm:$0xff] }
 0x14a   : > { %v656_v53 = vcombine.high %v648_v43, %v648_v43  ;;  %v679_v55 = vrot.slane %v665_v46, %v7432_v27  ;;  %v680_v56 = vcombine.high %v672_v47, %v672_v47  ;;  %v1085_v61 = vcombine.low %v5634_v54, %v672_v47  ;;  %v541_v9 = vld [vmem:[%s7380_s1] sm:$0xff]  ;;  %v542_v10 = vld [vmem:[%s7380_s1 + $0x8] sm:$0xff]  ;;  %v543_v16 = vld [vmem:[%s7380_s1 + $0x10] sm:$0x3]  ;;  %3031 = vst.msk [vmem:[#allocation3] sm:$0xff] %vm3030_vm3, %v6984_v1  ;;  %s5825_s12 = sshll.u32 %s9291_s19, 5 }
 0x14b   : > { %v640_v57 = vcombine.high %v638_v50, %v638_v50  ;;  %v1051_v58 = vcombine.low %v631_v41, %v639_v51  ;;  %v657_v59 = vcombine.high %v655_v52, %v655_v52  ;;  %v696_v63 = vrot.slane %v682_v48, %v7432_v27  ;;  %548 = vst.msk [vmem:[#allocation2 + $0xc0] sm:$0xff] %vm515_vm1, %v541_v9  ;;  %v544_v17 = vld [vmem:[%s7380_s1 + $0x18] sm:$0xff]  ;;  %v545_v18 = vld [vmem:[%s7380_s1 + $0x20] sm:$0xff]  ;;  %v546_v20 = vld [vmem:[%s7380_s1 + $0x28] sm:$0x3]  ;;  %s5427_s11 = sadd.s32 %s5833_s30, %s5825_s12  ;;  %s9293_s22 = sld [smem:[#allocation51_spill]] }
 0x14c   : > { %v1068_v60 = vcombine.low %v648_v43, %v656_v53  ;;  %v681_v62 = vcombine.high %v679_v55, %v679_v55  ;;  %v697_v5 = vcombine.high %v689_v49, %v689_v49  ;;  %v1086_v7 = vcombine.low %v680_v56, %v679_v55  ;;  %549 = vst.msk [vmem:[#allocation2 + $0xc8] sm:$0xff] %vm515_vm1, %v542_v10  ;;  %v563_v33 = vld [vmem:[#allocation2 + $0x48] sm:$0xff]  ;;  %v6590_v39 = vld.sshfl [vmem:[#allocation2 + $0x40] sm:$0x3 pattern:$0x76325410] }
 0x14d   : > { %v1052_v2 = vcombine.low %v638_v50, %v640_v57  ;;  %v1059_v3 = vrot.slane %v1051_v58, %v7432_v27  ;;  %v1069_v4 = vcombine.low %v655_v52, %v657_v59  ;;  %v713_v15 = vrot.slane %v560_v0, %v7432_v27  ;;  %550 = vst.msk [vmem:[#allocation2 + $0xd0] sm:$0x3] %vm518_vm2, %v543_v16  ;;  %v564_v44 = vld [vmem:[#allocation2 + $0x50] sm:$0xff]  ;;  %v566_v54 = vld [vmem:[#allocation2 + $0x60] sm:$0xff]  ;;  %s5826_s25 = sshll.u32 %s5427_s11, 7  ;;  %s5414_s18 = scalar_lea.sflag [#allocation6], %s7368_s20 }
 0x14e   : > { %v1076_v12 = vrot.slane %v1068_v60, %v7432_v27  ;;  %v706_v19 = vcombine.high %v560_v0, %v560_v0  ;;  %551 = vst.msk [vmem:[#allocation2 + $0xd8] sm:$0xff] %vm515_vm1, %v544_v17  ;;  %552 = vst.msk [vmem:[#allocation2 + $0xe0] sm:$0xff] %vm515_vm1, %v545_v18  ;;  %v1093_v22 = vrot.slane %v1085_v61, %v7432_v27  ;;  %v6591_v0 = vld.sshfl [vmem:[#allocation2 + $0x58] sm:$0x3 pattern:$0x76325410] }
 0x14f   : > { %v1066_v11 = vrot.slane %v1052_v2, %v7432_v27  ;;  %v1083_v14 = vrot.slane %v1069_v4, %v7432_v27  ;;  %v1102_v23 = vcombine.low %v681_v62, %v689_v49  ;;  %v1103_v24 = vcombine.low %v697_v5, %v696_v63  ;;  %553 = vst.msk [vmem:[#allocation2 + $0xe8] sm:$0x3] %vm518_vm2, %v546_v20  ;;  %s6822_s8 = scalar_lea.vmem %s9067_s26, 2048  ;;  %p9294_p10 = scmp.ne.s32.totalorder %s9292_s5, 0 }
 0x150   : > { %v698_v25 = vcombine.high %v696_v63, %v696_v63  ;;  %v720_v26 = vrot.slane %v706_v19, %v7432_v27  ;;  %v730_v28 = vrot.slane %v561_v8, %v7432_v27  ;;  %v1100_v30 = vrot.slane %v1086_v7, %v7432_v27  ;;  %3032 = vst.msk [vmem:[#allocation3 + $0x8] sm:$0xff] %vm3030_vm3, %v6984_v1  ;;  %p6823_p6 = scmp.ne.s32.totalorder %s9067_s26, %s6822_s8  ;;  %s6986_s16 = smov [#allocation18]  }
 0x151   : > { %v1067_v21 = vcombine.low %v1059_v3, %v1066_v11  ;;  %v1084_v29 = vcombine.low %v1076_v12, %v1083_v14  ;;  %v721_v31 = vcombine.high %v713_v15, %v713_v15  ;;  %v723_v32 = vcombine.high %v561_v8, %v561_v8  ;;  %v567_v3 = vld [vmem:[#allocation2 + $0x68] sm:$0xff]  ;;  %3033 = vst.msk [vmem:[#allocation3 + $0x10] sm:$0xff] %vm3030_vm3, %v6984_v1  ;;  %s9072_s27 = scalar_lea.hbm %s9293_s22, %s5826_s25  ;;  %s6826_s1 = sshll.u32 %s6986_s16, 4  ;;  %s6827_s1 = int_to_ptr.vmem [resolvable:$false] %s6826_s1 }
 0x152   : > { %v1110_v34 = vrot.slane %v1102_v23, %v7432_v27  ;;  %v1117_v35 = vrot.slane %v1103_v24, %v7432_v27  ;;  %v1119_v36 = vcombine.low %v698_v25, %v6589_v6  ;;  %v722_v37 = vcombine.high %v720_v26, %v720_v26  ;;  %v569_v24 = vld [vmem:[#allocation2 + $0x78] sm:$0xff]  ;;  %3034 = vst.msk [vmem:[#allocation3 + $0x18] sm:$0xff] %vm3030_vm3, %v6984_v1  ;;  %p6824_p0 = pnand %p6823_p6, %p9294_p10  ;;  %s6828_s24 = scalar_lea.vmem %s6827_s1, 4096 }
 0x153   : > { %6040 = vmatmul.mubr.msk.f32.vlgmr.msra.gmra.mrb[0].mxu0 %vm515_vm1, %v1067_v21  ;;  %v738_v38 = vcombine.high %v730_v28, %v730_v28  ;;  %v1101_v40 = vcombine.low %v1093_v22, %v1100_v30  ;;  %v1120_v41 = vcombine.low %v713_v15, %v721_v31  ;;  %v737_v42 = vrot.slane %v723_v32, %v7432_v27  ;;  %p6829_p3 = scmp.lt.s32.totalorder %s9067_s26, %s6827_s1  ;;  %p6830_p5 = scmp.lt.s32.totalorder %s6828_s24, %s6822_s8 }
 0x154   : > { %6042 = vmatprep.mubr.msk.f32.mxu0 %vm6983_vm0, %v6984_v1  ;;  %v747_v43 = vcombine.high %v563_v33, %v563_v33  ;;  %v754_v45 = vrot.slane %v563_v33, %v7432_v27  ;;  %v1118_v46 = vcombine.low %v1110_v34, %v1117_v35  ;;  %v1127_v47 = vrot.slane %v1119_v36, %v7432_v27  ;;  %v570_v36 = vld [vmem:[#allocation2 + $0x80] sm:$0xff]  ;;  %p6825_p7 = pneg %p6824_p0 }
 0x155   : > { %v1136_v48 = vcombine.low %v720_v26, %v722_v37  ;;  %v1137_v49 = vcombine.low %v730_v28, %v738_v38  ;;  %v1134_v50 = vrot.slane %v1120_v41, %v7432_v27  ;;  %v739_v51 = vcombine.high %v737_v42, %v737_v42  ;;  %3035 = vst.msk [vmem:[#allocation3 + $0x20] sm:$0xff] %vm3030_vm3, %v6984_v1  ;;  %p6831_p13 = por %p6830_p5, %p6829_p3 }
 0x156   : > { %v761_v52 = vrot.slane %v747_v43, %v7432_v27  ;;  %v764_v53 = vcombine.high %v564_v44, %v564_v44  ;;  %v1154_v55 = vcombine.low %v6590_v39, %v754_v45  ;;  %v762_v56 = vcombine.high %v754_v45, %v754_v45  ;;  %3036 = vst.msk [vmem:[#allocation3 + $0x28] sm:$0xff] %vm3030_vm3, %v6984_v1 }
 0x157   : > { %6043 = vmatmul.mubr.msk.f32.gmra.mrb[2].mxu0 %vm515_vm1, %v1084_v29  ;;  %v1144_v57 = vrot.slane %v1136_v48, %v7432_v27  ;;  %v1151_v58 = vrot.slane %v1137_v49, %v7432_v27  ;;  %v771_v59 = vrot.slane %v564_v44, %v7432_v27  ;;  %v788_v60 = vcombine.high %v566_v54, %v566_v54  ;;  %v6592_v29 = vld.sshfl [vmem:[#allocation2 + $0x70] sm:$0x3 pattern:$0x76325410]  ;;  %p6832_p4 = pnand %p6831_p13, %p6825_p7 }
 0x158   : > { %6045 = vmatprep.mubr.msk.f32.mxu0 %vm6983_vm0, %v6984_v1  ;;  %v1135_v61 = vcombine.low %v1127_v47, %v1134_v50  ;;  %v1153_v62 = vcombine.low %v737_v42, %v739_v51  ;;  %v763_v63 = vcombine.high %v761_v52, %v761_v52  ;;  %v778_v2 = vrot.slane %v764_v53, %v7432_v27 }
 0x159   : > { %v1168_v4 = vrot.slane %v1154_v55, %v7432_v27  ;;  %v779_v5 = vcombine.high %v771_v59, %v771_v59  ;;  %v795_v6 = vrot.slane %v566_v54, %v7432_v27  ;;  %v1152_v7 = vcombine.low %v1144_v57, %v1151_v58  ;;  %v573_v58 = vld [vmem:[#allocation2 + $0x98] sm:$0xff]  ;;  %3037 = vst.msk [vmem:[#allocation3 + $0x30] sm:$0xff] %vm3030_vm3, %v6984_v1 }
 0x15a   : > { %v1170_v8 = vcombine.low %v762_v56, %v761_v52  ;;  %v802_v9 = vrot.slane %v788_v60, %v7432_v27  ;;  %v1161_v10 = vrot.slane %v1153_v62, %v7432_v27  ;;  %v1171_v11 = vcombine.low %v763_v63, %v771_v59  ;;  %v6593_v56 = vld.sshfl [vmem:[#allocation2 + $0x88] sm:$0x3 pattern:$0x76325410]  ;;  %3038 = vst.msk [vmem:[#allocation3 + $0x38] sm:$0xff] %vm3030_vm3, %v6984_v1 }
 0x15b   : > { %6046 = vmatmul.mubr.msk.f32.gmra.mrb[4].mxu0 %vm515_vm1, %v1101_v40  ;;  %v780_v12 = vcombine.high %v778_v2, %v778_v2  ;;  %v805_v14 = vcombine.high %v567_v3, %v567_v3  ;;  %v803_v15 = vcombine.high %v795_v6, %v795_v6  ;;  %v1187_v17 = vcombine.low %v779_v5, %v778_v2 }
 0x15c   : > { %6048 = vmatprep.mubr.msk.f32.mxu0 %vm6983_vm0, %v6984_v1  ;;  %v1178_v16 = vrot.slane %v1170_v8, %v7432_v27  ;;  %v804_v18 = vcombine.high %v802_v9, %v802_v9  ;;  %v812_v19 = vrot.slane %v567_v3, %v7432_v27  ;;  %v1169_v20 = vcombine.low %v1161_v10, %v1168_v4 }
 0x15d   : > { %v1185_v21 = vrot.slane %v1171_v11, %v7432_v27  ;;  %v1188_v22 = vcombine.low %v780_v12, %v6591_v0  ;;  %v819_v23 = vrot.slane %v805_v14, %v7432_v27  ;;  %v1204_v25 = vcombine.low %v795_v6, %v803_v15  ;;  %v575_v6 = vld [vmem:[#allocation2 + $0xa8] sm:$0xff]  ;;  %v6594_v12 = vld.sshfl [vmem:[#allocation2 + $0xa0] sm:$0x3 pattern:$0x76325410]  ;;  %3039 = vst.msk [vmem:[#allocation3 + $0x40] sm:$0xff] %vm3030_vm3, %v6984_v1 }
 0x15e   : > { %v1205_v26 = vcombine.low %v802_v9, %v804_v18  ;;  %v820_v28 = vcombine.high %v812_v19, %v812_v19  ;;  %v829_v30 = vcombine.high %v569_v24, %v569_v24  ;;  %v836_v31 = vrot.slane %v569_v24, %v7432_v27  ;;  %3040 = vst.msk [vmem:[#allocation3 + $0x48] sm:$0xff] %vm3030_vm3, %v6984_v1 }
 0x15f   : > { %6049 = vmatmul.mubr.msk.f32.gmra.mrb[6].mxu0 %vm515_vm1, %v1118_v46  ;;  %v1186_v32 = vcombine.low %v1178_v16, %v1185_v21  ;;  %v1195_v33 = vrot.slane %v1187_v17, %v7432_v27  ;;  %v1202_v34 = vrot.slane %v1188_v22, %v7432_v27  ;;  %v821_v35 = vcombine.high %v819_v23, %v819_v23  ;;  %v572_v46 = vld [vmem:[#allocation2 + $0x90] sm:$0xff] }
 0x160   : > { %6051 = vmatprep.mubr.msk.f32.mxu0 %vm6983_vm0, %v6984_v1  ;;  %v1212_v37 = vrot.slane %v1204_v25, %v7432_v27  ;;  %v1219_v38 = vrot.slane %v1205_v26, %v7432_v27  ;;  %v1221_v39 = vcombine.low %v812_v19, %v820_v28  ;;  %v843_v40 = vrot.slane %v829_v30, %v7432_v27  ;;  %v576_v17 = vld [vmem:[#allocation2 + $0xb0] sm:$0xff] }
 0x161   : > { %v844_v41 = vcombine.high %v836_v31, %v836_v31  ;;  %v1203_v42 = vcombine.low %v1195_v33, %v1202_v34  ;;  %v1222_v43 = vcombine.low %v819_v23, %v821_v35  ;;  %v846_v44 = vcombine.high %v570_v36, %v570_v36  ;;  %3041 = vst.msk [vmem:[#allocation3 + $0x50] sm:$0xff] %vm3030_vm3, %v6984_v1 }
 0x162   : > { %v853_v45 = vrot.slane %v570_v36, %v7432_v27  ;;  %v1238_v47 = vcombine.low %v6592_v29, %v836_v31  ;;  %v845_v48 = vcombine.high %v843_v40, %v843_v40  ;;  %v1220_v49 = vcombine.low %v1212_v37, %v1219_v38  ;;  %v578_v29 = vld [vmem:[#allocation2 + $0xc0] sm:$0xff]  ;;  %3042 = vst.msk [vmem:[#allocation3 + $0x58] sm:$0xff] %vm3030_vm3, %v6984_v1 }
 0x163   : > { %6052 = vmatmul.mubr.msk.f32.gmra.mrb[8].mxu0 %vm515_vm1, %v1135_v61  ;;  %v1229_v50 = vrot.slane %v1221_v39, %v7432_v27  ;;  %v1239_v51 = vcombine.low %v844_v41, %v843_v40  ;;  %v870_v52 = vcombine.high %v572_v46, %v572_v46  ;;  %v1236_v53 = vrot.slane %v1222_v43, %v7432_v27  ;;  %v6595_v39 = vld.sshfl [vmem:[#allocation2 + $0xb8] sm:$0x3 pattern:$0x76325410]  ;;  %v579_v41 = vld [vmem:[#allocation2 + $0xc8] sm:$0xff] }
 0x164   : > { %6054 = vmatprep.mubr.msk.f32.mxu0 %vm6983_vm0, %v6984_v1  ;;  %v860_v54 = vrot.slane %v846_v44, %v7432_v27  ;;  %v861_v55 = vcombine.high %v853_v45, %v853_v45  ;;  %v877_v57 = vrot.slane %v572_v46, %v7432_v27  ;;  %v1246_v59 = vrot.slane %v1238_v47, %v7432_v27 }
 0x165   : > { %v1255_v60 = vcombine.low %v845_v48, %v853_v45  ;;  %v1253_v62 = vrot.slane %v1239_v51, %v7432_v27  ;;  %v884_v63 = vrot.slane %v870_v52, %v7432_v27  ;;  %v894_v0 = vrot.slane %v573_v58, %v7432_v27  ;;  %3043 = vst.msk [vmem:[#allocation3 + $0x60] sm:$0xff] %vm3030_vm3, %v6984_v1 }
 0x166   : > { %v862_v61 = vcombine.high %v860_v54, %v860_v54  ;;  %v1237_v2 = vcombine.low %v1229_v50, %v1236_v53  ;;  %v1256_v3 = vcombine.low %v861_v55, %v860_v54  ;;  %v885_v4 = vcombine.high %v877_v57, %v877_v57  ;;  %3044 = vst.msk [vmem:[#allocation3 + $0x68] sm:$0xff] %vm3030_vm3, %v6984_v1 }
 0x167   : > { %6055 = vmatmul.mubr.msk.f32.gmra.mrb[10].mxu0 %vm515_vm1, %v1152_v7  ;;  %v887_v5 = vcombine.high %v573_v58, %v573_v58  ;;  %v1263_v7 = vrot.slane %v1255_v60, %v7432_v27  ;;  %v1254_v8 = vcombine.low %v1246_v59, %v1253_v62  ;;  %v886_v10 = vcombine.high %v884_v63, %v884_v63 }
 0x168   : > { %6057 = vmatprep.mubr.msk.f32.mxu0 %vm6983_vm0, %v6984_v1  ;;  %v1272_v9 = vcombine.low %v862_v61, %v6593_v56  ;;  %v902_v11 = vcombine.high %v894_v0, %v894_v0  ;;  %v1270_v14 = vrot.slane %v1256_v3, %v7432_v27  ;;  %v1273_v15 = vcombine.low %v877_v57, %v885_v4  ;;  %v581_v61 = vld [vmem:[#allocation2 + $0xd8] sm:$0xff]  ;;  %v6596_v3 = vld.sshfl [vmem:[#allocation2 + $0xd0] sm:$0x3 pattern:$0x76325410] }
 0x169   : > { %v901_v16 = vrot.slane %v887_v5, %v7432_v27  ;;  %v911_v18 = vcombine.high %v575_v6, %v575_v6  ;;  %v918_v19 = vrot.slane %v575_v6, %v7432_v27  ;;  %v1289_v21 = vcombine.low %v884_v63, %v886_v10  ;;  %3045 = vst.msk [vmem:[#allocation3 + $0x70] sm:$0xff] %vm3030_vm3, %v6984_v1 }
 0x16a   : > { %v1290_v22 = vcombine.low %v894_v0, %v902_v11  ;;  %v928_v23 = vcombine.high %v576_v17, %v576_v17  ;;  %v1271_v24 = vcombine.low %v1263_v7, %v1270_v14  ;;  %v1287_v25 = vrot.slane %v1273_v15, %v7432_v27  ;;  %3046 = vst.msk [vmem:[#allocation3 + $0x78] sm:$0xff] %vm3030_vm3, %v6984_v1 }
 0x16b   : > { %6058 = vmatmul.mubr.msk.f32.gmra.mrb[12].mxu0 %vm515_vm1, %v1169_v20  ;;  %v1280_v20 = vrot.slane %v1272_v9, %v7432_v27  ;;  %v903_v26 = vcombine.high %v901_v16, %v901_v16  ;;  %v925_v28 = vrot.slane %v911_v18, %v7432_v27  ;;  %v1307_v30 = vcombine.low %v6594_v12, %v918_v19  ;;  %v582_v9 = vld [vmem:[#allocation2 + $0xe0] sm:$0xff] }
 0x16c   : > { %6060 = vmatprep.mubr.msk.f32.mxu0 %vm6983_vm0, %v6984_v1  ;;  %v935_v31 = vrot.slane %v576_v17, %v7432_v27  ;;  %v1304_v33 = vrot.slane %v1290_v22, %v7432_v27  ;;  %v926_v34 = vcombine.high %v918_v19, %v918_v19  ;;  %v942_v35 = vrot.slane %v928_v23, %v7432_v27 }
 0x16d   : > { %v1288_v36 = vcombine.low %v1280_v20, %v1287_v25  ;;  %v1306_v37 = vcombine.low %v901_v16, %v903_v26  ;;  %v927_v38 = vcombine.high %v925_v28, %v925_v28  ;;  %v952_v40 = vcombine.high %v578_v29, %v578_v29 }
 0x16e   : > { %v943_v43 = vcombine.high %v935_v31, %v935_v31  ;;  %v959_v44 = vrot.slane %v578_v29, %v7432_v27  ;;  %v1323_v46 = vcombine.low %v926_v34, %v925_v28  ;;  %v944_v47 = vcombine.high %v942_v35, %v942_v35 }
 0x16f   : > { %6061 = vmatmul.mubr.msk.f32.gmra.mrb[14].mxu0 %vm515_vm1, %v1186_v32  ;;  %v1297_v32 = vrot.slane %v1289_v21, %v7432_v27  ;;  %v1314_v48 = vrot.slane %v1306_v37, %v7432_v27  ;;  %v966_v50 = vrot.slane %v952_v40, %v7432_v27  ;;  %v969_v51 = vcombine.high %v579_v41, %v579_v41 }
 0x170   : > { %6063 = vmatprep.mubr.msk.f32.mxu0 %vm6983_vm0, %v6984_v1  ;;  %v967_v52 = vcombine.high %v959_v44, %v959_v44  ;;  %v1331_v53 = vrot.slane %v1323_v46, %v7432_v27  ;;  %v1340_v54 = vcombine.low %v943_v43, %v942_v35  ;;  %v1341_v55 = vcombine.low %v944_v47, %v6595_v39  ;;  %v7653_v43 = vld [vmem:[#allocation12 + $0x20] sm:$0xff] }
 0x171   : > { %v1305_v45 = vcombine.low %v1297_v32, %v1304_v33  ;;  %v976_v56 = vrot.slane %v579_v41, %v7432_v27  ;;  %v968_v59 = vcombine.high %v966_v50, %v966_v50  ;;  %v983_v60 = vrot.slane %v969_v51, %v7432_v27 }
 0x172   : > { %v1357_v62 = vcombine.low %v959_v44, %v967_v52  ;;  %v1348_v63 = vrot.slane %v1340_v54, %v7432_v27  ;;  %v1355_v0 = vrot.slane %v1341_v55, %v7432_v27  ;;  %v993_v4 = vcombine.high %v581_v61, %v581_v61  ;;  %v7656_v44 = vld [vmem:[#allocation12 + $0x8] sm:$0xff] }
 0x173   : > { %6064 = vmatmul.mubr.msk.f32.gmra.mrb[16].mxu0 %vm515_vm1, %v1203_v42  ;;  %v1321_v42 = vrot.slane %v1307_v30, %v7432_v27  ;;  %v1358_v6 = vcombine.low %v966_v50, %v968_v59  ;;  %v985_v7 = vcombine.high %v983_v60, %v983_v60  ;;  %v1010_v15 = vcombine.high %v582_v9, %v582_v9 }
 0x174   : > { %6066 = vmatprep.mubr.msk.f32.mxu0 %vm6983_vm0, %v6984_v1  ;;  %v1365_v10 = vrot.slane %v1357_v62, %v7432_v27  ;;  %v1356_v11 = vcombine.low %v1348_v63, %v1355_v0  ;;  %v1007_v14 = vrot.slane %v993_v4, %v7432_v27  ;;  %v1017_v19 = vrot.slane %v582_v9, %v7432_v27 }
 0x175   : > { %v1322_v57 = vcombine.low %v1314_v48, %v1321_v42  ;;  %v1372_v16 = vrot.slane %v1358_v6, %v7432_v27  ;;  %v1375_v17 = vcombine.low %v983_v60, %v985_v7  ;;  %v1024_v23 = vrot.slane %v1010_v15, %v7432_v27  ;;  %v3063_v42 = vld [vmem:[#allocation12] sm:$0xff] }
 0x176   : > { %v1009_v22 = vcombine.high %v1007_v14, %v1007_v14  ;;  %v1025_v28 = vcombine.high %v1017_v19, %v1017_v19  ;;  %6108 = vmatprep.subr.mxu0 %v3063_v42  ;;  %6374 = vmatprep.subr.mxu1 %v3063_v42  ;;  %v7672_v0 = vstv %s5659_s13  ;;  %v7681_v7 = vadd.s32 16, %v7407_v13 }
 0x177   : > { %6067 = vmatmul.mubr.msk.f32.gmra.mrb[18].mxu0 %vm515_vm1, %v1220_v49  ;;  %v1324_v49 = vcombine.low %v927_v38, %v935_v31  ;;  %v1389_v25 = vrot.slane %v1375_v17, %v7432_v27  ;;  %v1026_v37 = vcombine.high %v1024_v23, %v1024_v23  ;;  %v5635_v38 = vld.sshfl [vmem:[#allocation2 + $0xe8] sm:$0x3 pattern:$0x76325410]  ;;  %6375 = vmatpush3.msra.mxu1 %v3063_v42  ;;  %vm2314_vm4 = vcmp.ge.s32.totalorder %v7672_v0, 1 }
 0x178   : > { %6069 = vmatprep.mubr.msk.f32.mxu0 %vm6983_vm0, %v6984_v1  ;;  %v1408_v32 = vcombine.low %v1009_v22, %v1017_v19  ;;  %v1409_v33 = vcombine.low %v1025_v28, %v1024_v23  ;;  %6109 = vmatpush3.msra.mxu0 %v3063_v42  ;;  %vm2324_vm5 = vcmp.lt.s32.totalorder %v7672_v0, 17  ;;  %vm2379_vm7 = vcmp.lt.s32.totalorder %v7681_v7, 17 }
 0x179   : > { %v1338_v58 = vrot.slane %v1324_v49, %v7432_v27  ;;  %v1425_v40 = vcombine.low %v1026_v37, %v5635_v38  ;;  %6212 = vmatprep.subr.mxu0 %v7653_v43  ;;  %6134 = vmatprep.subr.mxu1 %v7656_v44  ;;  %v7721_v42 = vadd.s32 6, %v7672_v0  ;;  %vm7729_vm10 = vmand %vm2314_vm4, %vm2324_vm5 }
 0x17a   : > { %v1416_v35 = vrot.slane %v1408_v32, %v7432_v27  ;;  %v7709_v32 = vadd.s32 4, %v7672_v0  ;;  %vm2347_vm11 = vmand %vm7729_vm10, %vm2344_vm6 }
 0x17b   : > { %6070 = vmatmul.mubr.msk.f32.gmra.mrb[20].mxu0 %vm515_vm1, %v1237_v2  ;;  %v984_v2 = vcombine.high %v976_v56, %v976_v56  ;;  %v1339_v5 = vcombine.low %v1331_v53, %v1338_v58  ;;  %v1432_v41 = vrot.slane %v1425_v40, %v7432_v27  ;;  %vm2382_vm12 = vmand %vm7729_vm10, %vm2379_vm7 }
 0x17c   : > { %6072 = vmatprep.mubr.msk.f32.mxu0 %vm6983_vm0, %v6984_v1 }
 0x17d   : > { %v1374_v12 = vcombine.low %v976_v56, %v984_v2 }
 0x17f   : > { %6073 = vmatmul.mubr.msk.f32.gmra.mrb[22].mxu0 %vm515_vm1, %v1254_v8  ;;  %v1000_v8 = vrot.slane %v581_v61, %v7432_v27  ;;  %v1382_v20 = vrot.slane %v1374_v12, %v7432_v27 }
 0x180   : > { %6075 = vmatprep.mubr.msk.f32.mxu0 %vm6983_vm0, %v6984_v1 }
 0x181   : > { %v1008_v18 = vcombine.high %v1000_v8, %v1000_v8  ;;  %v1391_v21 = vcombine.low %v6596_v3, %v1000_v8  ;;  %v1390_v30 = vcombine.low %v1382_v20, %v1389_v25 }
 0x183   : > { %6076 = vmatmul.mubr.msk.f32.gmra.mrb[24].mxu0 %vm515_vm1, %v1271_v24  ;;  %v1373_v24 = vcombine.low %v1365_v10, %v1372_v16  ;;  %v1392_v26 = vcombine.low %v1008_v18, %v1007_v14  ;;  %v1399_v29 = vrot.slane %v1391_v21, %v7432_v27  ;;  %v7694_v18 = vadd.s32 1, %v7672_v0 }
 0x184   : > { %6078 = vmatprep.mubr.msk.f32.mxu0 %vm6983_vm0, %v6984_v1 }
 0x185   : > { %v1406_v31 = vrot.slane %v1392_v26, %v7432_v27  ;;  %vm2315_vm8 = vcmp.ge.s32.totalorder %v7694_v18, 1  ;;  %vm2325_vm9 = vcmp.lt.s32.totalorder %v7694_v18, 17 }
 0x186   : > { %vm7771_vm13 = vmand %vm2315_vm8, %vm2325_vm9  ;;  %vm3315_vm9 = vcmask 1046528  }
 0x187   : > { %6079 = vmatmul.mubr.msk.f32.gmra.mrb[26].mxu0 %vm515_vm1, %v1288_v36  ;;  %v1407_v34 = vcombine.low %v1399_v29, %v1406_v31  ;;  %v1423_v36 = vrot.slane %v1409_v33, %v7432_v27  ;;  %v7706_v31 = vadd.s32 2, %v7672_v0  ;;  %v7712_v33 = vadd.s32 3, %v7672_v0  ;;  %vm7790_vm14 = vmand %vm7771_vm13, %vm2344_vm6 }
 0x188   : > { %6081 = vmatprep.mubr.msk.f32.mxu0 %vm6983_vm0, %v6984_v1  ;;  %vm7804_vm15 = vmand %vm7771_vm13, %vm2379_vm7 }
 0x189   : > { %v1424_v39 = vcombine.low %v1416_v35, %v1423_v36  ;;  %vm2326_vm2 = vcmp.lt.s32.totalorder %v7706_v31, 17  ;;  %vm2317_vm4 = vcmp.ge.s32.totalorder %v7712_v33, 1  ;;  %vm2327_vm5 = vcmp.lt.s32.totalorder %v7712_v33, 17 }
 0x18b   : > { %6082 = vmatmul.mubr.msk.f32.gmra.mrb[28].mxu0 %vm515_vm1, %v1305_v45  ;;  %v5633_v45 = vld [vmem:[#allocation10] ss:$0 sm:$0xff] }
 0x18c   : > { %6084 = vmatprep.mubr.msk.f32.mxu0 %vm6983_vm0, %v6984_v1  ;;  %v1034_v46 = vcombine.high %v5633_v45, %v5633_v45  ;;  %v1041_v47 = vrot.slane %v5633_v45, %v7432_v27 }
 0x18e   : > { %v1049_v48 = vcombine.high %v1041_v47, %v1041_v47  ;;  %v1450_v54 = vcombine.low %v1041_v47, %v1041_v47 }
 0x18f   : > { %6085 = vmatmul.mubr.msk.f32.gmra.mrb[30].mxu0 %vm515_vm1, %v1322_v57 }
 0x190   : > { %6087 = vmatprep.mubr.msk.f32.mxu0 %vm6983_vm0, %v6984_v1  ;;  %v1433_v50 = vcombine.low %v1041_v47, %v1049_v48  ;;  %v1458_v59 = vrot.slane %v1450_v54, %v7432_v27 }
 0x192   : > { %v1441_v52 = vrot.slane %v1433_v50, %v7432_v27 }
 0x193   : > { %6088 = vmatmul.mubr.msk.f32.gmra.mrb[32].mxu0 %vm515_vm1, %v1339_v5 }
 0x194   : > { %6090 = vmatprep.mubr.msk.f32.mxu0 %vm6983_vm0, %v6984_v1 }
 0x197   : > { %6091 = vmatmul.mubr.msk.f32.gmra.mrb[34].mxu0 %vm515_vm1, %v1356_v11 }
 0x198   : > { %6093 = vmatprep.mubr.msk.f32.mxu0 %vm6983_vm0, %v6984_v1 }
 0x19b   : > { %6094 = vmatmul.mubr.msk.f32.gmra.mrb[36].mxu0 %vm515_vm1, %v1373_v24 }
 0x19c   : > { %6096 = vmatprep.mubr.msk.f32.mxu0 %vm6983_vm0, %v6984_v1 }
 0x19f   : > { %6097 = vmatmul.mubr.msk.f32.gmra.mrb[38].mxu0 %vm515_vm1, %v1390_v30 }
 0x1a0   : > { %6099 = vmatprep.mubr.msk.f32.mxu0 %vm6983_vm0, %v6984_v1 }
 0x1a3   : > { %6100 = vmatmul.mubr.msk.f32.gmra.mrb[40].mxu0 %vm515_vm1, %v1407_v34 }
 0x1a4   : > { %6102 = vmatprep.mubr.msk.f32.mxu0 %vm6983_vm0, %v6984_v1 }
 0x1a7   : > { %6103 = vmatmul.mubr.msk.f32.gmra.mrb[42].mxu0 %vm515_vm1, %v1424_v39 }
 0x1a8   : > { %6105 = vmatprep.mubr.msk.f32.mxu0 %vm6983_vm0, %v6984_v1  ;;  %v1048_v1 = vrot.slane %v1034_v46, %v7432_v27  ;;  %vm2316_vm0 = vcmp.ge.s32.totalorder %v7706_v31, 1 }
 0x1a9   : > { %vm7860_vm8 = vmand %vm2316_vm0, %vm2326_vm2 }
 0x1aa   : > { %v1050_v49 = vcombine.high %v1048_v1, %v1048_v1  ;;  %v1451_v55 = vcombine.low %v1049_v48, %v1048_v1  ;;  %vm7973_vm2 = vmand %vm7860_vm8, %vm2379_vm7 }
 0x1ab   : > { %6106 = vmatmul.mubr.msk.f32.gmra.mrb[44].mxu0 %vm515_vm1, %v1432_v41  ;;  %v7718_v41 = vadd.s32 5, %v7672_v0 }
 0x1ac   : > { %v1434_v51 = vcombine.low %v1048_v1, %v1050_v49  ;;  %v1467_v56 = vcombine.low %v1050_v49, %v1041_v47  ;;  %v1465_v60 = vrot.slane %v1451_v55, %v7432_v27 }
 0x1ae   : > { %v1448_v53 = vrot.slane %v1434_v51, %v7432_v27  ;;  %v7669_v61 = vrot.slane %v1467_v56, %v7432_v27  ;;  %v7675_v5 = vcombine.low %v1458_v59, %v1465_v60 }
 0x1b0   : > { %v7663_v57 = vcombine.low %v1441_v52, %v1448_v53  ;;  %v7678_v6 = vcombine.low %v7669_v61, %v1465_v60  ;;  %v7687_v12 = vcombine.low %v7669_v61, %v1441_v52  ;;  %v7691_v14 = vcombine.low %v1448_v53, %v1441_v52 }
 0x1b1   : > { %v7698_v22 = vcombine.low %v1448_v53, %v1458_v59  ;;  %v7701_v23 = vcombine.low %v1465_v60, %v7669_v61 }
 0x226   : > { %v1600_v58 = vpop.f32.mrb[0].mxu0 }
 0x227   : > { %v1601_v62 = vadd.f32 %v1600_v58, %v7663_v57  ;;  %v6041_v63 = vpop.f32.mrb[1].mxu0 }
 0x229   : > { %v1737_v2 = vcombine.high %v1601_v62, %v1601_v62  ;;  %v1744_v3 = vrot.slane %v1601_v62, %v7432_v27 }
 0x22a   : > { %v1605_v4 = vpop.f32.mrb[2].mxu0 }
 0x22b   : > { %v1751_v8 = vrot.slane %v1737_v2, %v7432_v27  ;;  %v1752_v9 = vcombine.high %v1744_v3, %v1744_v3  ;;  %v1606_v10 = vadd.f32 %v1605_v4, %v7663_v57  ;;  %v6044_v11 = vpop.f32.mrb[3].mxu0  ;;  %v2209_v19 = vmax.f32 %v1744_v3, 0.0 }
 0x22d   : > { %v1753_v15 = vcombine.high %v1751_v8, %v1751_v8  ;;  %v2210_v16 = vmax.f32 %v1752_v9, 0.0  ;;  %v1754_v17 = vcombine.high %v1606_v10, %v1606_v10  ;;  %v1761_v20 = vrot.slane %v1606_v10, %v7432_v27 }
 0x22e   : > { %v1610_v21 = vpop.f32.mrb[4].mxu0  ;;  %v2211_v24 = vmax.f32 %v1751_v8, 0.0 }
 0x22f   : > { %v2212_v25 = vmax.f32 %v1753_v15, 0.0  ;;  %v1768_v26 = vrot.slane %v1754_v17, %v7432_v27  ;;  %v1611_v28 = vadd.f32 %v1610_v21, %v7675_v5  ;;  %v6047_v29 = vpop.f32.mrb[5].mxu0  ;;  %v1769_v30 = vcombine.high %v1761_v20, %v1761_v20 }
 0x230   : > { %v2560_v34 = vcombine.low %v2209_v19, %v2210_v16  ;;  %v2213_v49 = vmax.f32 %v1761_v20, 0.0 }
 0x231   : > { %v2561_v35 = vcombine.low %v2211_v24, %v2212_v25  ;;  %v1770_v36 = vcombine.high %v1768_v26, %v1768_v26  ;;  %v1771_v37 = vcombine.high %v1611_v28, %v1611_v28  ;;  %v2214_v38 = vmax.f32 %v1769_v30, 0.0 }
 0x232   : > { %v1778_v39 = vrot.slane %v1611_v28, %v7432_v27  ;;  %v1615_v40 = vpop.f32.mrb[6].mxu0  ;;  %v2215_v45 = vmax.f32 %v1768_v26, 0.0  ;;  %v2568_v58 = vrot.slane %v2560_v34, %v7432_v27 }
 0x233   : > { %v2216_v46 = vmax.f32 %v1770_v36, 0.0  ;;  %v1785_v47 = vrot.slane %v1771_v37, %v7432_v27  ;;  %v1616_v1 = vadd.f32 %v1615_v40, %v7678_v6  ;;  %v6050_v48 = vpop.f32.mrb[7].mxu0  ;;  %v2575_v53 = vrot.slane %v2561_v35, %v7432_v27 }
 0x234   : > { %v1786_v50 = vcombine.high %v1778_v39, %v1778_v39  ;;  %v2217_v51 = vmax.f32 %v1778_v39, 0.0  ;;  %v2577_v59 = vcombine.low %v2213_v49, %v2214_v38 }
 0x235   : > { %v2578_v54 = vcombine.low %v2215_v45, %v2216_v46  ;;  %v1787_v55 = vcombine.high %v1785_v47, %v1785_v47  ;;  %v1788_v56 = vcombine.high %v1616_v1, %v1616_v1  ;;  %v2219_v62 = vmax.f32 %v1785_v47, 0.0 }
 0x236   : > { %v2218_v60 = vmax.f32 %v1786_v50, 0.0  ;;  %v1795_v63 = vrot.slane %v1616_v1, %v7432_v27  ;;  %v1620_v2 = vpop.f32.mrb[8].mxu0  ;;  %v2600_v4 = vrot.slane %v2217_v51, %v7432_v27  ;;  %v2576_v17 = vcombine.low %v2568_v58, %v2575_v53 }
 0x237   : > { %v2220_v3 = vmax.f32 %v1787_v55, 0.0  ;;  %v1802_v8 = vrot.slane %v1788_v56, %v7432_v27  ;;  %v1621_v9 = vadd.f32 %v1620_v2, %v7687_v12  ;;  %v6053_v10 = vpop.f32.mrb[9].mxu0  ;;  %v2592_v11 = vrot.slane %v2578_v54, %v7432_v27 }
 0x238   : > { %v1803_v15 = vcombine.high %v1795_v63, %v1795_v63  ;;  %v2221_v16 = vmax.f32 %v1795_v63, 0.0  ;;  %v2601_v25 = vcombine.low %v2218_v60, %v2219_v62  ;;  %v7749_v29 = vsel %vm2347_vm11, %v2576_v17, 0.0 }
 0x239   : > { %v1804_v19 = vcombine.high %v1802_v8, %v1802_v8  ;;  %v2223_v20 = vmax.f32 %v1802_v8, 0.0  ;;  %v1805_v21 = vcombine.high %v1621_v9, %v1621_v9  ;;  %v1812_v24 = vrot.slane %v1621_v9, %v7432_v27  ;;  %6110 = vmatprep.mubr.msk.f32.mxu0 %vm3030_vm3, %v7749_v29  ;;  %v7794_v9 = vld [vmem:[#allocation12 + $0x30] sm:$0xff] }
 0x23a   : > { %v2222_v26 = vmax.f32 %v1803_v15, 0.0  ;;  %v2602_v28 = vcombine.low %v2220_v3, %v2221_v16  ;;  %v1625_v30 = vpop.f32.mrb[10].mxu0  ;;  %v2585_v39 = vrot.slane %v2577_v59, %v7432_v27  ;;  %v7755_v40 = vsel %vm2382_vm12, %v2600_v4, 0.0  ;;  %vm2353_vm12 = vmand %vm7860_vm8, %vm2344_vm6 }
 0x23b   : > { %v2224_v34 = vmax.f32 %v1804_v19, 0.0  ;;  %v1819_v35 = vrot.slane %v1805_v21, %v7432_v27  ;;  %v1820_v36 = vcombine.high %v1812_v24, %v1812_v24  ;;  %v2225_v37 = vmax.f32 %v1812_v24, 0.0  ;;  %v6056_v38 = vpop.f32.mrb[11].mxu0 }
 0x23c   : > { %v7758_v45 = vadd.s32 7, %v7672_v0  ;;  %v7761_v46 = vadd.s32 8, %v7672_v0  ;;  %v7763_v47 = vcombine.low %v2222_v26, %v2223_v20  ;;  %v1626_v54 = vadd.f32 %v1625_v30, %v7691_v14 }
 0x23d   : > { %v1821_v1 = vcombine.high %v1819_v35, %v1819_v35  ;;  %v2226_v48 = vmax.f32 %v1820_v36, 0.0  ;;  %v7765_v49 = vcombine.low %v2224_v34, %v2225_v37  ;;  %v2227_v51 = vmax.f32 %v1819_v35, 0.0 }
 0x23e   : > { %v2593_v55 = vcombine.low %v2585_v39, %v2592_v11  ;;  %v1630_v56 = vpop.f32.mrb[12].mxu0  ;;  %v2609_v62 = vrot.slane %v2601_v25, %v7432_v27  ;;  %v2616_v63 = vrot.slane %v2602_v28, %v7432_v27  ;;  %v1822_v2 = vcombine.high %v1626_v54, %v1626_v54 }
 0x23f   : > { %v2228_v58 = vmax.f32 %v1821_v1, 0.0  ;;  %v1631_v59 = vadd.f32 %v1630_v56, %v7698_v22  ;;  %v6059_v60 = vpop.f32.mrb[13].mxu0  ;;  %v2641_v18 = vrot.slane %v2226_v48, %v7432_v27  ;;  %v1829_v3 = vrot.slane %v1626_v54, %v7432_v27 }
 0x240   : > { %v7784_v4 = vsel %vm7729_vm10, %v2593_v55, 0.0  ;;  %v2617_v16 = vcombine.low %v2609_v62, %v2616_v63  ;;  %v1836_v19 = vrot.slane %v1822_v2, %v7432_v27  ;;  %v2626_v24 = vrot.slane %v7763_v47, %v7432_v27 }
 0x241   : > { %6111 = vmatmul.mubr.msk.f32.vlgmr.msra.gmra.mrb[46].mxu0 %vm3030_vm3, %v7784_v4  ;;  %v1839_v11 = vcombine.high %v1631_v59, %v1631_v59  ;;  %v1846_v52 = vrot.slane %v1631_v59, %v7432_v27  ;;  %v7810_v17 = vcombine.low %v2227_v51, %v2228_v58  ;;  %v1837_v20 = vcombine.high %v1829_v3, %v1829_v3 }
 0x242   : > { %v1635_v21 = vpop.f32.mrb[14].mxu0  ;;  %6213 = vmatpush3.msra.mxu0 %v7653_v43  ;;  %v2229_v25 = vmax.f32 %v1829_v3, 0.0  ;;  %v7819_v30 = vsel %vm7790_vm14, %v2617_v16, 0.0  ;;  %v1838_v35 = vcombine.high %v1836_v19, %v1836_v19  ;;  %v7824_v38 = vsel %vm7804_vm15, %v2641_v18, 0.0 }
 0x243   : > { %v1853_v26 = vrot.slane %v1839_v11, %v7432_v27  ;;  %v1854_v28 = vcombine.high %v1846_v52, %v1846_v52  ;;  %9242 = vst [vmem:[#allocation39_spill] sm:$0xff] %v7819_v30  ;;  %v6062_v34 = vpop.f32.mrb[15].mxu0  ;;  %6264 = vmatprep.subr.mxu0 %v7794_v9  ;;  %v2230_v36 = vmax.f32 %v1837_v20, 0.0  ;;  %v2233_v37 = vmax.f32 %v1846_v52, 0.0  ;;  %9243 = vst [vmem:[#allocation40_spill] sm:$0xff] %v7824_v38 }
 0x244   : > { %6113 = vmatprep.mubr.msk.f32.mxu0 %vm3030_vm3, %v7819_v30  ;;  %v2231_v43 = vmax.f32 %v1836_v19, 0.0  ;;  %v2232_v48 = vmax.f32 %v1838_v35, 0.0  ;;  %v3321_v54 = vrot.slane %v7819_v30, 1  ;;  %v1636_v55 = vadd.f32 %v1635_v21, %v7701_v23 }
 0x245   : > { %v1855_v39 = vcombine.high %v1853_v26, %v1853_v26  ;;  %v2234_v47 = vmax.f32 %v1854_v28, 0.0  ;;  %v2235_v1 = vmax.f32 %v1853_v26, 0.0  ;;  %v2643_v51 = vcombine.low %v2229_v25, %v2230_v36 }
 0x246   : > { %v1640_v56 = vpop.f32.mrb[16].mxu0  ;;  %v3324_v60 = vrot.slane %v7824_v38, 1  ;;  %v2633_v62 = vrot.slane %v7765_v49, %v7432_v27  ;;  %v1856_v3 = vcombine.high %v1636_v55, %v1636_v55  ;;  %v1863_v8 = vrot.slane %v1636_v55, %v7432_v27 }
 0x247   : > { %v2236_v58 = vmax.f32 %v1855_v39, 0.0  ;;  %v7830_v59 = vcombine.low %v2233_v37, %v2234_v47  ;;  %v6065_v63 = vpop.f32.mrb[17].mxu0  ;;  %v2657_v18 = vrot.slane %v2643_v51, %v7432_v27  ;;  %v7837_v2 = vrot.slane %v2235_v1, %v7432_v27 }
 0x248   : > { %v2659_v11 = vcombine.low %v2231_v43, %v2232_v48  ;;  %v2634_v15 = vcombine.low %v2626_v24, %v2633_v62  ;;  %v1641_v49 = vadd.f32 %v1640_v56, %v7701_v23  ;;  %v1870_v16 = vrot.slane %v1856_v3, %v7432_v27 }
 0x249   : > { %v2674_v52 = vrot.slane %v7830_v59, %v7432_v27  ;;  %v1871_v19 = vcombine.high %v1863_v8, %v1863_v8  ;;  %v2237_v20 = vmax.f32 %v1863_v8, 0.0  ;;  %v2650_v25 = vrot.slane %v7810_v17, %v7432_v27 }
 0x24a   : > { %v1645_v21 = vpop.f32.mrb[18].mxu0  ;;  %v7850_v26 = vsel %vm7771_vm13, %v2634_v15, 0.0  ;;  %v1873_v28 = vcombine.high %v1641_v49, %v1641_v49  ;;  %v1880_v34 = vrot.slane %v1641_v49, %v7432_v27  ;;  %v1872_v36 = vcombine.high %v1870_v16, %v1870_v16  ;;  %vm7898_vm13 = vmand %vm2317_vm4, %vm2327_vm5 }
 0x24b   : > { %9244 = vst [vmem:[#allocation41_spill] sm:$0xff] %v7850_v26  ;;  %v1646_v35 = vadd.f32 %v1645_v21, %v7663_v57  ;;  %v6068_v24 = vpop.f32.mrb[19].mxu0  ;;  %v2238_v37 = vmax.f32 %v1871_v19, 0.0  ;;  %v2239_v43 = vmax.f32 %v1870_v16, 0.0  ;;  %v2683_v39 = vcombine.low %v2236_v58, %v2237_v20  ;;  %6114 = vmatmul.mubr.msk.f32.gmra.mrb[48].mxu0 %vm3030_vm3, %v7850_v26  ;;  %vm7918_vm14 = vmand %vm7898_vm13, %vm2344_vm6 }
 0x24c   : > { %vm2318_vm10 = vcmp.ge.s32.totalorder %v7709_v32, 1  ;;  %vm2328_vm11 = vcmp.lt.s32.totalorder %v7709_v32, 17  ;;  %v3322_v17 = vrot.slane %v7850_v26, 1  ;;  %v1887_v47 = vrot.slane %v1873_v28, %v7432_v27 }
 0x24d   : > { %v1888_v1 = vcombine.high %v1880_v34, %v1880_v34  ;;  %v2667_v48 = vrot.slane %v2659_v11, %v7432_v27  ;;  %v2240_v51 = vmax.f32 %v1872_v36, 0.0  ;;  %v2684_v55 = vcombine.low %v2238_v37, %v2239_v43  ;;  %vm7933_vm15 = vmand %vm2318_vm10, %vm2328_vm11 }
 0x24e   : > { %v2691_v31 = vrot.slane %v2683_v39, %v7432_v27  ;;  %v2241_v56 = vmax.f32 %v1880_v34, 0.0  ;;  %v1650_v58 = vpop.f32.mrb[20].mxu0  ;;  %v1889_v59 = vcombine.high %v1887_v47, %v1887_v47  ;;  %v2243_v63 = vmax.f32 %v1887_v47, 0.0  ;;  %vm7954_vm0 = vmand %vm7933_vm15, %vm2379_vm7 }
 0x24f   : > { %v2242_v62 = vmax.f32 %v1888_v1, 0.0  ;;  %v1890_v3 = vcombine.high %v1646_v35, %v1646_v35  ;;  %v6071_v8 = vpop.f32.mrb[21].mxu0  ;;  %v2698_v15 = vrot.slane %v2684_v55, %v7432_v27  ;;  %v1897_v11 = vrot.slane %v1646_v35, %v7432_v27  ;;  %vm2359_vm10 = vmand %vm7933_vm15, %vm2344_vm6 }
 0x250   : > { %v7875_v49 = vcombine.low %v2240_v51, %v2241_v56  ;;  %v2658_v16 = vcombine.low %v2650_v25, %v2657_v18  ;;  %v7878_v19 = vmax.f32 %v1889_v59, 0.0  ;;  %v1651_v28 = vadd.f32 %v1650_v58, %v7663_v57 }
 0x251   : > { %v7880_v20 = vcombine.low %v2242_v62, %v2243_v63  ;;  %v1904_v21 = vrot.slane %v1890_v3, %v7432_v27  ;;  %v1905_v24 = vcombine.high %v1897_v11, %v1897_v11  ;;  %v2245_v36 = vmax.f32 %v1897_v11, 0.0 }
 0x252   : > { %v2708_v34 = vrot.slane %v7875_v49, %v7432_v27  ;;  %v7886_v37 = vsel %vm2353_vm12, %v2658_v16, 0.0  ;;  %v1655_v43 = vpop.f32.mrb[22].mxu0  ;;  %v2723_v18 = vrot.slane %v7878_v19, %v7432_v27  ;;  %v1907_v55 = vcombine.high %v1651_v28, %v1651_v28 }
 0x253   : > { %v2715_v35 = vrot.slane %v7880_v20, %v7432_v27  ;;  %v1906_v25 = vcombine.high %v1904_v21, %v1904_v21  ;;  %v2247_v39 = vmax.f32 %v1904_v21, 0.0  ;;  %6116 = vmatprep.mubr.msk.f32.mxu0 %vm3030_vm3, %v7886_v37  ;;  %v6074_v1 = vpop.f32.mrb[23].mxu0  ;;  %v2246_v51 = vmax.f32 %v1905_v24, 0.0 }
 0x254   : > { %v1914_v56 = vrot.slane %v1651_v28, %v7432_v27  ;;  %v2675_v58 = vcombine.low %v2667_v48, %v2674_v52  ;;  %v7908_v62 = vsel %vm3315_vm9, %v3321_v54, %v3322_v17  ;;  %v1656_v33 = vadd.f32 %v1655_v43, %v7675_v5 }
 0x255   : > { %v2248_v59 = vmax.f32 %v1906_v25, 0.0  ;;  %v2699_v63 = vcombine.low %v2691_v31, %v2698_v15  ;;  %v7911_v3 = vcombine.low %v2245_v36, %v2246_v51  ;;  %v1921_v8 = vrot.slane %v1907_v55, %v7432_v27 }
 0x256   : > { %v1922_v11 = vcombine.high %v1914_v56, %v1914_v56  ;;  %v2249_v16 = vmax.f32 %v1914_v56, 0.0  ;;  %v1660_v48 = vpop.f32.mrb[24].mxu0  ;;  %v7926_v31 = vsel %vm7860_vm8, %v2675_v58, 0.0  ;;  %v1924_v15 = vcombine.high %v1656_v33, %v1656_v33  ;;  %vm8012_vm8 = vmand %vm7898_vm13, %vm2379_vm7 }
 0x257   : > { %v7922_v54 = vcombine.low %v2247_v39, %v2248_v59  ;;  %v1931_v20 = vrot.slane %v1656_v33, %v7432_v27  ;;  %v6077_v28 = vpop.f32.mrb[25].mxu0  ;;  %v2732_v24 = vrot.slane %v7911_v3, %v7432_v27  ;;  %v1923_v36 = vcombine.high %v1921_v8, %v1921_v8  ;;  %6117 = vmatmul.mubr.msk.f32.gmra.mrb[50].mxu0 %vm3030_vm3, %v7926_v31 }
 0x258   : > { %v2250_v43 = vmax.f32 %v1922_v11, 0.0  ;;  %v2251_v25 = vmax.f32 %v1921_v8, 0.0  ;;  %6214 = vmatprep.mubr.msk.f32.mxu0 %vm3030_vm3, %v7908_v62  ;;  %v1938_v39 = vrot.slane %v1924_v15, %v7432_v27  ;;  %v7946_v51 = vsel %vm7918_vm14, %v2699_v63, 0.0  ;;  %v7977_v28 = vld [vmem:[#allocation12 + $0x40] sm:$0xff] }
 0x259   : > { %v1939_v32 = vcombine.high %v1931_v20, %v1931_v20  ;;  %v2253_v1 = vmax.f32 %v1931_v20, 0.0  ;;  %v2252_v55 = vmax.f32 %v1923_v36, 0.0  ;;  %6119 = vmatprep.mubr.msk.f32.mxu1 %vm3030_vm3, %v7946_v51  ;;  %v7965_v59 = vsel %vm3315_vm9, %v3322_v17, %v3324_v60 }
 0x25a   : > { %v7948_v56 = vcombine.low %v2249_v16, %v2250_v43  ;;  %v3326_v33 = vrot.slane %v7886_v37, 1  ;;  %v1665_v63 = vpop.f32.mrb[26].mxu0  ;;  %v1940_v8 = vcombine.high %v1938_v39, %v1938_v39  ;;  %v2255_v16 = vmax.f32 %v1938_v39, 0.0 }
 0x25b   : > { %v2254_v11 = vmax.f32 %v1939_v32, 0.0  ;;  %v2764_v52 = vrot.slane %v2253_v1, %v7432_v27  ;;  %v6080_v20 = vpop.f32.mrb[27].mxu0  ;;  %v7979_v60 = vcombine.low %v2251_v25, %v2252_v55  ;;  %6215 = vmatmul.mubr.msk.f32.vlgmr.msra.gmra.mrb[52].mxu0 %vm3030_vm3, %v7965_v59  ;;  %v3327_v36 = vrot.slane %v7926_v31, 1 }
 0x25c   : > { %v2749_v17 = vrot.slane %v7948_v56, %v7432_v27  ;;  %v1661_v43 = vadd.f32 %v1660_v48, %v7678_v6  ;;  %v2256_v50 = vmax.f32 %v1940_v8, 0.0  ;;  %v2716_v25 = vcombine.low %v2708_v34, %v2715_v35  ;;  %6265 = vmatpush3.msra.mxu0 %v7794_v9 }
 0x25d   : > { %v7987_v39 = vcombine.low %v2254_v11, %v2255_v16  ;;  %v7991_v32 = vsel %vm7954_vm0, %v2764_v52, 0.0  ;;  %vm2319_vm4 = vcmp.ge.s32.totalorder %v7718_v41, 1  ;;  %vm2329_vm5 = vcmp.lt.s32.totalorder %v7718_v41, 17  ;;  %6316 = vmatprep.subr.mxu0 %v7977_v28  ;;  %v8027_v11 = vld [vmem:[#allocation12 + $0x10] sm:$0xff] }
 0x25e   : > { %9257 = vst [vmem:[#allocation42_spill] sm:$0xff] %v7991_v32  ;;  %v8000_v1 = vsel %vm3315_vm9, %v3326_v33, %v3327_v36  ;;  %v1941_v48 = vcombine.high %v1661_v43, %v1661_v43  ;;  %v1948_v55 = vrot.slane %v1661_v43, %v7432_v27  ;;  %v8006_v58 = vsel %vm7973_vm2, %v7837_v2, 0.0  ;;  %v1670_v9 = vpop.f32.mrb[28].mxu0  ;;  %vm8093_vm11 = vmand %vm2319_vm4, %vm2329_vm5 }
 0x25f   : > { %9258 = vst [vmem:[#allocation43_spill] sm:$0xff] %v8006_v58  ;;  %v2773_v34 = vrot.slane %v7987_v39, %v7432_v27  ;;  %6217 = vmatprep.mubr.msk.f32.mxu0 %vm3030_vm3, %v8000_v1  ;;  %v8023_v2 = vsel %vm7898_vm13, %v2716_v25, 0.0  ;;  %v3329_v35 = vrot.slane %v8006_v58, 1  ;;  %v3331_v33 = vrot.slane %v7946_v51, 1  ;;  %v6083_v8 = vpop.f32.mrb[29].mxu0  ;;  %vm2362_vm14 = vmand %vm8093_vm11, %vm2344_vm6 }
 0x260   : > { %v1955_v16 = vrot.slane %v1941_v48, %v7432_v27  ;;  %v1956_v52 = vcombine.high %v1948_v55, %v1948_v55  ;;  %v2257_v15 = vmax.f32 %v1948_v55, 0.0  ;;  %6120 = vmatmul.mubr.msk.f32.vlgmr.msra.gmra.mrb[0].mxu1 %vm3030_vm3, %v8023_v2  ;;  %v3332_v20 = vrot.slane %v8023_v2, 1 }
 0x261   : > { %v8034_v47 = vsel %vm3315_vm9, %v3327_v36, %v3329_v35  ;;  %v1666_v43 = vadd.f32 %v1665_v63, %v7687_v12  ;;  %v8042_v25 = vsel %vm8012_vm8, %v2723_v18, 0.0  ;;  %v2739_v48 = vrot.slane %v7922_v54, %v7432_v27  ;;  %6135 = vmatpush3.msra.mxu1 %v7656_v44 }
 0x262   : > { %9261 = vst [vmem:[#allocation44_spill] sm:$0xff] %v8042_v25  ;;  %v1957_v55 = vcombine.high %v1955_v16, %v1955_v16  ;;  %v2258_v8 = vmax.f32 %v1956_v52, 0.0  ;;  %v2259_v10 = vmax.f32 %v1955_v16, 0.0  ;;  %v2766_v53 = vcombine.low %v2256_v50, %v2257_v15  ;;  %6218 = vmatmul.mubr.msk.f32.gmra.mrb[54].mxu0 %vm3030_vm3, %v8034_v47  ;;  %v1675_v12 = vpop.f32.mrb[30].mxu0  ;;  %6160 = vmatprep.subr.mxu1 %v8027_v11 }
 0x263   : > { %v8051_v19 = vsel %vm3315_vm9, %v3331_v33, %v3332_v20  ;;  %v1958_v18 = vcombine.high %v1666_v43, %v1666_v43  ;;  %v1965_v63 = vrot.slane %v1666_v43, %v7432_v27  ;;  %v3334_v54 = vrot.slane %v8042_v25, 1  ;;  %v6086_v44 = vpop.f32.mrb[31].mxu0 }
 0x264   : > { %v2260_v36 = vmax.f32 %v1957_v55, 0.0  ;;  %v2780_v50 = vrot.slane %v2766_v53, %v7432_v27  ;;  %v8060_v49 = vcombine.low %v2258_v8, %v2259_v10  ;;  %6220 = vmatprep.mubr.msk.f32.mxu0 %vm3030_vm3, %v8051_v19  ;;  %v2740_v35 = vcombine.low %v2732_v24, %v2739_v48 }
 0x265   : > { %v1972_v33 = vrot.slane %v1958_v18, %v7432_v27  ;;  %v1973_v16 = vcombine.high %v1965_v63, %v1965_v63  ;;  %v2261_v52 = vmax.f32 %v1965_v63, 0.0  ;;  %v8069_v15 = vsel %vm3315_vm9, %v3332_v20, %v3334_v54 }
 0x266   : > { %v2790_v43 = vrot.slane %v8060_v49, %v7432_v27  ;;  %6221 = vmatmul.mubr.msk.f32.gmra.mrb[56].mxu0 %vm3030_vm3, %v8069_v15  ;;  %v8075_v53 = vsel %vm2359_vm10, %v2740_v35, 0.0  ;;  %v1671_v10 = vadd.f32 %v1670_v9, %v7691_v14  ;;  %v2756_v3 = vrot.slane %v7979_v60, %v7432_v27  ;;  %v1680_v24 = vpop.f32.mrb[32].mxu0 }
 0x267   : > { %v1974_v48 = vcombine.high %v1972_v33, %v1972_v33  ;;  %v8080_v55 = vmax.f32 %v1973_v16, 0.0  ;;  %v2263_v8 = vmax.f32 %v1972_v33, 0.0  ;;  %v2783_v20 = vcombine.low %v2260_v36, %v2261_v52  ;;  %6122 = vmatprep.mubr.msk.f32.mxu1 %vm3030_vm3, %v8075_v53  ;;  %v6089_v18 = vpop.f32.mrb[33].mxu0 }
 0x268   : > { %v1975_v63 = vcombine.high %v1671_v10, %v1671_v10  ;;  %v1982_v54 = vrot.slane %v1671_v10, %v7432_v27  ;;  %v2757_v14 = vcombine.low %v2749_v17, %v2756_v3  ;;  %v1676_v9 = vadd.f32 %v1675_v12, %v7698_v22 }
 0x269   : > { %v2264_v44 = vmax.f32 %v1974_v48, 0.0  ;;  %v2797_v36 = vrot.slane %v2783_v20, %v7432_v27  ;;  %v2805_v49 = vrot.slane %v8080_v55, %v7432_v27  ;;  %v3336_v35 = vrot.slane %v8075_v53, 1 }
 0x26a   : > { %v1989_v56 = vrot.slane %v1975_v63, %v7432_v27  ;;  %v1990_v17 = vcombine.high %v1982_v54, %v1982_v54  ;;  %v2265_v22 = vmax.f32 %v1982_v54, 0.0  ;;  %v8104_v12 = vsel %vm7933_vm15, %v2757_v14, 0.0  ;;  %v1685_v41 = vpop.f32.mrb[34].mxu0  ;;  %vm8146_vm15 = vmand %vm8093_vm11, %vm2379_vm7 }
 0x26b   : > { %vm2320_vm12 = vcmp.ge.s32.totalorder %v7721_v42, 1  ;;  %vm2330_vm13 = vcmp.lt.s32.totalorder %v7721_v42, 17  ;;  %v8108_v33 = vcombine.low %v2263_v8, %v2264_v44  ;;  %6123 = vmatmul.mubr.msk.f32.gmra.mrb[2].mxu1 %vm3030_vm3, %v8104_v12  ;;  %v1992_v16 = vcombine.high %v1676_v9, %v1676_v9  ;;  %v6092_v21 = vpop.f32.mrb[35].mxu0 }
 0x26c   : > { %v1999_v52 = vrot.slane %v1676_v9, %v7432_v27  ;;  %v3337_v10 = vrot.slane %v8104_v12, 1  ;;  %v1991_v3 = vcombine.high %v1989_v56, %v1989_v56  ;;  %v2266_v48 = vmax.f32 %v1990_v17, 0.0  ;;  %vm8185_vm4 = vmand %vm2320_vm12, %vm2330_vm13 }
 0x26d   : > { %v2267_v55 = vmax.f32 %v1989_v56, 0.0  ;;  %v2781_v8 = vcombine.low %v2773_v34, %v2780_v50  ;;  %v2006_v20 = vrot.slane %v1992_v16, %v7432_v27  ;;  %v3339_v56 = vrot.slane %v7991_v32, 1  ;;  %vm2365_vm5 = vmand %vm8185_vm4, %vm2344_vm6 }
 0x26e   : > { %v2007_v18 = vcombine.high %v1999_v52, %v1999_v52  ;;  %v2269_v63 = vmax.f32 %v1999_v52, 0.0  ;;  %v8123_v54 = vsel %vm3315_vm9, %v3336_v35, %v3337_v10  ;;  %v2268_v14 = vmax.f32 %v1991_v3, 0.0  ;;  %v1690_v17 = vpop.f32.mrb[36].mxu0  ;;  %vm8242_vm12 = vmand %vm8185_vm4, %vm2379_vm7 }
 0x26f   : > { %v8125_v9 = vcombine.low %v2265_v22, %v2266_v48  ;;  %6223 = vmatprep.mubr.msk.f32.mxu0 %vm3030_vm3, %v8123_v54  ;;  %v8129_v44 = vsel %vm2362_vm14, %v2781_v8, 0.0  ;;  %v2008_v39 = vcombine.high %v2006_v20, %v2006_v20  ;;  %v2271_v50 = vmax.f32 %v2006_v20, 0.0  ;;  %v6095_v16 = vpop.f32.mrb[37].mxu0 }
 0x270   : > { %v2270_v34 = vmax.f32 %v2007_v18, 0.0  ;;  %6125 = vmatprep.mubr.msk.f32.mxu1 %vm3030_vm3, %v8129_v44  ;;  %v1681_v35 = vadd.f32 %v1680_v24, %v7701_v23  ;;  %v8137_v52 = vcombine.low %v2267_v55, %v2268_v14  ;;  %v8140_v21 = vsel %vm3315_vm9, %v3337_v10, %v3339_v56 }
 0x271   : > { %v2821_v22 = vrot.slane %v8125_v9, %v7432_v27  ;;  %v2798_v3 = vcombine.low %v2790_v43, %v2797_v36  ;;  %v2272_v8 = vmax.f32 %v2008_v39, 0.0  ;;  %v8153_v20 = vrot.slane %v2271_v50, %v7432_v27  ;;  %6224 = vmatmul.mubr.msk.f32.gmra.mrb[58].mxu0 %vm3030_vm3, %v8140_v21 }
 0x272   : > { %v8150_v24 = vcombine.low %v2269_v63, %v2270_v34  ;;  %v2009_v10 = vcombine.high %v1681_v35, %v1681_v35  ;;  %v2016_v43 = vrot.slane %v1681_v35, %v7432_v27  ;;  %v1686_v55 = vadd.f32 %v1685_v41, %v7701_v23  ;;  %v1695_v14 = vpop.f32.mrb[38].mxu0 }
 0x273   : > { %v8160_v36 = vsel %vm8093_vm11, %v2798_v3, 0.0  ;;  %v3341_v18 = vrot.slane %v8129_v44, 1  ;;  %vm2321_vm0 = vcmp.ge.s32.totalorder %v7758_v45, 1  ;;  %vm2331_vm2 = vcmp.lt.s32.totalorder %v7758_v45, 17  ;;  %v6098_v41 = vpop.f32.mrb[39].mxu0 }
 0x274   : > { %v2838_v63 = vrot.slane %v8150_v24, %v7432_v27  ;;  %v2023_v9 = vrot.slane %v2009_v10, %v7432_v27  ;;  %6126 = vmatmul.mubr.msk.f32.gmra.mrb[4].mxu1 %vm3030_vm3, %v8160_v36  ;;  %v3342_v60 = vrot.slane %v8160_v36, 1  ;;  %v8174_v23 = vsel %vm8146_vm15, %v2805_v49, 0.0  ;;  %vm8233_vm11 = vmand %vm2321_vm0, %vm2331_vm2 }
 0x275   : > { %9266 = vst [vmem:[#allocation45_spill] sm:$0xff] %v8174_v23  ;;  %v2024_v56 = vcombine.high %v2016_v43, %v2016_v43  ;;  %v2273_v39 = vmax.f32 %v2016_v43, 0.0  ;;  %v2026_v34 = vcombine.high %v1686_v55, %v1686_v55  ;;  %v2033_v50 = vrot.slane %v1686_v55, %v7432_v27  ;;  %vm2368_vm13 = vmand %vm8233_vm11, %vm2344_vm6 }
 0x276   : > { %v2025_v35 = vcombine.high %v2023_v9, %v2023_v9  ;;  %v2275_v16 = vmax.f32 %v2023_v9, 0.0  ;;  %v8178_v3 = vsel %vm3315_vm9, %v3341_v18, %v3342_v60  ;;  %v3344_v24 = vrot.slane %v8174_v23, 1  ;;  %v8192_v18 = vpop.f32.mrb[40].mxu0  ;;  %vm2403_vm15 = vmand %vm8233_vm11, %vm2379_vm7 }
 0x277   : > { %v2274_v48 = vmax.f32 %v2024_v56, 0.0  ;;  %v2847_v10 = vcombine.low %v2272_v8, %v2273_v39  ;;  %v2040_v43 = vrot.slane %v2026_v34, %v7432_v27  ;;  %v2041_v55 = vcombine.high %v2033_v50, %v2033_v50  ;;  %6226 = vmatprep.mubr.msk.f32.mxu0 %vm3030_vm3, %v8178_v3  ;;  %v6101_v32 = vpop.f32.mrb[41].mxu0 }
 0x278   : > { %v2276_v9 = vmax.f32 %v2025_v35, 0.0  ;;  %v2277_v41 = vmax.f32 %v2033_v50, 0.0  ;;  %v8195_v23 = vsel %vm3315_vm9, %v3342_v60, %v3344_v24  ;;  %v2814_v42 = vrot.slane %v8108_v33, %v7432_v27 }
 0x279   : > { %v2848_v25 = vcombine.low %v2274_v48, %v2275_v16  ;;  %v2855_v8 = vrot.slane %v2847_v10, %v7432_v27  ;;  %v2042_v56 = vcombine.high %v2040_v43, %v2040_v43  ;;  %v2278_v39 = vmax.f32 %v2041_v55, 0.0  ;;  %6227 = vmatmul.mubr.msk.f32.gmra.mrb[60].mxu0 %vm3030_vm3, %v8195_v23 }
 0x27a   : > { %v2279_v34 = vmax.f32 %v2040_v43, 0.0  ;;  %v2864_v60 = vcombine.low %v2276_v9, %v2277_v41  ;;  %v2822_v50 = vcombine.low %v2814_v42, %v2821_v22  ;;  %v1691_v35 = vadd.f32 %v1690_v17, %v7663_v57  ;;  %v8215_v48 = vpop.f32.mrb[42].mxu0 }
 0x27b   : > { %vm2322_vm8 = vcmp.ge.s32.totalorder %v7761_v46, 1  ;;  %vm2332_vm10 = vcmp.lt.s32.totalorder %v7761_v46, 17  ;;  %v2862_v32 = vrot.slane %v2848_v25, %v7432_v27  ;;  %v8210_v33 = vmax.f32 %v2042_v56, 0.0  ;;  %v6104_v55 = vpop.f32.mrb[43].mxu0 }
 0x27c   : > { %v1696_v16 = vadd.f32 %v1695_v14, %v7663_v57  ;;  %v2831_v24 = vrot.slane %v8137_v52, %v7432_v27  ;;  %v2865_v10 = vcombine.low %v2278_v39, %v2279_v34  ;;  %v2872_v22 = vrot.slane %v2864_v60, %v7432_v27  ;;  %vm8280_vm14 = vmand %vm2322_vm8, %vm2332_vm10 }
 0x27d   : > { %v8218_v43 = vsel %vm2365_vm5, %v2822_v50, 0.0  ;;  %v2043_v17 = vcombine.high %v1691_v35, %v1691_v35  ;;  %v2050_v57 = vrot.slane %v1691_v35, %v7432_v27  ;;  %v8262_v49 = vsel %vm8242_vm12, %v8153_v20, 0.0  ;;  %vm2371_vm0 = vmand %vm8280_vm14, %vm2344_vm6 }
 0x27e   : > { %6128 = vmatprep.mubr.msk.f32.mxu1 %vm3030_vm3, %v8218_v43  ;;  %v2060_v25 = vcombine.high %v1696_v16, %v1696_v16  ;;  %v2067_v52 = vrot.slane %v1696_v16, %v7432_v27  ;;  %v2879_v14 = vrot.slane %v2865_v10, %v7432_v27  ;;  %v2839_v42 = vcombine.low %v2831_v24, %v2838_v63  ;;  %v8246_v16 = vpop.f32.mrb[44].mxu0  ;;  %vm8338_vm2 = vmand %vm8280_vm14, %vm2379_vm7 }
 0x27f   : > { %v2057_v41 = vrot.slane %v2043_v17, %v7432_v27  ;;  %v3346_v56 = vrot.slane %v8218_v43, 1  ;;  %v2058_v34 = vcombine.high %v2050_v57, %v2050_v57  ;;  %v2281_v60 = vmax.f32 %v2050_v57, 0.0  ;;  %v6107_v55 = vpop.f32.mrb[45].mxu0 }
 0x280   : > { %v2074_v50 = vrot.slane %v2060_v25, %v7432_v27  ;;  %v2075_v35 = vcombine.high %v2067_v52, %v2067_v52  ;;  %v2285_v10 = vmax.f32 %v2067_v52, 0.0  ;;  %v8250_v17 = vsel %vm8185_vm4, %v2839_v42, 0.0 }
 0x281   : > { %v2059_v45 = vcombine.high %v2057_v41, %v2057_v41  ;;  %v2283_v24 = vmax.f32 %v2057_v41, 0.0  ;;  %9273 = vst [vmem:[#allocation46_spill] sm:$0xff] %v8250_v17  ;;  %v2282_v57 = vmax.f32 %v2058_v34, 0.0  ;;  %6129 = vmatmul.mubr.msk.f32.gmra.mrb[6].mxu1 %vm3030_vm3, %v8250_v17  ;;  %v3347_v52 = vrot.slane %v8250_v17, 1 }
 0x282   : > { %v2076_v25 = vcombine.high %v2074_v50, %v2074_v50  ;;  %v2286_v9 = vmax.f32 %v2075_v35, 0.0  ;;  %v2287_v58 = vmax.f32 %v2074_v50, 0.0  ;;  %v2863_v41 = vcombine.low %v2855_v8, %v2862_v32 }
 0x283   : > { %v2284_v38 = vmax.f32 %v2059_v45, 0.0  ;;  %v2888_v42 = vcombine.low %v2281_v60, %v2282_v57  ;;  %v3349_v35 = vrot.slane %v8262_v49, 1  ;;  %v8266_v30 = vsel %vm3315_vm9, %v3346_v56, %v3347_v52 }
 0x284   : > { %v2288_v34 = vmax.f32 %v2076_v25, 0.0  ;;  %v2905_v50 = vcombine.low %v2285_v10, %v2286_v9  ;;  %v8268_v26 = vsel %vm2368_vm13, %v2863_v41, 0.0  ;;  %v2880_v45 = vcombine.low %v2872_v22, %v2879_v14  ;;  %6229 = vmatprep.mubr.msk.f32.mxu0 %vm3030_vm3, %v8266_v30 }
 0x285   : > { %v2889_v55 = vcombine.low %v2283_v24, %v2284_v38  ;;  %v2896_v17 = vrot.slane %v2888_v42, %v7432_v27  ;;  %6131 = vmatprep.mubr.msk.f32.mxu1 %vm3030_vm3, %v8268_v26  ;;  %v3317_v20 = vrot.slane %v7784_v4, 1  ;;  %v8287_v22 = vsel %vm3315_vm9, %v3347_v52, %v3349_v35 }
 0x286   : > { %v2906_v8 = vcombine.low %v2287_v58, %v2288_v34  ;;  %v2913_v32 = vrot.slane %v2905_v50, %v7432_v27  ;;  %v8291_v9 = vsel %vm8233_vm11, %v2880_v45, 0.0  ;;  %v1701_v14 = vadd.f32 %v8192_v18, %v7675_v5  ;;  %6230 = vmatmul.mubr.msk.f32.gmra.mrb[62].mxu0 %vm3030_vm3, %v8287_v22  ;;  %v8332_v45 = vld [vmem:[#allocation12 + $0x18] sm:$0xff] }
 0x287   : > { %v2903_v58 = vrot.slane %v2889_v55, %v7432_v27  ;;  %6132 = vmatmul.mubr.msk.f32.gmra.mrb[8].mxu1 %vm3030_vm3, %v8291_v9  ;;  %v9276_v56 = vrot.slane %v7749_v29, 1  ;;  %v3351_v63 = vrot.slane %v8268_v26, 1  ;;  %v3352_v5 = vrot.slane %v8291_v9, 1 }
 0x288   : > { %v2920_v46 = vrot.slane %v2906_v8, %v7432_v27  ;;  %v2077_v24 = vcombine.high %v1701_v14, %v1701_v14  ;;  %v2084_v39 = vrot.slane %v1701_v14, %v7432_v27  ;;  %v9277_v10 = vrot.slane %v7755_v40, 1 }
 0x289   : > { %v3318_v60 = vsel %vm3315_vm9, %v9276_v56, %v3317_v20  ;;  %v2904_v18 = vcombine.low %v2896_v17, %v2903_v58  ;;  %v8319_v52 = vsel %vm3315_vm9, %v3351_v63, %v3352_v5  ;;  %v9278_v17 = vrot.slane %v8210_v33, %v7432_v27 }
 0x28a   : > { %6136 = vmatprep.mubr.msk.f32.mxu1 %vm3030_vm3, %v3318_v60  ;;  %v3320_v57 = vsel %vm3315_vm9, %v3317_v20, %v9277_v10  ;;  %v2921_v25 = vcombine.low %v2913_v32, %v2920_v46  ;;  %v1706_v42 = vadd.f32 %v8215_v48, %v7678_v6  ;;  %v2091_v34 = vrot.slane %v2077_v24, %v7432_v27 }
 0x28b   : > { %v8324_v41 = vsel %vm2403_vm15, %v9278_v17, 0.0  ;;  %v2092_v50 = vcombine.high %v2084_v39, %v2084_v39  ;;  %v2289_v35 = vmax.f32 %v2084_v39, 0.0  ;;  %6232 = vmatprep.mubr.msk.f32.mxu0 %vm3030_vm3, %v8319_v52  ;;  %6137 = vmatmul.mubr.msk.f32.vlgmr.msra.gmra.mrb[10].mxu1 %vm3030_vm3, %v3320_v57  ;;  %v8343_v6 = vsel %vm2371_vm0, %v2904_v18, 0.0 }
 0x28c   : > { %v3354_v55 = vrot.slane %v8324_v41, 1  ;;  %v8347_v48 = vsel %vm8280_vm14, %v2921_v25, 0.0  ;;  %v2094_v8 = vcombine.high %v1706_v42, %v1706_v42  ;;  %v2101_v32 = vrot.slane %v1706_v42, %v7432_v27  ;;  %6161 = vmatpush3.msra.mxu1 %v8027_v11  ;;  %6139 = vmatprep.mubr.msk.f32.mxu1 %vm3030_vm3, %v7908_v62 }
 0x28d   : > { %v2093_v20 = vcombine.high %v2091_v34, %v2091_v34  ;;  %v2290_v58 = vmax.f32 %v2092_v50, 0.0  ;;  %v2928_v14 = vrot.slane %v2289_v35, %v7432_v27  ;;  %v4053_v56 = vrot.slane %v8343_v6, 1  ;;  %6186 = vmatprep.subr.mxu1 %v8332_v45 }
 0x28e   : > { %v8355_v46 = vsel %vm3315_vm9, %v3352_v5, %v3354_v55  ;;  %v4054_v38 = vrot.slane %v8347_v48, 1  ;;  %v2108_v60 = vrot.slane %v2094_v8, %v7432_v27  ;;  %v2291_v63 = vmax.f32 %v2091_v34, 0.0  ;;  %v8472_v8 = vld [vmem:[#allocation12 + $0x28] sm:$0xff] }
 0x28f   : > { %v2292_v18 = vmax.f32 %v2093_v20, 0.0  ;;  %v8363_v24 = vsel %vm8338_vm2, %v2928_v14, 0.0  ;;  %6233 = vmatmul.mubr.msk.f32.gmra.mrb[64].mxu0 %vm3030_vm3, %v8355_v46  ;;  %v2109_v62 = vcombine.high %v2101_v32, %v2101_v32  ;;  %6140 = vmatmul.mubr.msk.f32.gmra.mrb[12].mxu1 %vm3030_vm3, %v7965_v59  ;;  %v2293_v10 = vmax.f32 %v2101_v32, 0.0 }
 0x290   : > { %v8370_v11 = vsel %vm3315_vm9, %v4053_v56, %v4054_v38  ;;  %v4056_v5 = vrot.slane %v8363_v24, 1  ;;  %v2110_v39 = vcombine.high %v2108_v60, %v2108_v60  ;;  %6142 = vmatprep.mubr.msk.f32.mxu1 %vm3030_vm3, %v8000_v1  ;;  %v2295_v25 = vmax.f32 %v2108_v60, 0.0 }
 0x291   : > { %6235 = vmatprep.mubr.msk.f32.mxu0 %vm3030_vm3, %v8370_v11  ;;  %v2294_v57 = vmax.f32 %v2109_v62, 0.0  ;;  %v1711_v17 = vadd.f32 %v8246_v16, %v7669_v61  ;;  %v2930_v42 = vcombine.low %v2292_v18, %v2293_v10  ;;  %v2309_v34 = vadd.s32 9, %v7672_v0 }
 0x292   : > { %v8380_v59 = vsel %vm3315_vm9, %v4054_v38, %v4056_v5  ;;  %v2296_v50 = vmax.f32 %v2110_v39, 0.0  ;;  %v2929_v55 = vcombine.low %v2290_v58, %v2291_v63  ;;  %vm3583_vm11 = vcmask 1045504  }
 0x293   : > { %6236 = vmatmul.mubr.msk.f32.gmra.mrb[66].mxu0 %vm3030_vm3, %v8380_v59  ;;  %v2117_v35 = vrot.slane %v1711_v17, %v7432_v27  ;;  %6143 = vmatmul.mubr.msk.f32.gmra.mrb[14].mxu1 %vm3030_vm3, %v8034_v47  ;;  %v2946_v61 = vcombine.low %v2294_v57, %v2295_v25  ;;  %vm2323_vm4 = vcmp.ge.s32.totalorder %v2309_v34, 1  ;;  %vm2333_vm5 = vcmp.lt.s32.totalorder %v2309_v34, 17 }
 0x294   : > { %6266 = vmatprep.mubr.msk.f32.mxu0 %vm3030_vm3, %v7886_v37  ;;  %6145 = vmatprep.mubr.msk.f32.mxu1 %vm3030_vm3, %v8051_v19  ;;  %vm8398_vm8 = vmand %vm2323_vm4, %vm2333_vm5  ;;  %v2937_v32 = vrot.slane %v2929_v55, %v7432_v27  ;;  %v2944_v20 = vrot.slane %v2930_v42, %v7432_v27  ;;  %v3585_v57 = vrot.slane %v7784_v4, 2  ;;  %v3584_v34 = vrot.slane %v7749_v29, 2  ;;  %v9284_v55 = vld [vmem:[#allocation41_spill] sm:$0xff]  ;;  %v9285_v29 = vld [vmem:[#allocation39_spill] sm:$0xff] }
 0x295   : > { %v2118_v16 = vcombine.high %v2117_v35, %v2117_v35  ;;  %v2297_v33 = vmax.f32 %v2117_v35, 0.0  ;;  %v2954_v58 = vrot.slane %v2946_v61, %v7432_v27  ;;  %vm2374_vm10 = vmand %vm8398_vm8, %vm2344_vm6  ;;  %v3590_v4 = vrot.slane %v9284_v55, 2 }
 0x296   : > { %v2945_v38 = vcombine.low %v2937_v32, %v2944_v20  ;;  %vm2409_vm6 = vmand %vm8398_vm8, %vm2379_vm7  ;;  %v3586_v61 = vsel %vm3583_vm11, %v3584_v34, %v3585_v57  ;;  %v3595_v20 = vrot.slane %v7926_v31, 2  ;;  %v9289_v34 = vld [vmem:[#allocation42_spill] sm:$0xff] }
 0x297   : > { %6267 = vmatmul.mubr.msk.f32.vlgmr.msra.gmra.mrb[68].mxu0 %vm3030_vm3, %v7926_v31  ;;  %v2947_v0 = vcombine.low %v2296_v50, %v2297_v33  ;;  %6146 = vmatmul.mubr.msk.f32.gmra.mrb[16].mxu1 %vm3030_vm3, %v8069_v15  ;;  %v2298_v14 = vmax.f32 %v2118_v16, 0.0  ;;  %v9283_v50 = vld [vmem:[#allocation46_spill] sm:$0xff]  ;;  %v3587_v16 = vrot.slane %v7755_v40, 2  ;;  %v3589_v33 = vrot.slane %v9285_v29, 2  ;;  %v9286_v40 = vld [vmem:[#allocation40_spill] sm:$0xff] }
 0x298   : > { %6269 = vmatprep.mubr.msk.f32.mxu0 %vm3030_vm3, %v7946_v51  ;;  %6148 = vmatprep.mubr.msk.f32.mxu1 %vm3030_vm3, %v8123_v54  ;;  %v3027_v63 = vsel %vm2374_vm10, %v2945_v38, 0.0  ;;  %v3600_v38 = vrot.slane %v8023_v2, 2 }
 0x299   : > { %v2961_v56 = vrot.slane %v2947_v0, %v7432_v27  ;;  %6317 = vmatpush3.msra.mxu0 %v7977_v28  ;;  %v2969_v13 = vrot.slane %v2298_v14, %v7432_v27  ;;  %v4867_v18 = vrot.slane %v3027_v63, 2  ;;  %v4663_v27 = vrot.slane %v3027_v63, 1 }
 0x29a   : > { %v3588_v0 = vsel %vm3583_vm11, %v3585_v57, %v3587_v16  ;;  %v8476_v32 = vsel %vm3583_vm11, %v3589_v33, %v3590_v4  ;;  %v3594_v14 = vrot.slane %v7886_v37, 2 }
 0x29b   : > { %6270 = vmatmul.mubr.msk.f32.gmra.mrb[70].mxu0 %vm3030_vm3, %v8023_v2  ;;  %v2962_v60 = vcombine.low %v2954_v58, %v2961_v56  ;;  %6149 = vmatmul.mubr.msk.f32.gmra.mrb[18].mxu1 %vm3030_vm3, %v8140_v21  ;;  %v3029_v7 = vsel %vm2409_vm6, %v2969_v13, 0.0  ;;  %v3592_v58 = vrot.slane %v9286_v40, 2 }
 0x29c   : > { %6272 = vmatprep.mubr.msk.f32.mxu0 %vm3030_vm3, %v8075_v53  ;;  %6151 = vmatprep.mubr.msk.f32.mxu1 %vm3030_vm3, %v8178_v3  ;;  %v4870_v10 = vrot.slane %v3029_v7, 2  ;;  %v4666_v42 = vrot.slane %v3029_v7, 1 }
 0x29d   : > { %v3028_v28 = vsel %vm8398_vm8, %v2962_v60, 0.0  ;;  %v8488_v56 = vsel %vm3583_vm11, %v3590_v4, %v3592_v58  ;;  %v9287_v60 = vld [vmem:[#allocation43_spill] sm:$0xff]  ;;  %v3607_v4 = vrot.slane %v9289_v34, 2  ;;  %v3614_v58 = vrot.slane %v8218_v43, 2 }
 0x29e   : > { %v4868_v62 = vrot.slane %v3028_v28, 2  ;;  %v4664_v5 = vrot.slane %v3028_v28, 1  ;;  %v3597_v13 = vrot.slane %v9287_v60, 2  ;;  %v3620_v60 = vrot.slane %v8291_v9, 2 }
 0x29f   : > { %6273 = vmatmul.mubr.msk.f32.gmra.mrb[72].mxu0 %vm3030_vm3, %v8104_v12  ;;  %6152 = vmatmul.mubr.msk.f32.gmra.mrb[20].mxu1 %vm3030_vm3, %v8195_v23  ;;  %v4260_v34 = vrot.slane %v8363_v24, 2 }
 0x2a0   : > { %6275 = vmatprep.mubr.msk.f32.mxu0 %vm3030_vm3, %v8129_v44  ;;  %v8435_v39 = vsel %vm3583_vm11, %v4867_v18, %v4868_v62  ;;  %6154 = vmatprep.mubr.msk.f32.mxu1 %vm3030_vm3, %v8266_v30  ;;  %v8447_v25 = vsel %vm3583_vm11, %v4868_v62, %v4870_v10  ;;  %v8450_v17 = vsel %vm3315_vm9, %v4663_v27, %v4664_v5  ;;  %v3599_v18 = vrot.slane %v7946_v51, 2 }
 0x2a1   : > { %v8458_v35 = vsel %vm3315_vm9, %v4664_v5, %v4666_v42  ;;  %v8504_v62 = vsel %vm3583_vm11, %v3595_v20, %v3597_v13  ;;  %v9288_v5 = vld [vmem:[#allocation44_spill] sm:$0xff]  ;;  %v3604_v10 = vrot.slane %v8075_v53, 2  ;;  %v3610_v42 = vrot.slane %v8160_v36, 2 }
 0x2a2   : > { %v8510_v27 = vsel %vm3583_vm11, %v3599_v18, %v3600_v38  ;;  %v3602_v7 = vrot.slane %v9288_v5, 2  ;;  %v3617_v13 = vrot.slane %v8262_v49, 2  ;;  %v3619_v18 = vrot.slane %v8268_v26, 2 }
 0x2a3   : > { %6276 = vmatmul.mubr.msk.f32.gmra.mrb[74].mxu0 %vm3030_vm3, %v8160_v36  ;;  %6155 = vmatmul.mubr.msk.f32.gmra.mrb[22].mxu1 %vm3030_vm3, %v8287_v22  ;;  %v4258_v49 = vrot.slane %v8347_v48, 2 }
 0x2a4   : > { %6278 = vmatprep.mubr.msk.f32.mxu0 %vm3030_vm3, %v8218_v43  ;;  %6157 = vmatprep.mubr.msk.f32.mxu1 %vm3030_vm3, %v8319_v52  ;;  %v3621_v5 = vsel %vm3583_vm11, %v3619_v18, %v3620_v60  ;;  %v3061_v18 = vld [vmem:[#allocation3 + $0x70] sm:$0xff] }
 0x2a7   : > { %6279 = vmatmul.mubr.msk.f32.gmra.mrb[76].mxu0 %vm3030_vm3, %v9283_v50  ;;  %6158 = vmatmul.mubr.msk.f32.gmra.mrb[24].mxu1 %vm3030_vm3, %v8355_v46 }
 0x2a8   : > { %6281 = vmatprep.mubr.msk.f32.mxu0 %vm3030_vm3, %v8268_v26  ;;  %6162 = vmatprep.mubr.msk.f32.mxu1 %vm3030_vm3, %v3586_v61  ;;  %v3609_v61 = vrot.slane %v8129_v44, 2 }
 0x2aa   : > { %v8544_v33 = vsel %vm3583_vm11, %v3609_v61, %v3610_v42  ;;  %v4261_v61 = vsel %vm3583_vm11, %v4258_v49, %v4260_v34 }
 0x2ab   : > { %6282 = vmatmul.mubr.msk.f32.gmra.mrb[78].mxu0 %vm3030_vm3, %v8291_v9  ;;  %6163 = vmatmul.mubr.msk.f32.vlgmr.msra.gmra.mrb[26].mxu1 %vm3030_vm3, %v3588_v0  ;;  %v3615_v0 = vrot.slane %v9283_v50, 2 }
 0x2ac   : > { %6284 = vmatprep.mubr.msk.f32.mxu0 %vm3030_vm3, %v8343_v6  ;;  %6187 = vmatpush3.msra.mxu1 %v8332_v45  ;;  %v8495_v45 = vsel %vm3583_vm11, %v3594_v14, %v3595_v20  ;;  %v9290_v20 = vld [vmem:[#allocation45_spill] sm:$0xff] }
 0x2ad   : > { %6165 = vmatprep.mubr.msk.f32.mxu1 %vm3030_vm3, %v8476_v32  ;;  %6238 = vmatprep.subr.mxu1 %v8472_v8  ;;  %v3612_v40 = vrot.slane %v9290_v20, 2  ;;  %v3060_v20 = vld [vmem:[#allocation3 + $0x68] sm:$0xff] }
 0x2af   : > { %6285 = vmatmul.mubr.msk.f32.gmra.mrb[80].mxu0 %vm3030_vm3, %v8347_v48  ;;  %6166 = vmatmul.mubr.msk.f32.gmra.mrb[28].mxu1 %vm3030_vm3, %v8488_v56  ;;  %v3613_v14 = vsel %vm3583_vm11, %v3610_v42, %v3612_v40  ;;  %v3059_v40 = vld [vmem:[#allocation3 + $0x60] sm:$0xff] }
 0x2b0   : > { %6287 = vmatprep.mubr.msk.f32.mxu0 %vm3030_vm3, %v3027_v63  ;;  %6168 = vmatprep.mubr.msk.f32.mxu1 %vm3030_vm3, %v8495_v45  ;;  %v3605_v63 = vrot.slane %v8104_v12, 2 }
 0x2b2   : > { %v8527_v57 = vsel %vm3583_vm11, %v3604_v10, %v3605_v63  ;;  %v8537_v16 = vsel %vm3583_vm11, %v3605_v63, %v3607_v4  ;;  %v3618_v63 = vsel %vm3583_vm11, %v3615_v0, %v3617_v13  ;;  %v4257_v10 = vrot.slane %v8343_v6, 2  ;;  %v3062_v13 = vld [vmem:[#allocation3 + $0x78] sm:$0xff] }
 0x2b3   : > { %6288 = vmatmul.mubr.msk.f32.gmra.mrb[82].mxu0 %vm3030_vm3, %v3028_v28  ;;  %6169 = vmatmul.mubr.msk.f32.gmra.mrb[30].mxu1 %vm3030_vm3, %v8504_v62  ;;  %v8520_v28 = vsel %vm3583_vm11, %v3600_v38, %v3602_v7  ;;  %v3616_v38 = vsel %vm3583_vm11, %v3614_v58, %v3615_v0  ;;  %v3622_v7 = vrot.slane %v8324_v41, 2  ;;  %v4661_v41 = vld [vmem:[#allocation12 + $0x38] sm:$0xff] }
 0x2b4   : > { %6318 = vmatprep.mubr.msk.f32.mxu0 %vm3030_vm3, %v8495_v45  ;;  %6171 = vmatprep.mubr.msk.f32.mxu1 %vm3030_vm3, %v8510_v27  ;;  %v4259_v4 = vsel %vm3583_vm11, %v4257_v10, %v4258_v49 }
 0x2b5   : > { %v3623_v42 = vsel %vm3583_vm11, %v3620_v60, %v3622_v7  ;;  %v5108_v7 = vld [vmem:[#allocation15] sm:$0xff] }
 0x2b7   : > { %6319 = vmatmul.mubr.msk.f32.vlgmr.msra.gmra.mrb[84].mxu0 %vm3030_vm3, %v8504_v62  ;;  %6172 = vmatmul.mubr.msk.f32.gmra.mrb[32].mxu1 %vm3030_vm3, %v8520_v28 }
 0x2b8   : > { %6321 = vmatprep.mubr.msk.f32.mxu0 %vm3030_vm3, %v8510_v27  ;;  %6174 = vmatprep.mubr.msk.f32.mxu1 %vm3030_vm3, %v8527_v57 }
 0x2bb   : > { %6322 = vmatmul.mubr.msk.f32.gmra.mrb[86].mxu0 %vm3030_vm3, %v8520_v28  ;;  %6175 = vmatmul.mubr.msk.f32.gmra.mrb[34].mxu1 %vm3030_vm3, %v8537_v16 }
 0x2bc   : > { %6324 = vmatprep.mubr.msk.f32.mxu0 %vm3030_vm3, %v8527_v57  ;;  %6177 = vmatprep.mubr.msk.f32.mxu1 %vm3030_vm3, %v8544_v33 }
 0x2bf   : > { %6325 = vmatmul.mubr.msk.f32.gmra.mrb[88].mxu0 %vm3030_vm3, %v8537_v16  ;;  %6178 = vmatmul.mubr.msk.f32.gmra.mrb[36].mxu1 %vm3030_vm3, %v3613_v14 }
 0x2c0   : > { %6327 = vmatprep.mubr.msk.f32.mxu0 %vm3030_vm3, %v8544_v33  ;;  %6180 = vmatprep.mubr.msk.f32.mxu1 %vm3030_vm3, %v3616_v38 }
 0x2c3   : > { %6328 = vmatmul.mubr.msk.f32.gmra.mrb[90].mxu0 %vm3030_vm3, %v3613_v14  ;;  %6181 = vmatmul.mubr.msk.f32.gmra.mrb[38].mxu1 %vm3030_vm3, %v3618_v63 }
 0x2c4   : > { %6330 = vmatprep.mubr.msk.f32.mxu0 %vm3030_vm3, %v3616_v38  ;;  %6183 = vmatprep.mubr.msk.f32.mxu1 %vm3030_vm3, %v3621_v5 }
 0x2c7   : > { %6331 = vmatmul.mubr.msk.f32.gmra.mrb[92].mxu0 %vm3030_vm3, %v3618_v63  ;;  %6184 = vmatmul.mubr.msk.f32.gmra.mrb[40].mxu1 %vm3030_vm3, %v3623_v42 }
 0x2c8   : > { %6333 = vmatprep.mubr.msk.f32.mxu0 %vm3030_vm3, %v3621_v5  ;;  %6188 = vmatprep.mubr.msk.f32.mxu1 %vm3030_vm3, %v9285_v29 }
 0x2cb   : > { %6334 = vmatmul.mubr.msk.f32.gmra.mrb[94].mxu0 %vm3030_vm3, %v3623_v42  ;;  %6189 = vmatmul.mubr.msk.f32.vlgmr.msra.gmra.mrb[42].mxu1 %vm3030_vm3, %v9284_v55 }
 0x2cc   : > { %6336 = vmatprep.mubr.msk.f32.mxu0 %vm3030_vm3, %v4259_v4  ;;  %6239 = vmatpush3.msra.mxu1 %v8472_v8 }
 0x2cd   : > { %6191 = vmatprep.mubr.msk.f32.mxu1 %vm3030_vm3, %v7886_v37  ;;  %6290 = vmatprep.subr.mxu1 %v4661_v41  ;;  %v3047_v37 = vld [vmem:[#allocation3] sm:$0xff] }
 0x2cf   : > { %6337 = vmatmul.mubr.msk.f32.gmra.mrb[96].mxu0 %vm3030_vm3, %v4261_v61  ;;  %6192 = vmatmul.mubr.msk.f32.gmra.mrb[44].mxu1 %vm3030_vm3, %v7926_v31 }
 0x2d0   : > { %6339 = vmatprep.mubr.msk.f32.mxu0 %vm3030_vm3, %v8435_v39  ;;  %6194 = vmatprep.mubr.msk.f32.mxu1 %vm3030_vm3, %v7946_v51 }
 0x2d3   : > { %6340 = vmatmul.mubr.msk.f32.gmra.mrb[98].mxu0 %vm3030_vm3, %v8447_v25  ;;  %6195 = vmatmul.mubr.msk.f32.gmra.mrb[46].mxu1 %vm3030_vm3, %v8023_v2 }
 0x2d4   : > { %6197 = vmatprep.mubr.msk.f32.mxu1 %vm3030_vm3, %v8075_v53 }
 0x2d7   : > { %6198 = vmatmul.mubr.msk.f32.gmra.mrb[48].mxu1 %vm3030_vm3, %v8104_v12 }
 0x2d8   : > { %6200 = vmatprep.mubr.msk.f32.mxu1 %vm3030_vm3, %v8129_v44  ;;  %v3051_v44 = vld [vmem:[#allocation3 + $0x20] sm:$0xff] }
 0x2db   : > { %6201 = vmatmul.mubr.msk.f32.gmra.mrb[50].mxu1 %vm3030_vm3, %v8160_v36 }
 0x2dc   : > { %6203 = vmatprep.mubr.msk.f32.mxu1 %vm3030_vm3, %v8218_v43 }
 0x2df   : > { %6204 = vmatmul.mubr.msk.f32.gmra.mrb[52].mxu1 %vm3030_vm3, %v9283_v50  ;;  %v3055_v50 = vld [vmem:[#allocation3 + $0x40] sm:$0xff] }
 0x2e0   : > { %6206 = vmatprep.mubr.msk.f32.mxu1 %vm3030_vm3, %v8268_v26  ;;  %v3048_v26 = vld [vmem:[#allocation3 + $0x8] sm:$0xff] }
 0x2e3   : > { %6207 = vmatmul.mubr.msk.f32.gmra.mrb[54].mxu1 %vm3030_vm3, %v8291_v9  ;;  %v3054_v9 = vld [vmem:[#allocation3 + $0x38] sm:$0xff] }
 0x2e4   : > { %6209 = vmatprep.mubr.msk.f32.mxu1 %vm3030_vm3, %v8343_v6 }
 0x2e7   : > { %6210 = vmatmul.mubr.msk.f32.gmra.mrb[56].mxu1 %vm3030_vm3, %v8347_v48 }
 0x2e8   : > { %6240 = vmatprep.mubr.msk.f32.mxu1 %vm3030_vm3, %v8476_v32 }
 0x2eb   : > { %6241 = vmatmul.mubr.msk.f32.vlgmr.msra.gmra.mrb[58].mxu1 %vm3030_vm3, %v8488_v56  ;;  %v3058_v56 = vld [vmem:[#allocation3 + $0x58] sm:$0xff] }
 0x2ec   : > { %6291 = vmatpush3.msra.mxu1 %v4661_v41  ;;  %6243 = vmatprep.mubr.msk.f32.mxu1 %vm3030_vm3, %v8495_v45 }
 0x2ed   : > { %6342 = vmatprep.subr.mxu1 %v5108_v7 }
 0x2ef   : > { %6244 = vmatmul.mubr.msk.f32.gmra.mrb[60].mxu1 %vm3030_vm3, %v8504_v62  ;;  %v3057_v62 = vld [vmem:[#allocation3 + $0x50] sm:$0xff] }
 0x2f0   : > { %6246 = vmatprep.mubr.msk.f32.mxu1 %vm3030_vm3, %v8510_v27 }
 0x2f3   : > { %6247 = vmatmul.mubr.msk.f32.gmra.mrb[62].mxu1 %vm3030_vm3, %v8520_v28 }
 0x2f4   : > { %6249 = vmatprep.mubr.msk.f32.mxu1 %vm3030_vm3, %v8527_v57 }
 0x2f7   : > { %6250 = vmatmul.mubr.msk.f32.gmra.mrb[64].mxu1 %vm3030_vm3, %v8537_v16 }
 0x2f8   : > { %6252 = vmatprep.mubr.msk.f32.mxu1 %vm3030_vm3, %v8544_v33 }
 0x2fb   : > { %6253 = vmatmul.mubr.msk.f32.gmra.mrb[66].mxu1 %vm3030_vm3, %v3613_v14 }
 0x2fc   : > { %6255 = vmatprep.mubr.msk.f32.mxu1 %vm3030_vm3, %v3616_v38 }
 0x2ff   : > { %6256 = vmatmul.mubr.msk.f32.gmra.mrb[68].mxu1 %vm3030_vm3, %v3618_v63 }
 0x300   : > { %6258 = vmatprep.mubr.msk.f32.mxu1 %vm3030_vm3, %v3621_v5 }
 0x303   : > { %6259 = vmatmul.mubr.msk.f32.gmra.mrb[70].mxu1 %vm3030_vm3, %v3623_v42 }
 0x304   : > { %6261 = vmatprep.mubr.msk.f32.mxu1 %vm3030_vm3, %v4259_v4 }
 0x307   : > { %6262 = vmatmul.mubr.msk.f32.gmra.mrb[72].mxu1 %vm3030_vm3, %v4261_v61 }
 0x308   : > { %6292 = vmatprep.mubr.msk.f32.mxu1 %vm3030_vm3, %v8000_v1 }
 0x30b   : > { %6293 = vmatmul.mubr.msk.f32.vlgmr.msra.gmra.mrb[74].mxu1 %vm3030_vm3, %v8034_v47  ;;  %v3050_v47 = vld [vmem:[#allocation3 + $0x18] sm:$0xff] }
 0x30c   : > { %6295 = vmatprep.mubr.msk.f32.mxu1 %vm3030_vm3, %v8051_v19  ;;  %v3049_v19 = vld [vmem:[#allocation3 + $0x10] sm:$0xff]  ;;  %6343 = vmatpush3.msra.mxu1 %v5108_v7 }
 0x30f   : > { %6296 = vmatmul.mubr.msk.f32.gmra.mrb[76].mxu1 %vm3030_vm3, %v8069_v15 }
 0x310   : > { %6298 = vmatprep.mubr.msk.f32.mxu1 %vm3030_vm3, %v8123_v54  ;;  %v3052_v54 = vld [vmem:[#allocation3 + $0x28] sm:$0xff] }
 0x313   : > { %6299 = vmatmul.mubr.msk.f32.gmra.mrb[78].mxu1 %vm3030_vm3, %v8140_v21 }
 0x314   : > { %6301 = vmatprep.mubr.msk.f32.mxu1 %vm3030_vm3, %v8178_v3  ;;  %v6112_v31 = vpop.f32.mrb[46].mxu0 }
 0x315   : > { %v3258_v51 = vadd.f32 %v6112_v31, %v3048_v26  ;;  %v3178_v1 = vpop.f32.mrb[47].mxu0 }
 0x316   : > { %v3257_v2 = vadd.f32 %v3178_v1, %v3047_v37 }
 0x317   : > { %6302 = vmatmul.mubr.msk.f32.gmra.mrb[80].mxu1 %vm3030_vm3, %v8195_v23  ;;  %3274 = vst.msk [vmem:[#allocation3 + $0x8] sm:$0xff] %vm3030_vm3, %v3258_v51 }
 0x318   : > { %6304 = vmatprep.mubr.msk.f32.mxu1 %vm3030_vm3, %v8266_v30  ;;  %3273 = vst.msk [vmem:[#allocation3] sm:$0xff] %vm3030_vm3, %v3257_v2 }
 0x31b   : > { %6305 = vmatmul.mubr.msk.f32.gmra.mrb[82].mxu1 %vm3030_vm3, %v8287_v22 }
 0x31c   : > { %6307 = vmatprep.mubr.msk.f32.mxu1 %vm3030_vm3, %v8319_v52  ;;  %v3053_v52 = vld [vmem:[#allocation3 + $0x30] sm:$0xff] }
 0x31e   : > { %v6115_v15 = vpop.f32.mrb[48].mxu0  ;;  %v3290_v4 = vld [vmem:[#allocation3 + $0x8] sm:$0xff] }
 0x31f   : > { %6308 = vmatmul.mubr.msk.f32.gmra.mrb[84].mxu1 %vm3030_vm3, %v8355_v46  ;;  %v3260_v30 = vadd.f32 %v6115_v15, %v3050_v47  ;;  %v3188_v53 = vpop.f32.mrb[49].mxu0  ;;  %v3289_v26 = vld [vmem:[#allocation3] sm:$0xff] }
 0x320   : > { %6310 = vmatprep.mubr.msk.f32.mxu1 %vm3030_vm3, %v8370_v11  ;;  %v3259_v12 = vadd.f32 %v3188_v53, %v3049_v19 }
 0x321   : > { %3276 = vst.msk [vmem:[#allocation3 + $0x18] sm:$0xff] %vm3030_vm3, %v3260_v30 }
 0x322   : > { %3275 = vst.msk [vmem:[#allocation3 + $0x10] sm:$0xff] %vm3030_vm3, %v3259_v12 }
 0x323   : > { %6311 = vmatmul.mubr.msk.f32.gmra.mrb[86].mxu1 %vm3030_vm3, %v8380_v59 }
 0x324   : > { %6313 = vmatprep.mubr.msk.f32.mxu1 %vm3030_vm3, %v8450_v17  ;;  %v3056_v17 = vld [vmem:[#allocation3 + $0x48] sm:$0xff] }
 0x327   : > { %6314 = vmatmul.mubr.msk.f32.gmra.mrb[88].mxu1 %vm3030_vm3, %v8458_v35 }
 0x328   : > { %v3292_v2 = vld [vmem:[#allocation3 + $0x18] sm:$0xff] }
 0x329   : > { %v3291_v15 = vld [vmem:[#allocation3 + $0x10] sm:$0xff] }
 0x32a   : > { %v6118_v21 = vpop.f32.mrb[50].mxu0 }
 0x32b   : > { %v3262_v36 = vadd.f32 %v6118_v21, %v3052_v54  ;;  %v3198_v23 = vpop.f32.mrb[51].mxu0 }
 0x32c   : > { %v3261_v3 = vadd.f32 %v3198_v23, %v3051_v44 }
 0x32d   : > { %3278 = vst.msk [vmem:[#allocation3 + $0x28] sm:$0xff] %vm3030_vm3, %v3262_v36 }
 0x32e   : > { %3277 = vst.msk [vmem:[#allocation3 + $0x20] sm:$0xff] %vm3030_vm3, %v3261_v3  ;;  %v8683_v43 = vpop.f32.mrb[52].mxu0 }
 0x32f   : > { %v8685_v22 = vpop.f32.mrb[53].mxu0 }
 0x333   : > { %v6121_v6 = vpop.f32.mrb[0].mxu1 }
 0x334   : > { %v3264_v48 = vadd.f32 %v6121_v6, %v3054_v9  ;;  %v3208_v46 = vpop.f32.mrb[1].mxu1  ;;  %v3294_v54 = vld [vmem:[#allocation3 + $0x28] sm:$0xff] }
 0x335   : > { %v8687_v24 = vpop.f32.mrb[54].mxu0  ;;  %v3263_v11 = vadd.f32 %v3208_v46, %v3053_v52  ;;  %v3293_v23 = vld [vmem:[#allocation3 + $0x20] sm:$0xff] }
 0x336   : > { %3280 = vst.msk [vmem:[#allocation3 + $0x38] sm:$0xff] %vm3030_vm3, %v3264_v48  ;;  %v8690_v59 = vpop.f32.mrb[55].mxu0 }
 0x337   : > { %3279 = vst.msk [vmem:[#allocation3 + $0x30] sm:$0xff] %vm3030_vm3, %v3263_v11 }
 0x339   : > { %v8693_v39 = vpop.f32.mrb[56].mxu0 }
 0x33a   : > { %v8695_v25 = vpop.f32.mrb[57].mxu0 }
 0x33d   : > { %v3296_v6 = vld [vmem:[#allocation3 + $0x38] sm:$0xff] }
 0x33e   : > { %v6124_v35 = vpop.f32.mrb[2].mxu1 }
 0x33f   : > { %v3266_v55 = vadd.f32 %v6124_v35, %v3056_v17  ;;  %v3218_v29 = vpop.f32.mrb[3].mxu1  ;;  %v3295_v17 = vld [vmem:[#allocation3 + $0x30] sm:$0xff] }
 0x340   : > { %v3265_v8 = vadd.f32 %v3218_v29, %v3055_v50 }
 0x341   : > { %3282 = vst.msk [vmem:[#allocation3 + $0x48] sm:$0xff] %vm3030_vm3, %v3266_v55 }
 0x342   : > { %3281 = vst.msk [vmem:[#allocation3 + $0x40] sm:$0xff] %vm3030_vm3, %v3265_v8 }
 0x344   : > { %v8699_v32 = vpop.f32.mrb[58].mxu0 }
 0x345   : > { %v8701_v45 = vpop.f32.mrb[59].mxu0 }
 0x347   : > { %v6127_v27 = vpop.f32.mrb[4].mxu1 }
 0x348   : > { %v3268_v28 = vadd.f32 %v6127_v27, %v3058_v56  ;;  %v3228_v57 = vpop.f32.mrb[5].mxu1  ;;  %v3298_v29 = vld [vmem:[#allocation3 + $0x48] sm:$0xff] }
 0x349   : > { %v3267_v16 = vadd.f32 %v3228_v57, %v3057_v62  ;;  %v3297_v27 = vld [vmem:[#allocation3 + $0x40] sm:$0xff] }
 0x34a   : > { %3284 = vst.msk [vmem:[#allocation3 + $0x58] sm:$0xff] %vm3030_vm3, %v3268_v28 }
 0x34b   : > { %3283 = vst.msk [vmem:[#allocation3 + $0x50] sm:$0xff] %vm3030_vm3, %v3267_v16 }
 0x34c   : > { %v8705_v33 = vpop.f32.mrb[60].mxu0 }
 0x34d   : > { %v8707_v0 = vpop.f32.mrb[61].mxu0 }
 0x354   : > { %v6130_v58 = vpop.f32.mrb[6].mxu1 }
 0x355   : > { %v3270_v14 = vadd.f32 %v6130_v58, %v3060_v20  ;;  %v3238_v38 = vpop.f32.mrb[7].mxu1  ;;  %v3300_v20 = vld [vmem:[#allocation3 + $0x58] sm:$0xff] }
 0x356   : > { %v3269_v60 = vadd.f32 %v3238_v38, %v3059_v40  ;;  %v3299_v38 = vld [vmem:[#allocation3 + $0x50] sm:$0xff] }
 0x357   : > { %3286 = vst.msk [vmem:[#allocation3 + $0x68] sm:$0xff] %vm3030_vm3, %v3270_v14 }
 0x358   : > { %3285 = vst.msk [vmem:[#allocation3 + $0x60] sm:$0xff] %vm3030_vm3, %v3269_v60 }
 0x359   : > { %v8711_v63 = vpop.f32.mrb[62].mxu0 }
 0x35a   : > { %v6133_v5 = vpop.f32.mrb[8].mxu1  ;;  %v8713_v10 = vpop.f32.mrb[63].mxu0 }
 0x35b   : > { %v3272_v49 = vadd.f32 %v6133_v5, %v3062_v13  ;;  %v3248_v42 = vpop.f32.mrb[9].mxu1 }
 0x35c   : > { %v3271_v34 = vadd.f32 %v3248_v42, %v3061_v18 }
 0x35d   : > { %3288 = vst.msk [vmem:[#allocation3 + $0x78] sm:$0xff] %vm3030_vm3, %v3272_v49 }
 0x35e   : > { %3287 = vst.msk [vmem:[#allocation3 + $0x70] sm:$0xff] %vm3030_vm3, %v3271_v34  ;;  %v6138_v41 = vpop.f32.mrb[10].mxu1  ;;  %v3302_v5 = vld [vmem:[#allocation3 + $0x68] sm:$0xff] }
 0x35f   : > { %v3534_v61 = vadd.f32 %v6138_v41, %v3290_v4  ;;  %v3454_v37 = vpop.f32.mrb[11].mxu1  ;;  %v3301_v34 = vld [vmem:[#allocation3 + $0x60] sm:$0xff] }
 0x360   : > { %v3533_v31 = vadd.f32 %v3454_v37, %v3289_v26 }
 0x361   : > { %3550 = vst.msk [vmem:[#allocation3 + $0x8] sm:$0xff] %vm3030_vm3, %v3534_v61 }
 0x362   : > { %v8718_v51 = vpop.f32.mrb[64].mxu0  ;;  %3549 = vst.msk [vmem:[#allocation3] sm:$0xff] %vm3030_vm3, %v3533_v31  ;;  %v6141_v47 = vpop.f32.mrb[12].mxu1 }
 0x363   : > { %v8721_v1 = vpop.f32.mrb[65].mxu0  ;;  %v3536_v19 = vadd.f32 %v6141_v47, %v3292_v2  ;;  %v3464_v30 = vpop.f32.mrb[13].mxu1 }
 0x364   : > { %v3535_v53 = vadd.f32 %v3464_v30, %v3291_v15  ;;  %v3304_v26 = vld [vmem:[#allocation3 + $0x78] sm:$0xff] }
 0x365   : > { %3552 = vst.msk [vmem:[#allocation3 + $0x18] sm:$0xff] %vm3030_vm3, %v3536_v19  ;;  %v3303_v47 = vld [vmem:[#allocation3 + $0x70] sm:$0xff] }
 0x366   : > { %v8724_v12 = vpop.f32.mrb[66].mxu0  ;;  %3551 = vst.msk [vmem:[#allocation3 + $0x10] sm:$0xff] %vm3030_vm3, %v3535_v53  ;;  %v6144_v44 = vpop.f32.mrb[14].mxu1 }
 0x367   : > { %v8727_v21 = vpop.f32.mrb[67].mxu0  ;;  %v3538_v36 = vadd.f32 %v6144_v44, %v3294_v54  ;;  %v3474_v3 = vpop.f32.mrb[15].mxu1 }
 0x368   : > { %v3537_v9 = vadd.f32 %v3474_v3, %v3293_v23  ;;  %v3566_v53 = vld [vmem:[#allocation3 + $0x8] sm:$0xff] }
 0x369   : > { %3554 = vst.msk [vmem:[#allocation3 + $0x28] sm:$0xff] %vm3030_vm3, %v3538_v36  ;;  %v3565_v23 = vld [vmem:[#allocation3] sm:$0xff] }
 0x36a   : > { %v8730_v52 = vpop.f32.mrb[68].mxu0  ;;  %3553 = vst.msk [vmem:[#allocation3 + $0x20] sm:$0xff] %vm3030_vm3, %v3537_v9  ;;  %v6147_v48 = vpop.f32.mrb[16].mxu1 }
 0x36b   : > { %v8733_v46 = vpop.f32.mrb[69].mxu0  ;;  %v3540_v11 = vadd.f32 %v6147_v48, %v3296_v6  ;;  %v3484_v50 = vpop.f32.mrb[17].mxu1 }
 0x36c   : > { %v3539_v35 = vadd.f32 %v3484_v50, %v3295_v17  ;;  %v3568_v48 = vld [vmem:[#allocation3 + $0x18] sm:$0xff] }
 0x36d   : > { %3556 = vst.msk [vmem:[#allocation3 + $0x38] sm:$0xff] %vm3030_vm3, %v3540_v11 }
 0x36e   : > { %v8736_v55 = vpop.f32.mrb[70].mxu0  ;;  %3555 = vst.msk [vmem:[#allocation3 + $0x30] sm:$0xff] %vm3030_vm3, %v3539_v35  ;;  %v6150_v8 = vpop.f32.mrb[18].mxu1  ;;  %v3567_v35 = vld [vmem:[#allocation3 + $0x10] sm:$0xff] }
 0x36f   : > { %v8739_v56 = vpop.f32.mrb[71].mxu0  ;;  %v3542_v62 = vadd.f32 %v6150_v8, %v3298_v29  ;;  %v3494_v28 = vpop.f32.mrb[19].mxu1 }
 0x370   : > { %v3541_v57 = vadd.f32 %v3494_v28, %v3297_v27  ;;  %v3570_v27 = vld [vmem:[#allocation3 + $0x28] sm:$0xff] }
 0x371   : > { %3558 = vst.msk [vmem:[#allocation3 + $0x48] sm:$0xff] %vm3030_vm3, %v3542_v62 }
 0x372   : > { %v8742_v16 = vpop.f32.mrb[72].mxu0  ;;  %3557 = vst.msk [vmem:[#allocation3 + $0x40] sm:$0xff] %vm3030_vm3, %v3541_v57  ;;  %v6153_v40 = vpop.f32.mrb[20].mxu1 }
 0x373   : > { %v8745_v58 = vpop.f32.mrb[73].mxu0  ;;  %v3544_v14 = vadd.f32 %v6153_v40, %v3300_v20  ;;  %v3504_v60 = vpop.f32.mrb[21].mxu1  ;;  %v3569_v40 = vld [vmem:[#allocation3 + $0x20] sm:$0xff] }
 0x374   : > { %v3543_v13 = vadd.f32 %v3504_v60, %v3299_v38 }
 0x375   : > { %3560 = vst.msk [vmem:[#allocation3 + $0x58] sm:$0xff] %vm3030_vm3, %v3544_v14 }
 0x376   : > { %v8748_v18 = vpop.f32.mrb[74].mxu0  ;;  %3559 = vst.msk [vmem:[#allocation3 + $0x50] sm:$0xff] %vm3030_vm3, %v3543_v13  ;;  %v6156_v7 = vpop.f32.mrb[22].mxu1  ;;  %v3572_v13 = vld [vmem:[#allocation3 + $0x38] sm:$0xff] }
 0x377   : > { %v8751_v49 = vpop.f32.mrb[75].mxu0  ;;  %v3546_v42 = vadd.f32 %v6156_v7, %v3302_v5  ;;  %v3514_v4 = vpop.f32.mrb[23].mxu1 }
 0x378   : > { %v3545_v41 = vadd.f32 %v3514_v4, %v3301_v34  ;;  %v3571_v34 = vld [vmem:[#allocation3 + $0x30] sm:$0xff] }
 0x379   : > { %3562 = vst.msk [vmem:[#allocation3 + $0x68] sm:$0xff] %vm3030_vm3, %v3546_v42 }
 0x37a   : > { %v8754_v61 = vpop.f32.mrb[76].mxu0  ;;  %3561 = vst.msk [vmem:[#allocation3 + $0x60] sm:$0xff] %vm3030_vm3, %v3545_v41  ;;  %v6159_v37 = vpop.f32.mrb[24].mxu1 }
 0x37b   : > { %v8757_v31 = vpop.f32.mrb[77].mxu0  ;;  %v3548_v2 = vadd.f32 %v6159_v37, %v3304_v26  ;;  %v3524_v19 = vpop.f32.mrb[25].mxu1  ;;  %v3574_v37 = vld [vmem:[#allocation3 + $0x48] sm:$0xff] }
 0x37c   : > { %v3547_v15 = vadd.f32 %v3524_v19, %v3303_v47 }
 0x37d   : > { %3564 = vst.msk [vmem:[#allocation3 + $0x78] sm:$0xff] %vm3030_vm3, %v3548_v2 }
 0x37e   : > { %v8760_v30 = vpop.f32.mrb[78].mxu0  ;;  %3563 = vst.msk [vmem:[#allocation3 + $0x70] sm:$0xff] %vm3030_vm3, %v3547_v15  ;;  %v6164_v54 = vpop.f32.mrb[26].mxu1  ;;  %v3573_v15 = vld [vmem:[#allocation3 + $0x40] sm:$0xff] }
 0x37f   : > { %v8763_v44 = vpop.f32.mrb[79].mxu0  ;;  %v3802_v36 = vadd.f32 %v6164_v54, %v3566_v53  ;;  %v3722_v3 = vpop.f32.mrb[27].mxu1 }
 0x380   : > { %v3801_v9 = vadd.f32 %v3722_v3, %v3565_v23  ;;  %v3576_v23 = vld [vmem:[#allocation3 + $0x58] sm:$0xff] }
 0x381   : > { %3818 = vst.msk [vmem:[#allocation3 + $0x8] sm:$0xff] %vm3030_vm3, %v3802_v36 }
 0x382   : > { %v8766_v6 = vpop.f32.mrb[80].mxu0  ;;  %3817 = vst.msk [vmem:[#allocation3] sm:$0xff] %vm3030_vm3, %v3801_v9  ;;  %v6167_v11 = vpop.f32.mrb[28].mxu1 }
 0x383   : > { %v8769_v17 = vpop.f32.mrb[81].mxu0  ;;  %v3804_v50 = vadd.f32 %v6167_v11, %v3568_v48  ;;  %v3732_v29 = vpop.f32.mrb[29].mxu1  ;;  %v3575_v11 = vld [vmem:[#allocation3 + $0x50] sm:$0xff] }
 0x384   : > { %v3803_v8 = vadd.f32 %v3732_v29, %v3567_v35 }
 0x385   : > { %3820 = vst.msk [vmem:[#allocation3 + $0x18] sm:$0xff] %vm3030_vm3, %v3804_v50 }
 0x386   : > { %v8772_v62 = vpop.f32.mrb[82].mxu0  ;;  %3819 = vst.msk [vmem:[#allocation3 + $0x10] sm:$0xff] %vm3030_vm3, %v3803_v8  ;;  %v6170_v28 = vpop.f32.mrb[30].mxu1  ;;  %v3578_v8 = vld [vmem:[#allocation3 + $0x68] sm:$0xff] }
 0x387   : > { %v8775_v57 = vpop.f32.mrb[83].mxu0  ;;  %v3806_v20 = vadd.f32 %v6170_v28, %v3570_v27  ;;  %v3742_v14 = vpop.f32.mrb[31].mxu1 }
 0x388   : > { %v3805_v38 = vadd.f32 %v3742_v14, %v3569_v40  ;;  %v3577_v40 = vld [vmem:[#allocation3 + $0x60] sm:$0xff] }
 0x389   : > { %3822 = vst.msk [vmem:[#allocation3 + $0x28] sm:$0xff] %vm3030_vm3, %v3806_v20 }
 0x38a   : > { %v8778_v60 = vpop.f32.mrb[84].mxu0  ;;  %3821 = vst.msk [vmem:[#allocation3 + $0x20] sm:$0xff] %vm3030_vm3, %v3805_v38  ;;  %v6173_v5 = vpop.f32.mrb[32].mxu1 }
 0x38b   : > { %v8781_v7 = vpop.f32.mrb[85].mxu0  ;;  %v3808_v42 = vadd.f32 %v6173_v5, %v3572_v13  ;;  %v3752_v4 = vpop.f32.mrb[33].mxu1  ;;  %v3580_v5 = vld [vmem:[#allocation3 + $0x78] sm:$0xff] }
 0x38c   : > { %v3807_v41 = vadd.f32 %v3752_v4, %v3571_v34 }
 0x38d   : > { %3824 = vst.msk [vmem:[#allocation3 + $0x38] sm:$0xff] %vm3030_vm3, %v3808_v42 }
 0x38e   : > { %v8784_v26 = vpop.f32.mrb[86].mxu0  ;;  %3823 = vst.msk [vmem:[#allocation3 + $0x30] sm:$0xff] %vm3030_vm3, %v3807_v41  ;;  %v6176_v2 = vpop.f32.mrb[34].mxu1  ;;  %v3579_v41 = vld [vmem:[#allocation3 + $0x70] sm:$0xff] }
 0x38f   : > { %v8787_v47 = vpop.f32.mrb[87].mxu0  ;;  %v3810_v19 = vadd.f32 %v6176_v2, %v3574_v37  ;;  %v3762_v53 = vpop.f32.mrb[35].mxu1 }
 0x390   : > { %v3809_v54 = vadd.f32 %v3762_v53, %v3573_v15  ;;  %v3834_v15 = vld [vmem:[#allocation3 + $0x8] sm:$0xff] }
 0x391   : > { %3826 = vst.msk [vmem:[#allocation3 + $0x48] sm:$0xff] %vm3030_vm3, %v3810_v19 }
 0x392   : > { %v8790_v36 = vpop.f32.mrb[88].mxu0  ;;  %3825 = vst.msk [vmem:[#allocation3 + $0x40] sm:$0xff] %vm3030_vm3, %v3809_v54  ;;  %v6179_v3 = vpop.f32.mrb[36].mxu1 }
 0x393   : > { %v8793_v9 = vpop.f32.mrb[89].mxu0  ;;  %v3812_v48 = vadd.f32 %v6179_v3, %v3576_v23  ;;  %v3772_v50 = vpop.f32.mrb[37].mxu1  ;;  %v3833_v3 = vld [vmem:[#allocation3] sm:$0xff] }
 0x394   : > { %v3811_v35 = vadd.f32 %v3772_v50, %v3575_v11 }
 0x395   : > { %3828 = vst.msk [vmem:[#allocation3 + $0x58] sm:$0xff] %vm3030_vm3, %v3812_v48 }
 0x396   : > { %v8796_v29 = vpop.f32.mrb[90].mxu0  ;;  %3827 = vst.msk [vmem:[#allocation3 + $0x50] sm:$0xff] %vm3030_vm3, %v3811_v35  ;;  %v6182_v27 = vpop.f32.mrb[38].mxu1  ;;  %v3836_v35 = vld [vmem:[#allocation3 + $0x18] sm:$0xff] }
 0x397   : > { %v8799_v28 = vpop.f32.mrb[91].mxu0  ;;  %v3814_v20 = vadd.f32 %v6182_v27, %v3578_v8  ;;  %v3782_v14 = vpop.f32.mrb[39].mxu1 }
 0x398   : > { %v3813_v38 = vadd.f32 %v3782_v14, %v3577_v40  ;;  %v3835_v40 = vld [vmem:[#allocation3 + $0x10] sm:$0xff] }
 0x399   : > { %3830 = vst.msk [vmem:[#allocation3 + $0x68] sm:$0xff] %vm3030_vm3, %v3814_v20 }
 0x39a   : > { %v8802_v13 = vpop.f32.mrb[92].mxu0  ;;  %3829 = vst.msk [vmem:[#allocation3 + $0x60] sm:$0xff] %vm3030_vm3, %v3813_v38  ;;  %v6185_v42 = vpop.f32.mrb[40].mxu1 }
 0x39b   : > { %v8805_v34 = vpop.f32.mrb[93].mxu0  ;;  %v3816_v4 = vadd.f32 %v6185_v42, %v3580_v5  ;;  %v3792_v37 = vpop.f32.mrb[41].mxu1  ;;  %v3838_v42 = vld [vmem:[#allocation3 + $0x28] sm:$0xff] }
 0x39c   : > { %v3815_v2 = vadd.f32 %v3792_v37, %v3579_v41 }
 0x39d   : > { %3832 = vst.msk [vmem:[#allocation3 + $0x78] sm:$0xff] %vm3030_vm3, %v3816_v4 }
 0x39e   : > { %v8808_v19 = vpop.f32.mrb[94].mxu0  ;;  %3831 = vst.msk [vmem:[#allocation3 + $0x70] sm:$0xff] %vm3030_vm3, %v3815_v2  ;;  %v6190_v53 = vpop.f32.mrb[42].mxu1  ;;  %v3837_v2 = vld [vmem:[#allocation3 + $0x20] sm:$0xff] }
 0x39f   : > { %v8811_v54 = vpop.f32.mrb[95].mxu0  ;;  %v4003_v23 = vadd.f32 %v6190_v53, %v3834_v15  ;;  %v3923_v48 = vpop.f32.mrb[43].mxu1 }
 0x3a0   : > { %v4002_v11 = vadd.f32 %v3923_v48, %v3833_v3 }
 0x3a1   : > { %4019 = vst.msk [vmem:[#allocation3 + $0x8] sm:$0xff] %vm3030_vm3, %v4003_v23 }
 0x3a2   : > { %v8814_v50 = vpop.f32.mrb[96].mxu0  ;;  %4018 = vst.msk [vmem:[#allocation3] sm:$0xff] %vm3030_vm3, %v4002_v11  ;;  %v6193_v8 = vpop.f32.mrb[44].mxu1  ;;  %v3840_v11 = vld [vmem:[#allocation3 + $0x38] sm:$0xff] }
 0x3a3   : > { %v8817_v27 = vpop.f32.mrb[97].mxu0  ;;  %v4005_v20 = vadd.f32 %v6193_v8, %v3836_v35  ;;  %v3933_v14 = vpop.f32.mrb[45].mxu1 }
 0x3a4   : > { %v4004_v38 = vadd.f32 %v3933_v14, %v3835_v40  ;;  %v3839_v40 = vld [vmem:[#allocation3 + $0x30] sm:$0xff] }
 0x3a5   : > { %4021 = vst.msk [vmem:[#allocation3 + $0x18] sm:$0xff] %vm3030_vm3, %v4005_v20 }
 0x3a6   : > { %v8820_v5 = vpop.f32.mrb[98].mxu0  ;;  %4020 = vst.msk [vmem:[#allocation3 + $0x10] sm:$0xff] %vm3030_vm3, %v4004_v38  ;;  %v6196_v4 = vpop.f32.mrb[46].mxu1 }
 0x3a7   : > { %v8823_v41 = vpop.f32.mrb[99].mxu0  ;;  %v4007_v37 = vadd.f32 %v6196_v4, %v3838_v42  ;;  %v3943_v15 = vpop.f32.mrb[47].mxu1 }
 0x3a8   : > { %v4006_v53 = vadd.f32 %v3943_v15, %v3837_v2  ;;  %v4035_v23 = vld [vmem:[#allocation3 + $0x8] sm:$0xff] }
 0x3a9   : > { %4023 = vst.msk [vmem:[#allocation3 + $0x28] sm:$0xff] %vm3030_vm3, %v4007_v37  ;;  %v4208_v3 = vadd.f32 %v8683_v43, %v4035_v23  ;;  %v4034_v48 = vld [vmem:[#allocation3] sm:$0xff]  ;;  %v3842_v37 = vld [vmem:[#allocation3 + $0x48] sm:$0xff] }
 0x3aa   : > { %4022 = vst.msk [vmem:[#allocation3 + $0x20] sm:$0xff] %vm3030_vm3, %v4006_v53  ;;  %v6199_v35 = vpop.f32.mrb[48].mxu1  ;;  %v4207_v8 = vadd.f32 %v8685_v22, %v4034_v48  ;;  %v3841_v53 = vld [vmem:[#allocation3 + $0x40] sm:$0xff] }
 0x3ab   : > { %v4009_v20 = vadd.f32 %v6199_v35, %v3840_v11  ;;  %v3953_v14 = vpop.f32.mrb[49].mxu1  ;;  %4224 = vst.msk [vmem:[#allocation3 + $0x8] sm:$0xff] %vm3030_vm3, %v4208_v3  ;;  %v3844_v35 = vld [vmem:[#allocation3 + $0x58] sm:$0xff] }
 0x3ac   : > { %v4008_v38 = vadd.f32 %v3953_v14, %v3839_v40  ;;  %4223 = vst.msk [vmem:[#allocation3] sm:$0xff] %vm3030_vm3, %v4207_v8  ;;  %v4037_v42 = vld [vmem:[#allocation3 + $0x18] sm:$0xff]  ;;  %v3843_v40 = vld [vmem:[#allocation3 + $0x50] sm:$0xff] }
 0x3ad   : > { %4025 = vst.msk [vmem:[#allocation3 + $0x38] sm:$0xff] %vm3030_vm3, %v4009_v20  ;;  %v4210_v43 = vadd.f32 %v8687_v24, %v4037_v42  ;;  %v4036_v4 = vld [vmem:[#allocation3 + $0x10] sm:$0xff] }
 0x3ae   : > { %4024 = vst.msk [vmem:[#allocation3 + $0x30] sm:$0xff] %vm3030_vm3, %v4008_v38  ;;  %v6202_v2 = vpop.f32.mrb[50].mxu1  ;;  %v4209_v22 = vadd.f32 %v8690_v59, %v4036_v4  ;;  %v3846_v4 = vld [vmem:[#allocation3 + $0x68] sm:$0xff] }
 0x3af   : > { %v4011_v15 = vadd.f32 %v6202_v2, %v3842_v37  ;;  %v3963_v23 = vpop.f32.mrb[51].mxu1  ;;  %4226 = vst.msk [vmem:[#allocation3 + $0x18] sm:$0xff] %vm3030_vm3, %v4210_v43 }
 0x3b0   : > { %v4010_v3 = vadd.f32 %v3963_v23, %v3841_v53  ;;  %4225 = vst.msk [vmem:[#allocation3 + $0x10] sm:$0xff] %vm3030_vm3, %v4209_v22  ;;  %v4039_v48 = vld [vmem:[#allocation3 + $0x28] sm:$0xff]  ;;  %v3845_v22 = vld [vmem:[#allocation3 + $0x60] sm:$0xff] }
 0x3b1   : > { %4027 = vst.msk [vmem:[#allocation3 + $0x48] sm:$0xff] %vm3030_vm3, %v4011_v15  ;;  %v4212_v24 = vadd.f32 %v8693_v39, %v4039_v48  ;;  %v4038_v11 = vld [vmem:[#allocation3 + $0x20] sm:$0xff]  ;;  %v3848_v48 = vld [vmem:[#allocation3 + $0x78] sm:$0xff] }
 0x3b2   : > { %4026 = vst.msk [vmem:[#allocation3 + $0x40] sm:$0xff] %vm3030_vm3, %v4010_v3  ;;  %v6205_v8 = vpop.f32.mrb[52].mxu1  ;;  %v4211_v59 = vadd.f32 %v8695_v25, %v4038_v11 }
 0x3b3   : > { %v4013_v20 = vadd.f32 %v6205_v8, %v3844_v35  ;;  %v3973_v14 = vpop.f32.mrb[53].mxu1  ;;  %4228 = vst.msk [vmem:[#allocation3 + $0x28] sm:$0xff] %vm3030_vm3, %v4212_v24  ;;  %v3847_v35 = vld [vmem:[#allocation3 + $0x70] sm:$0xff] }
 0x3b4   : > { %v4012_v38 = vadd.f32 %v3973_v14, %v3843_v40  ;;  %4227 = vst.msk [vmem:[#allocation3 + $0x20] sm:$0xff] %vm3030_vm3, %v4211_v59  ;;  %v4041_v42 = vld [vmem:[#allocation3 + $0x38] sm:$0xff]  ;;  %v4240_v14 = vld [vmem:[#allocation3 + $0x8] sm:$0xff] }
 0x3b5   : > { %4029 = vst.msk [vmem:[#allocation3 + $0x58] sm:$0xff] %vm3030_vm3, %v4013_v20  ;;  %v4214_v39 = vadd.f32 %v8699_v32, %v4041_v42  ;;  %v4040_v43 = vld [vmem:[#allocation3 + $0x30] sm:$0xff] }
 0x3b6   : > { %4028 = vst.msk [vmem:[#allocation3 + $0x50] sm:$0xff] %vm3030_vm3, %v4012_v38  ;;  %v6208_v37 = vpop.f32.mrb[54].mxu1  ;;  %v4213_v25 = vadd.f32 %v8701_v45, %v4040_v43 }
 0x3b7   : > { %v4015_v2 = vadd.f32 %v6208_v37, %v3846_v4  ;;  %v3983_v15 = vpop.f32.mrb[55].mxu1  ;;  %4230 = vst.msk [vmem:[#allocation3 + $0x38] sm:$0xff] %vm3030_vm3, %v4214_v39  ;;  %v4239_v39 = vld [vmem:[#allocation3] sm:$0xff] }
 0x3b8   : > { %v4014_v53 = vadd.f32 %v3983_v15, %v3845_v22  ;;  %4229 = vst.msk [vmem:[#allocation3 + $0x30] sm:$0xff] %vm3030_vm3, %v4213_v25  ;;  %v4043_v23 = vld [vmem:[#allocation3 + $0x48] sm:$0xff] }
 0x3b9   : > { %4031 = vst.msk [vmem:[#allocation3 + $0x68] sm:$0xff] %vm3030_vm3, %v4015_v2  ;;  %v4216_v32 = vadd.f32 %v8705_v33, %v4043_v23  ;;  %v4042_v3 = vld [vmem:[#allocation3 + $0x40] sm:$0xff]  ;;  %v4242_v2 = vld [vmem:[#allocation3 + $0x18] sm:$0xff] }
 0x3ba   : > { %4030 = vst.msk [vmem:[#allocation3 + $0x60] sm:$0xff] %vm3030_vm3, %v4014_v53  ;;  %v6211_v24 = vpop.f32.mrb[56].mxu1  ;;  %v4215_v45 = vadd.f32 %v8707_v0, %v4042_v3  ;;  %v4241_v53 = vld [vmem:[#allocation3 + $0x10] sm:$0xff] }
 0x3bb   : > { %v4017_v11 = vadd.f32 %v6211_v24, %v3848_v48  ;;  %v3993_v8 = vpop.f32.mrb[57].mxu1  ;;  %4232 = vst.msk [vmem:[#allocation3 + $0x48] sm:$0xff] %vm3030_vm3, %v4216_v32  ;;  %v4244_v24 = vld [vmem:[#allocation3 + $0x28] sm:$0xff] }
 0x3bc   : > { %v4016_v59 = vadd.f32 %v3993_v8, %v3847_v35  ;;  %4231 = vst.msk [vmem:[#allocation3 + $0x40] sm:$0xff] %vm3030_vm3, %v4215_v45  ;;  %v4045_v20 = vld [vmem:[#allocation3 + $0x58] sm:$0xff]  ;;  %v4243_v35 = vld [vmem:[#allocation3 + $0x20] sm:$0xff] }
 0x3bd   : > { %4033 = vst.msk [vmem:[#allocation3 + $0x78] sm:$0xff] %vm3030_vm3, %v4017_v11  ;;  %v4218_v33 = vadd.f32 %v8711_v63, %v4045_v20  ;;  %v4044_v40 = vld [vmem:[#allocation3 + $0x50] sm:$0xff] }
 0x3be   : > { %4032 = vst.msk [vmem:[#allocation3 + $0x70] sm:$0xff] %vm3030_vm3, %v4016_v59  ;;  %v6242_v38 = vpop.f32.mrb[58].mxu1  ;;  %v4217_v0 = vadd.f32 %v8713_v10, %v4044_v40  ;;  %v4246_v40 = vld [vmem:[#allocation3 + $0x38] sm:$0xff] }
 0x3bf   : > { %v4412_v42 = vadd.f32 %v6242_v38, %v4240_v14  ;;  %v4332_v43 = vpop.f32.mrb[59].mxu1  ;;  %4234 = vst.msk [vmem:[#allocation3 + $0x58] sm:$0xff] %vm3030_vm3, %v4218_v33 }
 0x3c0   : > { %v4411_v4 = vadd.f32 %v4332_v43, %v4239_v39  ;;  %4233 = vst.msk [vmem:[#allocation3 + $0x50] sm:$0xff] %vm3030_vm3, %v4217_v0  ;;  %v4047_v37 = vld [vmem:[#allocation3 + $0x68] sm:$0xff]  ;;  %v4245_v0 = vld [vmem:[#allocation3 + $0x30] sm:$0xff] }
 0x3c1   : > { %4428 = vst.msk [vmem:[#allocation3 + $0x8] sm:$0xff] %vm3030_vm3, %v4412_v42  ;;  %v4220_v63 = vadd.f32 %v8718_v51, %v4047_v37  ;;  %v4046_v25 = vld [vmem:[#allocation3 + $0x60] sm:$0xff] }
 0x3c2   : > { %4427 = vst.msk [vmem:[#allocation3] sm:$0xff] %vm3030_vm3, %v4411_v4  ;;  %v6245_v22 = vpop.f32.mrb[60].mxu1  ;;  %v4219_v10 = vadd.f32 %v8721_v1, %v4046_v25  ;;  %v4248_v37 = vld [vmem:[#allocation3 + $0x48] sm:$0xff] }
 0x3c3   : > { %v4414_v15 = vadd.f32 %v6245_v22, %v4242_v2  ;;  %v4342_v23 = vpop.f32.mrb[61].mxu1  ;;  %4236 = vst.msk [vmem:[#allocation3 + $0x68] sm:$0xff] %vm3030_vm3, %v4220_v63  ;;  %v4247_v2 = vld [vmem:[#allocation3 + $0x40] sm:$0xff] }
 0x3c4   : > { %v4413_v32 = vadd.f32 %v4342_v23, %v4241_v53  ;;  %4235 = vst.msk [vmem:[#allocation3 + $0x60] sm:$0xff] %vm3030_vm3, %v4219_v10  ;;  %v4049_v3 = vld [vmem:[#allocation3 + $0x78] sm:$0xff] }
 0x3c5   : > { %4430 = vst.msk [vmem:[#allocation3 + $0x18] sm:$0xff] %vm3030_vm3, %v4414_v15  ;;  %v4222_v51 = vadd.f32 %v8724_v12, %v4049_v3  ;;  %v4048_v48 = vld [vmem:[#allocation3 + $0x70] sm:$0xff] }
 0x3c6   : > { %4429 = vst.msk [vmem:[#allocation3 + $0x10] sm:$0xff] %vm3030_vm3, %v4413_v32  ;;  %v6248_v45 = vpop.f32.mrb[62].mxu1  ;;  %v4221_v1 = vadd.f32 %v8727_v21, %v4048_v48  ;;  %v4250_v23 = vld [vmem:[#allocation3 + $0x58] sm:$0xff] }
 0x3c7   : > { %v4416_v11 = vadd.f32 %v6248_v45, %v4244_v24  ;;  %v4352_v8 = vpop.f32.mrb[63].mxu1  ;;  %4238 = vst.msk [vmem:[#allocation3 + $0x78] sm:$0xff] %vm3030_vm3, %v4222_v51  ;;  %v4249_v51 = vld [vmem:[#allocation3 + $0x50] sm:$0xff] }
 0x3c8   : > { %v4415_v59 = vadd.f32 %v4352_v8, %v4243_v35  ;;  %4237 = vst.msk [vmem:[#allocation3 + $0x70] sm:$0xff] %vm3030_vm3, %v4221_v1  ;;  %v4444_v20 = vld [vmem:[#allocation3 + $0x8] sm:$0xff] }
 0x3c9   : > { %4432 = vst.msk [vmem:[#allocation3 + $0x28] sm:$0xff] %vm3030_vm3, %v4416_v11  ;;  %v4613_v12 = vadd.f32 %v8730_v52, %v4444_v20  ;;  %v4443_v33 = vld [vmem:[#allocation3] sm:$0xff] }
 0x3ca   : > { %4431 = vst.msk [vmem:[#allocation3 + $0x20] sm:$0xff] %vm3030_vm3, %v4415_v59  ;;  %v6251_v14 = vpop.f32.mrb[64].mxu1  ;;  %v4612_v21 = vadd.f32 %v8733_v46, %v4443_v33  ;;  %v4252_v11 = vld [vmem:[#allocation3 + $0x68] sm:$0xff] }
 0x3cb   : > { %v4418_v38 = vadd.f32 %v6251_v14, %v4246_v40  ;;  %v4362_v42 = vpop.f32.mrb[65].mxu1  ;;  %4629 = vst.msk [vmem:[#allocation3 + $0x8] sm:$0xff] %vm3030_vm3, %v4613_v12  ;;  %v4251_v59 = vld [vmem:[#allocation3 + $0x60] sm:$0xff] }
 0x3cc   : > { %v4417_v39 = vadd.f32 %v4362_v42, %v4245_v0  ;;  %4628 = vst.msk [vmem:[#allocation3] sm:$0xff] %vm3030_vm3, %v4612_v21  ;;  %v4446_v43 = vld [vmem:[#allocation3 + $0x18] sm:$0xff] }
 0x3cd   : > { %4434 = vst.msk [vmem:[#allocation3 + $0x38] sm:$0xff] %vm3030_vm3, %v4418_v38  ;;  %v4615_v52 = vadd.f32 %v8736_v55, %v4446_v43  ;;  %v4445_v4 = vld [vmem:[#allocation3 + $0x10] sm:$0xff] }
 0x3ce   : > { %4433 = vst.msk [vmem:[#allocation3 + $0x30] sm:$0xff] %vm3030_vm3, %v4417_v39  ;;  %v6254_v63 = vpop.f32.mrb[66].mxu1  ;;  %v4614_v46 = vadd.f32 %v8739_v56, %v4445_v4  ;;  %v4254_v14 = vld [vmem:[#allocation3 + $0x78] sm:$0xff] }
 0x3cf   : > { %v4420_v25 = vadd.f32 %v6254_v63, %v4248_v37  ;;  %v4372_v22 = vpop.f32.mrb[67].mxu1  ;;  %4631 = vst.msk [vmem:[#allocation3 + $0x18] sm:$0xff] %vm3030_vm3, %v4615_v52  ;;  %v4253_v0 = vld [vmem:[#allocation3 + $0x70] sm:$0xff] }
 0x3d0   : > { %v4419_v10 = vadd.f32 %v4372_v22, %v4247_v2  ;;  %4630 = vst.msk [vmem:[#allocation3 + $0x10] sm:$0xff] %vm3030_vm3, %v4614_v46  ;;  %v4448_v15 = vld [vmem:[#allocation3 + $0x28] sm:$0xff] }
 0x3d1   : > { %4436 = vst.msk [vmem:[#allocation3 + $0x48] sm:$0xff] %vm3030_vm3, %v4420_v25  ;;  %v4617_v55 = vadd.f32 %v8742_v16, %v4448_v15  ;;  %v4447_v53 = vld [vmem:[#allocation3 + $0x20] sm:$0xff] }
 0x3d2   : > { %4435 = vst.msk [vmem:[#allocation3 + $0x40] sm:$0xff] %vm3030_vm3, %v4419_v10  ;;  %v6257_v32 = vpop.f32.mrb[68].mxu1  ;;  %v4616_v56 = vadd.f32 %v8745_v58, %v4447_v53  ;;  %v4645_v4 = vld [vmem:[#allocation3 + $0x8] sm:$0xff] }
 0x3d3   : > { %v4422_v3 = vadd.f32 %v6257_v32, %v4250_v23  ;;  %v4382_v48 = vpop.f32.mrb[69].mxu1  ;;  %4633 = vst.msk [vmem:[#allocation3 + $0x28] sm:$0xff] %vm3030_vm3, %v4617_v55  ;;  %v4644_v46 = vld [vmem:[#allocation3] sm:$0xff] }
 0x3d4   : > { %v4421_v24 = vadd.f32 %v4382_v48, %v4249_v51  ;;  %4632 = vst.msk [vmem:[#allocation3 + $0x20] sm:$0xff] %vm3030_vm3, %v4616_v56  ;;  %v4450_v45 = vld [vmem:[#allocation3 + $0x38] sm:$0xff] }
 0x3d5   : > { %4438 = vst.msk [vmem:[#allocation3 + $0x58] sm:$0xff] %vm3030_vm3, %v4422_v3  ;;  %v4619_v16 = vadd.f32 %v8748_v18, %v4450_v45  ;;  %v4449_v1 = vld [vmem:[#allocation3 + $0x30] sm:$0xff] }
 0x3d6   : > { %4437 = vst.msk [vmem:[#allocation3 + $0x50] sm:$0xff] %vm3030_vm3, %v4421_v24  ;;  %v6260_v35 = vpop.f32.mrb[70].mxu1  ;;  %v4618_v58 = vadd.f32 %v8751_v49, %v4449_v1  ;;  %v4647_v15 = vld [vmem:[#allocation3 + $0x18] sm:$0xff] }
 0x3d7   : > { %v4424_v8 = vadd.f32 %v6260_v35, %v4252_v11  ;;  %v4392_v20 = vpop.f32.mrb[71].mxu1  ;;  %4635 = vst.msk [vmem:[#allocation3 + $0x38] sm:$0xff] %vm3030_vm3, %v4619_v16  ;;  %v4646_v23 = vld [vmem:[#allocation3 + $0x10] sm:$0xff] }
 0x3d8   : > { %v4423_v12 = vadd.f32 %v4392_v20, %v4251_v59  ;;  %4634 = vst.msk [vmem:[#allocation3 + $0x30] sm:$0xff] %vm3030_vm3, %v4618_v58  ;;  %v4452_v33 = vld [vmem:[#allocation3 + $0x48] sm:$0xff] }
 0x3d9   : > { %4440 = vst.msk [vmem:[#allocation3 + $0x68] sm:$0xff] %vm3030_vm3, %v4424_v8  ;;  %v4621_v18 = vadd.f32 %v8754_v61, %v4452_v33  ;;  %v4451_v40 = vld [vmem:[#allocation3 + $0x40] sm:$0xff] }
 0x3da   : > { %4439 = vst.msk [vmem:[#allocation3 + $0x60] sm:$0xff] %vm3030_vm3, %v4423_v12  ;;  %v6263_v21 = vpop.f32.mrb[72].mxu1  ;;  %v4620_v49 = vadd.f32 %v8757_v31, %v4451_v40  ;;  %v4649_v48 = vld [vmem:[#allocation3 + $0x28] sm:$0xff] }
 0x3db   : > { %v4426_v38 = vadd.f32 %v6263_v21, %v4254_v14  ;;  %v4402_v42 = vpop.f32.mrb[73].mxu1  ;;  %4637 = vst.msk [vmem:[#allocation3 + $0x48] sm:$0xff] %vm3030_vm3, %v4621_v18  ;;  %v4648_v16 = vld [vmem:[#allocation3 + $0x20] sm:$0xff] }
 0x3dc   : > { %v4425_v39 = vadd.f32 %v4402_v42, %v4253_v0  ;;  %4636 = vst.msk [vmem:[#allocation3 + $0x40] sm:$0xff] %vm3030_vm3, %v4620_v49  ;;  %v4454_v43 = vld [vmem:[#allocation3 + $0x58] sm:$0xff] }
 0x3dd   : > { %4442 = vst.msk [vmem:[#allocation3 + $0x78] sm:$0xff] %vm3030_vm3, %v4426_v38  ;;  %v4623_v61 = vadd.f32 %v8760_v30, %v4454_v43  ;;  %v4453_v52 = vld [vmem:[#allocation3 + $0x50] sm:$0xff] }
 0x3de   : > { %4441 = vst.msk [vmem:[#allocation3 + $0x70] sm:$0xff] %vm3030_vm3, %v4425_v39  ;;  %v6294_v37 = vpop.f32.mrb[74].mxu1  ;;  %v4622_v31 = vadd.f32 %v8763_v44, %v4453_v52  ;;  %v4651_v59 = vld [vmem:[#allocation3 + $0x38] sm:$0xff] }
 0x3df   : > { %v4818_v63 = vadd.f32 %v6294_v37, %v4645_v4  ;;  %v4738_v25 = vpop.f32.mrb[75].mxu1  ;;  %4639 = vst.msk [vmem:[#allocation3 + $0x58] sm:$0xff] %vm3030_vm3, %v4623_v61  ;;  %v4650_v12 = vld [vmem:[#allocation3 + $0x30] sm:$0xff]  ;;  %v8933_v61 = vld [vmem:[#allocation13] ss:$0 sm:$0xff] }
 0x3e0   : > { %v4817_v2 = vadd.f32 %v4738_v25, %v4644_v46  ;;  %4638 = vst.msk [vmem:[#allocation3 + $0x50] sm:$0xff] %vm3030_vm3, %v4622_v31  ;;  %v4456_v22 = vld [vmem:[#allocation3 + $0x68] sm:$0xff] }
 0x3e1   : > { %4834 = vst.msk [vmem:[#allocation3 + $0x8] sm:$0xff] %vm3030_vm3, %v4818_v63  ;;  %v4625_v30 = vadd.f32 %v8766_v6, %v4456_v22  ;;  %v4455_v10 = vld [vmem:[#allocation3 + $0x60] sm:$0xff] }
 0x3e2   : > { %4833 = vst.msk [vmem:[#allocation3] sm:$0xff] %vm3030_vm3, %v4817_v2  ;;  %v6297_v55 = vpop.f32.mrb[76].mxu1  ;;  %v4624_v44 = vadd.f32 %v8769_v17, %v4455_v10  ;;  %v4653_v21 = vld [vmem:[#allocation3 + $0x48] sm:$0xff] }
 0x3e3   : > { %v4820_v53 = vadd.f32 %v6297_v55, %v4647_v15  ;;  %v4748_v32 = vpop.f32.mrb[77].mxu1  ;;  %4641 = vst.msk [vmem:[#allocation3 + $0x68] sm:$0xff] %vm3030_vm3, %v4625_v30  ;;  %v4652_v0 = vld [vmem:[#allocation3 + $0x40] sm:$0xff] }
 0x3e4   : > { %v4819_v56 = vadd.f32 %v4748_v32, %v4646_v23  ;;  %4640 = vst.msk [vmem:[#allocation3 + $0x60] sm:$0xff] %vm3030_vm3, %v4624_v44  ;;  %v4458_v3 = vld [vmem:[#allocation3 + $0x78] sm:$0xff] }
 0x3e5   : > { %4836 = vst.msk [vmem:[#allocation3 + $0x18] sm:$0xff] %vm3030_vm3, %v4820_v53  ;;  %v4627_v6 = vadd.f32 %v8772_v62, %v4458_v3  ;;  %v4457_v51 = vld [vmem:[#allocation3 + $0x70] sm:$0xff] }
 0x3e6   : > { %4835 = vst.msk [vmem:[#allocation3 + $0x10] sm:$0xff] %vm3030_vm3, %v4819_v56  ;;  %v6300_v24 = vpop.f32.mrb[78].mxu1  ;;  %v4626_v17 = vadd.f32 %v8775_v57, %v4457_v51  ;;  %v4655_v4 = vld [vmem:[#allocation3 + $0x58] sm:$0xff] }
 0x3e7   : > { %v4822_v45 = vadd.f32 %v6300_v24, %v4649_v48  ;;  %v4758_v1 = vpop.f32.mrb[79].mxu1  ;;  %4643 = vst.msk [vmem:[#allocation3 + $0x78] sm:$0xff] %vm3030_vm3, %v4627_v6  ;;  %v4654_v46 = vld [vmem:[#allocation3 + $0x50] sm:$0xff] }
 0x3e8   : > { %v4850_v11 = vld [vmem:[#allocation3 + $0x8] sm:$0xff]  ;;  %v4821_v35 = vadd.f32 %v4758_v1, %v4648_v16  ;;  %4642 = vst.msk [vmem:[#allocation3 + $0x70] sm:$0xff] %vm3030_vm3, %v4626_v17 }
 0x3e9   : > { %v5022_v58 = vadd.f32 %v8778_v60, %v4850_v11  ;;  %v4849_v8 = vld [vmem:[#allocation3] sm:$0xff]  ;;  %4838 = vst.msk [vmem:[#allocation3 + $0x28] sm:$0xff] %vm3030_vm3, %v4822_v45 }
 0x3ea   : > { %v5021_v62 = vadd.f32 %v8781_v7, %v4849_v8  ;;  %4837 = vst.msk [vmem:[#allocation3 + $0x20] sm:$0xff] %vm3030_vm3, %v4821_v35  ;;  %v6303_v57 = vpop.f32.mrb[80].mxu1  ;;  %v4657_v44 = vld [vmem:[#allocation3 + $0x68] sm:$0xff] }
 0x3eb   : > { %5038 = vst.msk [vmem:[#allocation3 + $0x8] sm:$0xff] %vm3030_vm3, %v5022_v58  ;;  %v4824_v20 = vadd.f32 %v6303_v57, %v4651_v59  ;;  %v4768_v33 = vpop.f32.mrb[81].mxu1  ;;  %v4656_v3 = vld [vmem:[#allocation3 + $0x60] sm:$0xff] }
 0x3ec   : > { %5037 = vst.msk [vmem:[#allocation3] sm:$0xff] %vm3030_vm3, %v5021_v62  ;;  %v4852_v18 = vld [vmem:[#allocation3 + $0x18] sm:$0xff]  ;;  %v4823_v40 = vadd.f32 %v4768_v33, %v4650_v12 }
 0x3ed   : > { %v5024_v60 = vadd.f32 %v8784_v26, %v4852_v18  ;;  %v4851_v14 = vld [vmem:[#allocation3 + $0x10] sm:$0xff]  ;;  %4840 = vst.msk [vmem:[#allocation3 + $0x38] sm:$0xff] %vm3030_vm3, %v4824_v20 }
 0x3ee   : > { %v5023_v7 = vadd.f32 %v8787_v47, %v4851_v14  ;;  %4839 = vst.msk [vmem:[#allocation3 + $0x30] sm:$0xff] %vm3030_vm3, %v4823_v40  ;;  %v6306_v49 = vpop.f32.mrb[82].mxu1  ;;  %v4659_v11 = vld [vmem:[#allocation3 + $0x78] sm:$0xff] }
 0x3ef   : > { %5040 = vst.msk [vmem:[#allocation3 + $0x18] sm:$0xff] %vm3030_vm3, %v5024_v60  ;;  %v4826_v38 = vadd.f32 %v6306_v49, %v4653_v21  ;;  %v4778_v42 = vpop.f32.mrb[83].mxu1  ;;  %v4658_v59 = vld [vmem:[#allocation3 + $0x70] sm:$0xff] }
 0x3f0   : > { %5039 = vst.msk [vmem:[#allocation3 + $0x10] sm:$0xff] %vm3030_vm3, %v5023_v7  ;;  %v4854_v39 = vld [vmem:[#allocation3 + $0x28] sm:$0xff]  ;;  %v4825_v43 = vadd.f32 %v4778_v42, %v4652_v0 }
 0x3f1   : > { %v5026_v26 = vadd.f32 %v8790_v36, %v4854_v39  ;;  %v4853_v52 = vld [vmem:[#allocation3 + $0x20] sm:$0xff]  ;;  %4842 = vst.msk [vmem:[#allocation3 + $0x48] sm:$0xff] %vm3030_vm3, %v4826_v38 }
 0x3f2   : > { %v5025_v47 = vadd.f32 %v8793_v9, %v4853_v52  ;;  %4841 = vst.msk [vmem:[#allocation3 + $0x40] sm:$0xff] %vm3030_vm3, %v4825_v43  ;;  %v6309_v37 = vpop.f32.mrb[84].mxu1  ;;  %v5054_v31 = vld [vmem:[#allocation3 + $0x8] sm:$0xff] }
 0x3f3   : > { %5042 = vst.msk [vmem:[#allocation3 + $0x28] sm:$0xff] %vm3030_vm3, %v5026_v26  ;;  %v4828_v63 = vadd.f32 %v6309_v37, %v4655_v4  ;;  %v4788_v25 = vpop.f32.mrb[85].mxu1  ;;  %v5053_v2 = vld [vmem:[#allocation3] sm:$0xff]  ;;  %v5077_v22 = vadd.f32 %v8933_v61, %v5054_v31 }
 0x3f4   : > { %5041 = vst.msk [vmem:[#allocation3 + $0x20] sm:$0xff] %vm3030_vm3, %v5025_v47  ;;  %v4856_v36 = vld [vmem:[#allocation3 + $0x38] sm:$0xff]  ;;  %v4827_v30 = vadd.f32 %v4788_v25, %v4654_v46  ;;  %v5076_v10 = vadd.f32 %v8933_v61, %v5053_v2 }
 0x3f5   : > { %v5028_v9 = vadd.f32 %v8796_v29, %v4856_v36  ;;  %v4855_v15 = vld [vmem:[#allocation3 + $0x30] sm:$0xff]  ;;  %4844 = vst.msk [vmem:[#allocation3 + $0x58] sm:$0xff] %vm3030_vm3, %v4828_v63  ;;  %v5093_v51 = vmax.f32 %v5077_v22, 0.0 }
 0x3f6   : > { %v5027_v55 = vadd.f32 %v8799_v28, %v4855_v15  ;;  %4843 = vst.msk [vmem:[#allocation3 + $0x50] sm:$0xff] %vm3030_vm3, %v4827_v30  ;;  %v6312_v53 = vpop.f32.mrb[86].mxu1  ;;  %v5092_v23 = vmax.f32 %v5076_v10, 0.0  ;;  %v5056_v32 = vld [vmem:[#allocation3 + $0x18] sm:$0xff] }
 0x3f7   : > { %5044 = vst.msk [vmem:[#allocation3 + $0x38] sm:$0xff] %vm3030_vm3, %v5028_v9  ;;  %v4830_v56 = vadd.f32 %v6312_v53, %v4657_v44  ;;  %v4798_v6 = vpop.f32.mrb[87].mxu1  ;;  %v5055_v48 = vld [vmem:[#allocation3 + $0x10] sm:$0xff]  ;;  %v5079_v29 = vadd.f32 %v8933_v61, %v5056_v32 }
 0x3f8   : > { %5043 = vst.msk [vmem:[#allocation3 + $0x30] sm:$0xff] %vm3030_vm3, %v5027_v55  ;;  %v4858_v24 = vld [vmem:[#allocation3 + $0x48] sm:$0xff]  ;;  %v4829_v17 = vadd.f32 %v4798_v6, %v4656_v3  ;;  %6344 = vmatprep.mubr.msk.f32.mxu1 %vm3030_vm3, %v5092_v23  ;;  %v5078_v28 = vadd.f32 %v8933_v61, %v5055_v48 }
 0x3f9   : > { %v5030_v45 = vadd.f32 %v8802_v13, %v4858_v24  ;;  %v4857_v16 = vld [vmem:[#allocation3 + $0x40] sm:$0xff]  ;;  %4846 = vst.msk [vmem:[#allocation3 + $0x68] sm:$0xff] %vm3030_vm3, %v4830_v56  ;;  %6345 = vmatmul.mubr.msk.f32.vlgmr.msra.gmra.mrb[90].mxu1 %vm3030_vm3, %v5093_v51  ;;  %v5095_v20 = vmax.f32 %v5079_v29, 0.0  ;;  %v6565_v29 = vld [vmem:[#allocation2 + $0x20] sm:$0xff] }
 0x3fa   : > { %v5029_v1 = vadd.f32 %v8805_v34, %v4857_v16  ;;  %4845 = vst.msk [vmem:[#allocation3 + $0x60] sm:$0xff] %vm3030_vm3, %v4829_v17  ;;  %v6315_v35 = vpop.f32.mrb[88].mxu1  ;;  %v5094_v58 = vmax.f32 %v5078_v28, 0.0  ;;  %v5058_v8 = vld [vmem:[#allocation3 + $0x28] sm:$0xff]  ;;  %v5310_v24 = vrot.slane %v6565_v29, 1 }
 0x3fb   : > { %5046 = vst.msk [vmem:[#allocation3 + $0x48] sm:$0xff] %vm3030_vm3, %v5030_v45  ;;  %v4832_v62 = vadd.f32 %v6315_v35, %v4659_v11  ;;  %v4808_v57 = vpop.f32.mrb[89].mxu1  ;;  %v5057_v13 = vld [vmem:[#allocation3 + $0x20] sm:$0xff]  ;;  %v5081_v12 = vadd.f32 %v8933_v61, %v5058_v8  ;;  %v6566_v17 = vld [vmem:[#allocation2 + $0x28] sm:$0x3]  ;;  %v6567_v45 = vld [vmem:[#allocation2 + $0x18] sm:$0xff] }
 0x3fc   : > { %5045 = vst.msk [vmem:[#allocation3 + $0x40] sm:$0xff] %vm3030_vm3, %v5029_v1  ;;  %v4860_v33 = vld [vmem:[#allocation3 + $0x58] sm:$0xff]  ;;  %v4831_v18 = vadd.f32 %v4808_v57, %v4658_v59  ;;  %6347 = vmatprep.mubr.msk.f32.mxu1 %vm3030_vm3, %v5094_v58  ;;  %v5080_v34 = vadd.f32 %v8933_v61, %v5057_v13  ;;  %v5312_v28 = vrot.slane %v6566_v17, 1  ;;  %v5309_v16 = vrot.slane %v6567_v45, 1  ;;  %v8999_v1 = vld [vmem:[#allocation16] ss:$0 sm:$0xff] }
 0x3fd   : > { %v5032_v40 = vadd.f32 %v8808_v19, %v4860_v33  ;;  %v4859_v60 = vld [vmem:[#allocation3 + $0x50] sm:$0xff]  ;;  %4848 = vst.msk [vmem:[#allocation3 + $0x78] sm:$0xff] %vm3030_vm3, %v4832_v62  ;;  %6348 = vmatmul.mubr.msk.f32.gmra.mrb[92].mxu1 %vm3030_vm3, %v5095_v20  ;;  %v5097_v49 = vmax.f32 %v5081_v12, 0.0  ;;  %v6568_v35 = vld [vmem:[#allocation2 + $0x38] sm:$0xff]  ;;  %v6570_v13 = vld [vmem:[#allocation2 + $0x30] sm:$0xff] }
 0x3fe   : > { %v5031_v14 = vadd.f32 %v8811_v54, %v4859_v60  ;;  %4847 = vst.msk [vmem:[#allocation3 + $0x70] sm:$0xff] %vm3030_vm3, %v4831_v18  ;;  %v5096_v7 = vmax.f32 %v5080_v34, 0.0  ;;  %v5060_v21 = vld [vmem:[#allocation3 + $0x38] sm:$0xff]  ;;  %v5315_v58 = vrot.slane %v6568_v35, 1  ;;  %v6569_v8 = vld [vmem:[#allocation2 + $0x40] sm:$0x3]  ;;  %v5311_v20 = vsel %vm3315_vm9, %v5309_v16, %v5310_v24 }
 0x3ff   : > { %5048 = vst.msk [vmem:[#allocation3 + $0x58] sm:$0xff] %vm3030_vm3, %v5032_v40  ;;  %v5059_v38 = vld [vmem:[#allocation3 + $0x30] sm:$0xff]  ;;  %v5083_v0 = vadd.f32 %v8933_v61, %v5060_v21  ;;  %v5317_v62 = vrot.slane %v6569_v8, 1  ;;  %v5314_v12 = vrot.slane %v6570_v13, 1  ;;  %v6572_v21 = vld [vmem:[#allocation2 + $0x58] sm:$0x3] }
 0x400   : > { %5047 = vst.msk [vmem:[#allocation3 + $0x50] sm:$0xff] %vm3030_vm3, %v5031_v14  ;;  %v4862_v19 = vld [vmem:[#allocation3 + $0x68] sm:$0xff]  ;;  %6350 = vmatprep.mubr.msk.f32.mxu1 %vm3030_vm3, %v5096_v7  ;;  %v5082_v42 = vadd.f32 %v8933_v61, %v5059_v38  ;;  %v6571_v14 = vld [vmem:[#allocation2 + $0x50] sm:$0xff] }
 0x401   : > { %v5034_v39 = vadd.f32 %v8814_v50, %v4862_v19  ;;  %v4861_v54 = vld [vmem:[#allocation3 + $0x60] sm:$0xff]  ;;  %6351 = vmatmul.mubr.msk.f32.gmra.mrb[94].mxu1 %vm3030_vm3, %v5097_v49  ;;  %v5099_v47 = vmax.f32 %v5083_v0, 0.0  ;;  %v5318_v60 = vsel %vm3315_vm9, %v5315_v58, %v5317_v62  ;;  %v5320_v7 = vrot.slane %v6571_v14, 1 }
 0x402   : > { %v5033_v43 = vadd.f32 %v8817_v27, %v4861_v54  ;;  %v5098_v26 = vmax.f32 %v5082_v42, 0.0  ;;  %v5062_v52 = vld [vmem:[#allocation3 + $0x48] sm:$0xff]  ;;  %v5322_v49 = vrot.slane %v6572_v21, 1  ;;  %v5316_v42 = vsel %vm3315_vm9, %v5314_v12, %v5315_v58  ;;  %v6581_v58 = vld [vmem:[#allocation2 + $0xa0] sm:$0x3]  ;;  %v6582_v13 = vld [vmem:[#allocation2 + $0x90] sm:$0xff] }
 0x403   : > { %5050 = vst.msk [vmem:[#allocation3 + $0x68] sm:$0xff] %vm3030_vm3, %v5034_v39  ;;  %v5061_v4 = vld [vmem:[#allocation3 + $0x40] sm:$0xff]  ;;  %v5085_v37 = vadd.f32 %v8933_v61, %v5062_v52  ;;  %v6573_v39 = vld [vmem:[#allocation2 + $0x48] sm:$0xff]  ;;  %v5337_v8 = vrot.slane %v6581_v58, 1  ;;  %v5334_v12 = vrot.slane %v6582_v13, 1 }
 0x404   : > { %5049 = vst.msk [vmem:[#allocation3 + $0x60] sm:$0xff] %vm3030_vm3, %v5033_v43  ;;  %v4864_v31 = vld [vmem:[#allocation3 + $0x78] sm:$0xff]  ;;  %6353 = vmatprep.mubr.msk.f32.mxu1 %vm3030_vm3, %v5098_v26  ;;  %v5084_v50 = vadd.f32 %v8933_v61, %v5061_v4  ;;  %v5319_v54 = vrot.slane %v6573_v39, 1 }
 0x405   : > { %v5036_v63 = vadd.f32 %v8820_v5, %v4864_v31  ;;  %v4863_v46 = vld [vmem:[#allocation3 + $0x70] sm:$0xff]  ;;  %6354 = vmatmul.mubr.msk.f32.gmra.mrb[96].mxu1 %vm3030_vm3, %v5099_v47  ;;  %v5101_v22 = vmax.f32 %v5085_v37, 0.0  ;;  %v5323_v37 = vsel %vm3315_vm9, %v5320_v7, %v5322_v49  ;;  %v6574_v31 = vld [vmem:[#allocation2 + $0x68] sm:$0xff]  ;;  %v6584_v49 = vld [vmem:[#allocation2 + $0xb8] sm:$0x3] }
 0x406   : > { %v5035_v27 = vadd.f32 %v8823_v41, %v4863_v46  ;;  %v5100_v25 = vmax.f32 %v5084_v50, 0.0  ;;  %v5064_v2 = vld [vmem:[#allocation3 + $0x58] sm:$0xff]  ;;  %v5325_v50 = vrot.slane %v6574_v31, 1 }
 0x407   : > { %5052 = vst.msk [vmem:[#allocation3 + $0x78] sm:$0xff] %vm3030_vm3, %v5036_v63  ;;  %v5063_v36 = vld [vmem:[#allocation3 + $0x50] sm:$0xff]  ;;  %v5087_v30 = vadd.f32 %v8933_v61, %v5064_v2  ;;  %v6575_v63 = vld [vmem:[#allocation2 + $0x70] sm:$0x3] }
 0x408   : > { %5051 = vst.msk [vmem:[#allocation3 + $0x70] sm:$0xff] %vm3030_vm3, %v5035_v27  ;;  %6356 = vmatprep.mubr.msk.f32.mxu1 %vm3030_vm3, %v5100_v25  ;;  %v5086_v10 = vadd.f32 %v8933_v61, %v5063_v36  ;;  %v5327_v46 = vrot.slane %v6575_v63, 1  ;;  %v6576_v36 = vld [vmem:[#allocation2 + $0x60] sm:$0xff] }
 0x409   : > { %6357 = vmatmul.mubr.msk.f32.gmra.mrb[98].mxu1 %vm3030_vm3, %v5101_v22  ;;  %v5103_v15 = vmax.f32 %v5087_v30, 0.0  ;;  %v5321_v22 = vsel %vm3315_vm9, %v5319_v54, %v5320_v7  ;;  %v5324_v30 = vrot.slane %v6576_v36, 1  ;;  %v6583_v7 = vld [vmem:[#allocation2 + $0xb0] sm:$0xff]  ;;  %v6585_v54 = vld [vmem:[#allocation2 + $0xa8] sm:$0xff] }
 0x40a   : > { %v5102_v5 = vmax.f32 %v5086_v10, 0.0  ;;  %v5066_v9 = vld [vmem:[#allocation3 + $0x68] sm:$0xff]  ;;  %v5340_v21 = vrot.slane %v6583_v7, 1 }
 0x40b   : > { %v5065_v41 = vld [vmem:[#allocation3 + $0x60] sm:$0xff]  ;;  %v5089_v55 = vadd.f32 %v8933_v61, %v5066_v9 }
 0x40c   : > { %6359 = vmatprep.mubr.msk.f32.mxu1 %vm3030_vm3, %v5102_v5  ;;  %v5088_v44 = vadd.f32 %v8933_v61, %v5065_v41 }
 0x40d   : > { %6360 = vmatmul.mubr.msk.f32.gmra.mrb[100].mxu1 %vm3030_vm3, %v5103_v15  ;;  %v5105_v32 = vmax.f32 %v5089_v55, 0.0  ;;  %v5328_v55 = vsel %vm3315_vm9, %v5325_v50, %v5327_v46  ;;  %v6587_v46 = vld [vmem:[#allocation2 + $0xd0] sm:$0x3] }
 0x40e   : > { %v5104_v53 = vmax.f32 %v5088_v44, 0.0  ;;  %v5068_v23 = vld [vmem:[#allocation3 + $0x78] sm:$0xff]  ;;  %v6577_v44 = vld [vmem:[#allocation2 + $0x80] sm:$0xff] }
 0x40f   : > { %v5067_v56 = vld [vmem:[#allocation3 + $0x70] sm:$0xff]  ;;  %v5091_v3 = vadd.f32 %v8933_v61, %v5068_v23  ;;  %v6578_v23 = vld [vmem:[#allocation2 + $0x88] sm:$0x3] }
 0x410   : > { %6362 = vmatprep.mubr.msk.f32.mxu1 %vm3030_vm3, %v5104_v53  ;;  %v5090_v6 = vadd.f32 %v8933_v61, %v5067_v56  ;;  %v5313_v61 = vsel %vm3315_vm9, %v5310_v24, %v5312_v28  ;;  %v5330_v53 = vrot.slane %v6577_v44, 1 }
 0x411   : > { %6363 = vmatmul.mubr.msk.f32.gmra.mrb[102].mxu1 %vm3030_vm3, %v5105_v32  ;;  %v5107_v48 = vmax.f32 %v5091_v3, 0.0  ;;  %v5332_v32 = vrot.slane %v6578_v23, 1 }
 0x412   : > { %v5106_v51 = vmax.f32 %v5090_v6, 0.0 }
 0x414   : > { %6365 = vmatprep.mubr.msk.f32.mxu1 %vm3030_vm3, %v5106_v51  ;;  %v5326_v51 = vsel %vm3315_vm9, %v5324_v30, %v5325_v50  ;;  %v6586_v50 = vld [vmem:[#allocation2 + $0xc8] sm:$0xff]  ;;  %v6588_v30 = vld [vmem:[#allocation2 + $0xc0] sm:$0xff] }
 0x415   : > { %6366 = vmatmul.mubr.msk.f32.gmra.mrb[104].mxu1 %vm3030_vm3, %v5107_v48  ;;  %v6579_v48 = vld [vmem:[#allocation2 + $0x78] sm:$0xff]  ;;  %v5345_v63 = vrot.slane %v6586_v50, 1 }
 0x416   : > { %v5329_v29 = vrot.slane %v6579_v48, 1 }
 0x4cc   : > { %v6346_v11 = vpop.f32.mrb[90].mxu1 }
 0x4cd   : > { %v5236_v59 = vadd.f32 %v6346_v11, %v8999_v1  ;;  %v5230_v57 = vpop.f32.mrb[91].mxu1  ;;  %v5333_v11 = vsel %vm3315_vm9, %v5330_v53, %v5332_v32 }
 0x4ce   : > { %v5231_v33 = vadd.f32 %v8999_v1, %v5230_v57 }
 0x4cf   : > { %v5366_v18 = vadd.f32 %v5313_v61, %v5236_v59  ;;  %v6580_v61 = vld [vmem:[#allocation2 + $0x98] sm:$0xff] }
 0x4d0   : > { %v5365_v34 = vadd.f32 %v5311_v20, %v5231_v33  ;;  %v6349_v40 = vpop.f32.mrb[92].mxu1  ;;  %v5335_v35 = vrot.slane %v6580_v61, 1  ;;  %v5331_v20 = vsel %vm3315_vm9, %v5329_v29, %v5330_v53 }
 0x4d1   : > { %v5382_v38 = vmax.f32 %v5366_v18, 0.0  ;;  %v5246_v0 = vadd.f32 %v6349_v40, %v8999_v1  ;;  %v5240_v19 = vpop.f32.mrb[93].mxu1 }
 0x4d2   : > { %v5381_v43 = vmax.f32 %v5365_v34, 0.0  ;;  %v5241_v26 = vadd.f32 %v8999_v1, %v5240_v19  ;;  %v5338_v14 = vsel %vm3315_vm9, %v5335_v35, %v5337_v8  ;;  %v5336_v39 = vsel %vm3315_vm9, %v5334_v12, %v5335_v35 }
 0x4d3   : > { %5398 = vst.msk [vmem:[%s9010_s0 + $0x8] sm:$0xff] %vm515_vm1, %v5382_v38  ;;  %v5368_v52 = vadd.f32 %v5318_v60, %v5246_v0  ;;  %v5342_v38 = vrot.slane %v6584_v49, 1 }
 0x4d4   : > { %5397 = vst.msk [vmem:[%s9010_s0] sm:$0xff] %vm515_vm1, %v5381_v43  ;;  %v5367_v47 = vadd.f32 %v5316_v42, %v5241_v26  ;;  %v6352_v4 = vpop.f32.mrb[94].mxu1  ;;  %v5339_v43 = vrot.slane %v6585_v54, 1 }
 0x4d5   : > { %v5384_v27 = vmax.f32 %v5368_v52, 0.0  ;;  %v5256_v25 = vadd.f32 %v6352_v4, %v8999_v1  ;;  %v5250_v2 = vpop.f32.mrb[95].mxu1  ;;  %v5343_v31 = vsel %vm3315_vm9, %v5340_v21, %v5342_v38 }
 0x4d6   : > { %v5383_v10 = vmax.f32 %v5367_v47, 0.0  ;;  %v5251_v5 = vadd.f32 %v8999_v1, %v5250_v2  ;;  %v5341_v36 = vsel %vm3315_vm9, %v5339_v43, %v5340_v21 }
 0x4d7   : > { %5400 = vst.msk [vmem:[%s9010_s0 + $0x18] sm:$0xff] %vm515_vm1, %v5384_v27  ;;  %v5370_v9 = vadd.f32 %v5323_v37, %v5256_v25  ;;  %v5347_v27 = vrot.slane %v6587_v46, 1 }
 0x4d8   : > { %5399 = vst.msk [vmem:[%s9010_s0 + $0x10] sm:$0xff] %vm515_vm1, %v5383_v10  ;;  %v5369_v15 = vadd.f32 %v5321_v22, %v5251_v5  ;;  %v6355_v41 = vpop.f32.mrb[96].mxu1  ;;  %v5344_v10 = vrot.slane %v6588_v30, 1 }
 0x4d9   : > { %v5386_v56 = vmax.f32 %v5370_v9, 0.0  ;;  %v5266_v3 = vadd.f32 %v6355_v41, %v8999_v1  ;;  %v5260_v6 = vpop.f32.mrb[97].mxu1  ;;  %v5348_v44 = vsel %vm3315_vm9, %v5345_v63, %v5347_v27 }
 0x4da   : > { %v5385_v24 = vmax.f32 %v5369_v15, 0.0  ;;  %v5261_v17 = vadd.f32 %v8999_v1, %v5260_v6 }
 0x4db   : > { %5402 = vst.msk [vmem:[%s9010_s0 + $0x28] sm:$0xff] %vm515_vm1, %v5386_v56  ;;  %v5372_v28 = vadd.f32 %v5328_v55, %v5266_v3  ;;  %v5346_v56 = vsel %vm3315_vm9, %v5344_v10, %v5345_v63 }
 0x4dc   : > { %5401 = vst.msk [vmem:[%s9010_s0 + $0x20] sm:$0xff] %vm515_vm1, %v5385_v24  ;;  %v5371_v45 = vadd.f32 %v5326_v51, %v5261_v17  ;;  %v6358_v16 = vpop.f32.mrb[98].mxu1 }
 0x4dd   : > { %v5388_v62 = vmax.f32 %v5372_v28, 0.0  ;;  %v5276_v59 = vadd.f32 %v6358_v16, %v8999_v1  ;;  %v5270_v57 = vpop.f32.mrb[99].mxu1 }
 0x4de   : > { %v5387_v33 = vmax.f32 %v5371_v45, 0.0  ;;  %v5271_v18 = vadd.f32 %v8999_v1, %v5270_v57 }
 0x4df   : > { %5404 = vst.msk [vmem:[%s9010_s0 + $0x38] sm:$0xff] %vm515_vm1, %v5388_v62  ;;  %v5374_v34 = vadd.f32 %v5333_v11, %v5276_v59 }
 0x4e0   : > { %5403 = vst.msk [vmem:[%s9010_s0 + $0x30] sm:$0xff] %vm515_vm1, %v5387_v33  ;;  %v5373_v40 = vadd.f32 %v5331_v20, %v5271_v18  ;;  %v6361_v60 = vpop.f32.mrb[100].mxu1 }
 0x4e1   : > { %v5390_v0 = vmax.f32 %v5374_v34, 0.0  ;;  %v5286_v19 = vadd.f32 %v6361_v60, %v8999_v1  ;;  %v5280_v42 = vpop.f32.mrb[101].mxu1 }
 0x4e2   : > { %v5389_v26 = vmax.f32 %v5373_v40, 0.0  ;;  %v5281_v52 = vadd.f32 %v8999_v1, %v5280_v42 }
 0x4e3   : > { %5406 = vst.msk [vmem:[%s9010_s0 + $0x48] sm:$0xff] %vm515_vm1, %v5390_v0  ;;  %v5376_v47 = vadd.f32 %v5338_v14, %v5286_v19 }
 0x4e4   : > { %5405 = vst.msk [vmem:[%s9010_s0 + $0x40] sm:$0xff] %vm515_vm1, %v5389_v26  ;;  %v5375_v4 = vadd.f32 %v5336_v39, %v5281_v52  ;;  %v6364_v37 = vpop.f32.mrb[102].mxu1 }
 0x4e5   : > { %v5392_v25 = vmax.f32 %v5376_v47, 0.0  ;;  %v5296_v2 = vadd.f32 %v6364_v37, %v8999_v1  ;;  %v5290_v22 = vpop.f32.mrb[103].mxu1 }
 0x4e6   : > { %v5391_v5 = vmax.f32 %v5375_v4, 0.0  ;;  %v5291_v9 = vadd.f32 %v8999_v1, %v5290_v22 }
 0x4e7   : > { %5408 = vst.msk [vmem:[%s9010_s0 + $0x58] sm:$0xff] %vm515_vm1, %v5392_v25  ;;  %v5378_v15 = vadd.f32 %v5343_v31, %v5296_v2 }
 0x4e8   : > { %5407 = vst.msk [vmem:[%s9010_s0 + $0x50] sm:$0xff] %vm515_vm1, %v5391_v5  ;;  %v5377_v41 = vadd.f32 %v5341_v36, %v5291_v9  ;;  %v6367_v55 = vpop.f32.mrb[104].mxu1 }
 0x4e9   : > { %v5394_v53 = vmax.f32 %v5378_v15, 0.0  ;;  %v5306_v23 = vadd.f32 %v6367_v55, %v8999_v1  ;;  %v5300_v32 = vpop.f32.mrb[105].mxu1 }
 0x4ea   : > { %v5393_v3 = vmax.f32 %v5377_v41, 0.0  ;;  %v5301_v6 = vadd.f32 %v8999_v1, %v5300_v32 }
 0x4eb   : > { %5410 = vst.msk [vmem:[%s9010_s0 + $0x68] sm:$0xff] %vm515_vm1, %v5394_v53  ;;  %v5380_v51 = vadd.f32 %v5348_v44, %v5306_v23 }
 0x4ec   : > { %5409 = vst.msk [vmem:[%s9010_s0 + $0x60] sm:$0xff] %vm515_vm1, %v5393_v3  ;;  %v5379_v48 = vadd.f32 %v5346_v56, %v5301_v6 }
 0x4ed   : > { %v5396_v29 = vmax.f32 %v5380_v51, 0.0 }
 0x4ee   : > { %v5395_v24 = vmax.f32 %v5379_v48, 0.0 }
 0x4ef   : > { %5412 = vst.msk [vmem:[%s9010_s0 + $0x78] sm:$0xff] %vm515_vm1, %v5396_v29 }
 0x4f0   : > { %5411 = vst.msk [vmem:[%s9010_s0 + $0x70] sm:$0xff] %vm515_vm1, %v5395_v24 }
 0x4f1   : > { %6835 = shalt.err (!%p6832_p4)
}
 0x4f2   : > { %s6836_s13 = scalar_lea.hbm %s9072_s27, 2048  ;;  %s6840_s19 = scalar_lea.hbm %s9293_s22, 8192 }
 0x4f3   : > { %p6837_p2 = scmp.ne.s32.totalorder %s9072_s27, %s6836_s13  ;;  %p6841_p8 = scmp.lt.u32.totalorder %s9072_s27, %s9293_s22 }
 0x4f4   : > { %p6842_p9 = scmp.lt.u32.totalorder %s6840_s19, %s6836_s13  ;;  %p6844_p6 = scmp.lt.u32.totalorder %s6836_s13, %s9072_s27 }
 0x4f5   : > { %p6838_p11 = pnand %p6837_p2, %p9294_p10 }
 0x4f6   : > { %p6843_p1 = por %p6842_p9, %p6841_p8 }
 0x4f7   : > { %p6839_p12 = pneg %p6838_p11 }
 0x4f8   : > { %p6845_p0 = por %p6844_p6, %p6843_p1 }
 0x4fa   : > { %p6846_p7 = pnand %p6845_p0, %p6839_p12 }
 0x4fc   : > { %6849 = shalt.err (!%p6846_p7)
}
 0x4fd   : > { %s6987_s11 = smov 128   ;;  %s6988_s25 = smov 8  }
 0x4fe   : > { %6409 = dma.vmem_to_hbm [thread:$0]  (%p9294_p10), %s9067_s26, 2048, %s9072_s27, %s5414_s18, %s6987_s11, %s6987_s11, %s6988_s25  }
 0x4ff PF: > { %s9295_s21 = sld [smem:[#allocation27_spill]]  ;;  %s9296_s17 = sld [smem:[#allocation38_spill]] }
 0x500   : > { %p6446_p3 = scmp.ge.s32.totalorder %s6966_s15, 2 }
 0x505   : > { %s5445_s8 = sand.u32 1, %s9295_s21   ;;  %p9297_p5 = scmp.ne.s32.totalorder %s9296_s17, 0 }
 0x506   : > { %s5446_s16 = scalar_lea.sflag [#allocation6], %s5445_s8 }
 0x507   : > { %p6431_p13 = pnand %p6446_p3, %p9297_p5 }
 0x509   : > { %6919 = dma.done.wait (!%p6431_p13), %s5446_s16, 2048  }
 0x50a   : > { %6921 = vsyncadd (!%p6431_p13), %s5446_s16, 4294965248  ;;  %s30_s15 = sadd.s32 1, %s6966_s15   ;;  %s9298_s27 = sld [smem:[#allocation26_spill]] }
 0x50b   : > { %p27_p4 = scmp.ge.s32.totalorder %s30_s15, 6   ;;  %s9299_s1 = sld [smem:[#allocation35_spill]] }
 0x50c   : > { %s9300_s20 = sld [smem:[#allocation34_spill]]  ;;  %s9301_s11 = sld [smem:[#allocation30_spill]] }
 0x50d   : > { %s9302_s13 = sld [smem:[#allocation32_spill]]  ;;  %s9303_s5 = sld [smem:[#allocation33_spill]] }
 0x50e   : > { %s9304_s28 = smov %s6934_s29  ;;  %s9306_s30 = smov %s6942_s9 }
 0x50f   : > { %s9307_s9 = smov %s6946_s10  ;;  %s9309_s12 = smov %s6962_s14 }
 0x510   :  { %29 = sbr.rel (!%p27_p4) target bundleno = 20 (0x14), region = 143 }
 0x511   : > { %s9305_s29 = smov %s9299_s1 }
 0x512   : > { %s9308_s10 = smov %s9300_s20 }
 0x513   : > { %s9310_s14 = smov %s9303_s5 }
 0x517   :  { %5451 = vsyncpa [#allocation5], 1 }
 0x518   :  { %5453 = vsyncpa [#allocation5 + $0x1], 1 }
 0x519   :  { %5454 = vsyncpa [#allocation8], 1 }
 0x51a   :  { %5456 = vsyncpa [#allocation8 + $0x1], 1 }
 0x51b   :  { %5457 = vsyncpa [#allocation11], 1 }
 0x51c   :  { %5458 = vsyncpa [#allocation14], 1 }
 0x51d   :  { %5459 = vsyncpa [#allocation17], 1 }
 0x51e   :  { %5460 = vsyncpa [#allocation6], 1 }
 0x51f   :  { %5462 = vsyncpa [#allocation6 + $0x1], 1 }

</bundles_post_ra>
